<compile_context>
chip_gen: v7x
topology: tpu7x:2x2x1
jax: 0.10.0
libtpu: 0.0.40
codegen_flags: <defaults>
</compile_context>

<pallas_src>
import functools
import math

import jax
import jax.numpy as jnp
from jax.experimental import pallas as pl
from jax.experimental.pallas import tpu as pltpu


# ---------------------------------------------------------------------------
# Kernel
# ---------------------------------------------------------------------------
def attention_block_kernel(x_ref, w_gtp_ref, b_gtp_ref, w_out_ref, b_out_ref,
                           z_ref, *, d, dp, jc, use_bf16_ef):
    tb = x_ref.shape[0]
    x = x_ref[...]                                            # (TB, C) f32

    # Fused g/theta/phi projection: one MXU pass, bf16 operands, f32 accumulate.
    proj = jnp.dot(x.astype(jnp.bfloat16), w_gtp_ref[...],
                   preferred_element_type=jnp.float32) + b_gtp_ref[...]
    # dp is a multiple of 128 (padded in pack_params) -> lane-tile-aligned slices.
    g_x = proj[:, :dp]                                        # (TB, Dp)
    theta_x = proj[:, dp:2 * dp]                              # (TB, Dp)
    phi_x = proj[:, 2 * dp:]                                  # (TB, Dp)

    # Rank-1 structure of f[i, j] = phi[i] * theta[j]:
    #   max_j f[i, j] = phi[i] * theta_max  (phi >= 0)  else  phi[i] * theta_min
    # -> O(TB*Dp) work instead of a (TB, Dp, Dp) reduction.  Padded theta
    # columns are 0, which only makes f_max a (still valid) looser upper bound.
    theta_max = jnp.max(theta_x, axis=-1, keepdims=True)      # (TB, 1)
    theta_min = jnp.min(theta_x, axis=-1, keepdims=True)      # (TB, 1)
    f_max = jnp.where(phi_x >= 0, phi_x * theta_max, phi_x * theta_min)  # (TB, Dp)

    # i-indexed operands broadcast once (hoisted; reused by every j-chunk).
    phi_b = jnp.broadcast_to(phi_x[:, None, :], (tb, jc, dp))    # (TB, JC, Dp)
    marg_b = jnp.broadcast_to(f_max[:, None, :], (tb, jc, dp))   # (TB, JC, Dp)

    # Streaming softmax: j lives on the SUBLANE axis, i on LANES, so both
    # reductions are sublane accumulations (VALU) instead of 128-lane XLU
    # reductions, and only one (TB, JC, Dp) exp chunk is live at a time.
    num = jnp.zeros((tb, dp), jnp.float32)
    den = jnp.zeros((tb, dp), jnp.float32)
    for s in range(dp // jc):
        j0 = s * jc
        th = theta_x[:, j0:j0 + jc][:, :, None]    # (TB, JC, 1)  theta_j on sublanes
        gg = g_x[:, j0:j0 + jc][:, :, None]        # (TB, JC, 1)  g_j on sublanes
        arg = th * phi_b - marg_b                  # (TB, JC, Dp) f32
        if use_bf16_ef:
            arg = arg.astype(jnp.bfloat16)         # bf16 EUP exp (v6e / v7x only)
        ef = jnp.exp(arg).astype(jnp.float32)      # f32 for the accumulations
        num = num + jnp.sum(ef * gg, axis=1)       # (TB, Dp)
        den = den + jnp.sum(ef, axis=1)            # (TB, Dp)

    # Padded j columns (zero weights/bias => theta_j = g_j = 0) contributed
    # exp(-f_max) each to den and nothing to num; remove them analytically.
    if dp != d:
        den = den - float(dp - d) * jnp.exp(-f_max)

    y = num * pl.reciprocal(den, approx=True)      # (TB, Dp), already lane-major

    # Output projection Dp -> C (padded rows of W are zero) + residual.
    w_y = jnp.dot(y.astype(jnp.bfloat16), w_out_ref[...],
                  preferred_element_type=jnp.float32) + b_out_ref[...]
    z_ref[...] = (w_y + x).astype(z_ref.dtype)


# ---------------------------------------------------------------------------
# Generation detection + sizing helpers
# ---------------------------------------------------------------------------
def _round_up(x, m):
    return ((x + m - 1) // m) * m


def _device_kind():
    try:
        return jax.devices()[0].device_kind.lower()
    except Exception:  # pragma: no cover - no TPU visible
        return ""


def _is_v7(kind):
    return "7" in kind


def _default_use_bf16_ef(kind):
    # bf16 VPU/EUP exist from v6e on; v5e (and older) gain nothing from the
    # bf16 pack/unpack, so keep the exp argument in f32 there.
    return not any(t in kind for t in ("v2", "v3", "v4", "v5"))


def _vmem_bytes(tb, c, dp, jc):
    io = 2 * 2 * tb * c * 4                                    # x + z tiles, double-buffered
    weights = 2 * ((c * 3 * dp + dp * c) * 2 + (3 * dp + c) * 4)  # 2 pipeline buffers each
    chunk = 5 * tb * jc * dp * 4                               # hoisted broadcasts + chunk temps
    vecs = 12 * tb * dp * 4                                    # proj slices, f_max, num, den, y
    return io + weights + chunk + vecs


def _pick_block_b(batch, c, dp, jc, kind):
    budget = (40 if _is_v7(kind) else 56) * 1024 * 1024
    cap = 128 if _is_v7(kind) else 256
    cands = [t for t in (256, 128, 64, 32, 16, 8) if t <= cap]
    # Prefer >= 2 evenly sized grid steps: per-step overhead (~0.35us) stays a
    # small fraction of the body and the "parallel" axis can feed both v7x TCs.
    for tb in cands:
        if 2 * tb <= batch and batch % tb == 0 and _vmem_bytes(tb, c, dp, jc) <= budget:
            return tb
    for tb in cands:
        if tb <= batch and _vmem_bytes(tb, c, dp, jc) <= budget:
            return tb
    return max(1, min(batch, 8))


def _vmem_limit(tb, c, dp, jc, kind):
    est = _vmem_bytes(tb, c, dp, jc)
    cap = (48 if _is_v7(kind) else 96) * 1024 * 1024   # < 64 MiB physical on v7x
    return int(min(cap, max(32 * 1024 * 1024, 1.25 * est)))


# ---------------------------------------------------------------------------
# Wrapper
# ---------------------------------------------------------------------------
def attention_block(x, packed_params, *, block_b=None, use_bf16_ef=None,
                    donate_x=True):
    """AttentionBlock forward: z = W(softmax_rows(phi(x) theta(x)^T) g(x)) + x.

    x:             (B, C) float32.
    packed_params: output of pack_params(): w_gtp bf16 (C, 3*Dp), b_gtp f32
                   (1, 3*Dp), w_out bf16 (Dp, C), b_out f32 (1, C), with
                   Dp = round_up(C // 8, 128).
    donate_x:      when True (default) the output aliases x's HBM buffer
                   (input_output_aliases={0: 0}) — do NOT reuse `x` afterwards.
    """
    b, c = x.shape
    w_gtp, b_gtp, w_out, b_out = packed_params
    dp = w_out.shape[0]            # padded inner dim (multiple of 128)
    d = c // 8                     # true inner dim of the PyTorch module
    jc = 16                        # j-chunk: 2 sublane groups per streaming step

    kind = _device_kind()
    if use_bf16_ef is None:
        use_bf16_ef = _default_use_bf16_ef(kind)
    if block_b is None:
        block_b = _pick_block_b(b, c, dp, jc, kind)
    block_b = max(1, min(block_b, b))
    grid = (pl.cdiv(b, block_b),)

    kernel = functools.partial(attention_block_kernel, d=d, dp=dp, jc=jc,
                               use_bf16_ef=use_bf16_ef)

    def const2d(shape):
        # Constant index_map: weight/bias tiles stay VMEM-resident across steps.
        return pl.BlockSpec(shape, lambda i: (0, 0))

    return pl.pallas_call(
        kernel,
        out_shape=jax.ShapeDtypeStruct((b, c), x.dtype),
        grid_spec=pltpu.PrefetchScalarGridSpec(
            num_scalar_prefetch=0,
            grid=grid,
            in_specs=[
                pl.BlockSpec((block_b, c), lambda i: (i, 0)),   # x tile
                const2d((c, 3 * dp)),                           # fused g/theta/phi weight
                const2d((1, 3 * dp)),                           # fused bias
                const2d((dp, c)),                               # W (output projection)
                const2d((1, c)),                                # W bias
            ],
            out_specs=pl.BlockSpec((block_b, c), lambda i: (i, 0)),
        ),
        compiler_params=pltpu.CompilerParams(
            dimension_semantics=("parallel",),
            vmem_limit_bytes=_vmem_limit(block_b, c, dp, jc, kind),
        ),
        input_output_aliases={0: 0} if donate_x else {},
    )(x, w_gtp, b_gtp, w_out, b_out)


# ---------------------------------------------------------------------------
# Reference + params
# ---------------------------------------------------------------------------
def attention_block_ref(x, raw_params):
    """Pure-JAX f32 reference mirroring the PyTorch forward."""
    wg, bg, wt, bt, wp, bp, ww, bw = raw_params
    g_x = x @ wg + bg
    theta_x = x @ wt + bt
    phi_x = x @ wp + bp
    f = phi_x[:, :, None] * theta_x[:, None, :]
    f_div_c = jax.nn.softmax(f, axis=-1)
    y = jnp.sum(f_div_c * g_x[:, None, :], axis=-1)
    return y @ ww + bw + x


def init_params(key, in_channels):
    c = in_channels
    d = c // 8
    ks = jax.random.split(key, 8)
    s_in = 0.5 / math.sqrt(c)
    s_out = 0.2 / math.sqrt(d)
    s_b = 0.05
    wg = s_in * jax.random.normal(ks[0], (c, d), jnp.float32)
    bg = s_b * jax.random.normal(ks[1], (1, d), jnp.float32)
    wt = s_in * jax.random.normal(ks[2], (c, d), jnp.float32)
    bt = s_b * jax.random.normal(ks[3], (1, d), jnp.float32)
    wp = s_in * jax.random.normal(ks[4], (c, d), jnp.float32)
    bp = s_b * jax.random.normal(ks[5], (1, d), jnp.float32)
    ww = s_out * jax.random.normal(ks[6], (d, c), jnp.float32)
    bw = s_b * jax.random.normal(ks[7], (1, c), jnp.float32)
    return (wg, bg, wt, bt, wp, bp, ww, bw)


def pack_params(raw_params):
    """Fuse g/theta/phi into (C, 3*Dp) bf16 with each slot padded to a
    128-lane multiple (zero weights/bias), and pad W to (Dp, C) with zero rows
    so the kernel's projection slices are always lane-tile aligned."""
    wg, bg, wt, bt, wp, bp, ww, bw = raw_params
    c, d = wg.shape
    dp = max(128, _round_up(d, 128))

    def padw(w):
        return jnp.pad(w, ((0, 0), (0, dp - d)))

    def padb(b):
        return jnp.pad(b, ((0, 0), (0, dp - d)))

    w_gtp = jnp.concatenate([padw(wg), padw(wt), padw(wp)],
                            axis=1).astype(jnp.bfloat16)
    b_gtp = jnp.concatenate([padb(bg), padb(bt), padb(bp)],
                            axis=1).astype(jnp.float32)
    w_out = jnp.pad(ww, ((0, dp - d), (0, 0))).astype(jnp.bfloat16)
    b_out = bw.astype(jnp.float32)
    return (w_gtp, b_gtp, w_out, b_out)


# ---------------------------------------------------------------------------
# Test
# ---------------------------------------------------------------------------
if __name__ == "__main__":
    key = jax.random.PRNGKey(0)
    k_x, k_p = jax.random.split(key)

    # Small but lane-dense: C=1024 -> D=128 (full lane width).  B=16 makes the
    # default picker choose 2 evenly sized grid steps, so batch tiling and the
    # x/z pipeline are actually exercised (this is a correctness run, not a
    # benchmark shape).
    B, C = 16, 1024
    x = jax.random.normal(k_x, (B, C), jnp.float32)
    raw_params = init_params(k_p, C)
    packed = pack_params(raw_params)

    # Reference computed BEFORE the kernel: the kernel (with donate_x=True)
    # aliases x's HBM buffer into the output.
    z_ref = attention_block_ref(x, raw_params)

    z = attention_block(x, packed)
    z = jax.block_until_ready(z)

    max_err = float(jnp.max(jnp.abs(z - z_ref)))
    # bf16 MXU operands (+ bf16 exp on v6e/v7x) and approx reciprocal ->
    # loosened tolerance vs the f32 reference.
    assert jnp.allclose(z, z_ref, atol=2e-2, rtol=2e-2), (
        f"mismatch vs reference (max abs err {max_err})")
    print("KERNEL_OK")
</pallas_src>

<mosaic_0001>
module attributes {stable_mosaic.version = 11 : i64} {
  func.func @attention_block_kernel(%arg0: i32, %arg1: memref<8x1024xf32, #tpu.memory_space<vmem>>, %arg2: memref<1024x384xbf16, #tpu.memory_space<vmem>>, %arg3: memref<1x384xf32, #tpu.memory_space<vmem>>, %arg4: memref<128x1024xbf16, #tpu.memory_space<vmem>>, %arg5: memref<1x1024xf32, #tpu.memory_space<vmem>>, %arg6: memref<8x1024xf32, #tpu.memory_space<vmem>>) attributes {dimension_semantics = [#tpu.dimension_semantics<parallel>], iteration_bounds = array<i64: 2>, scalar_prefetch = 0 : i64, scratch_operands = 0 : i64, tpu.core_type = #tpu.core_type<tc>, window_params = [{transform_indices = @transform_0, window_bounds = array<i64: 8, 1024>}, {pipeline_mode = #tpu.pipeline_mode<synchronous>, transform_indices = @transform_1, window_bounds = array<i64: 1024, 384>}, {pipeline_mode = #tpu.pipeline_mode<synchronous>, transform_indices = @transform_2, window_bounds = array<i64: 1, 384>}, {pipeline_mode = #tpu.pipeline_mode<synchronous>, transform_indices = @transform_3, window_bounds = array<i64: 128, 1024>}, {pipeline_mode = #tpu.pipeline_mode<synchronous>, transform_indices = @transform_4, window_bounds = array<i64: 1, 1024>}, {transform_indices = @transform_5, window_bounds = array<i64: 8, 1024>}]} {
    %c0 = arith.constant 0 : index
    %c0_0 = arith.constant 0 : index
    %0 = vector.load %arg1[%c0, %c0_0] : memref<8x1024xf32, #tpu.memory_space<vmem>>, vector<8x1024xf32>
    %1 = arith.truncf %0 : vector<8x1024xf32> to vector<8x1024xbf16>
    %c0_1 = arith.constant 0 : index
    %c0_2 = arith.constant 0 : index
    %2 = vector.load %arg2[%c0_1, %c0_2] : memref<1024x384xbf16, #tpu.memory_space<vmem>>, vector<1024x384xbf16>
    %cst = arith.constant dense<0.000000e+00> : vector<8x384xf32>
    %3 = tpu.matmul %1, %2, %cst {dimension_numbers = #tpu.dot_dimension_numbers<[1], [0], [0], [1], [0, 0, 1, 1], [], []>} : vector<8x1024xbf16>, vector<1024x384xbf16>, vector<8x384xf32> -> vector<8x384xf32>
    %c0_3 = arith.constant 0 : index
    %c0_4 = arith.constant 0 : index
    %4 = vector.load %arg3[%c0_3, %c0_4] : memref<1x384xf32, #tpu.memory_space<vmem>>, vector<1x384xf32>
    %5 = vector.broadcast %4 : vector<1x384xf32> to vector<8x384xf32>
    %6 = arith.addf %3, %5 : vector<8x384xf32>
    %7 = vector.extract_strided_slice %6 {offsets = [0, 0], sizes = [8, 128], strides = [1, 1]} : vector<8x384xf32> to vector<8x128xf32>
    %8 = vector.extract_strided_slice %6 {offsets = [0, 128], sizes = [8, 128], strides = [1, 1]} : vector<8x384xf32> to vector<8x128xf32>
    %9 = vector.extract_strided_slice %6 {offsets = [0, 256], sizes = [8, 128], strides = [1, 1]} : vector<8x384xf32> to vector<8x128xf32>
    %cst_5 = arith.constant dense<0xFF800000> : vector<8xf32>
    %10 = vector.multi_reduction <maximumf>, %8, %cst_5 [1] : vector<8x128xf32> to vector<8xf32>
    %11 = vector.shape_cast %10 : vector<8xf32> to vector<8x1xf32>
    %cst_6 = arith.constant dense<0x7F800000> : vector<8xf32>
    %12 = vector.multi_reduction <minimumf>, %8, %cst_6 [1] : vector<8x128xf32> to vector<8xf32>
    %13 = vector.shape_cast %12 : vector<8xf32> to vector<8x1xf32>
    %cst_7 = arith.constant 0.000000e+00 : f32
    %14 = vector.broadcast %cst_7 : f32 to vector<8x128xf32>
    %15 = arith.cmpf oge, %9, %14 : vector<8x128xf32>
    %16 = vector.broadcast %11 : vector<8x1xf32> to vector<8x128xf32>
    %17 = arith.mulf %9, %16 : vector<8x128xf32>
    %18 = vector.broadcast %13 : vector<8x1xf32> to vector<8x128xf32>
    %19 = arith.mulf %9, %18 : vector<8x128xf32>
    %20 = arith.select %15, %17, %19 : vector<8x128xi1>, vector<8x128xf32>
    %21 = vector.shape_cast %9 : vector<8x128xf32> to vector<8x1x128xf32>
    %22 = vector.shape_cast %21 : vector<8x1x128xf32> to vector<8x1x128xf32>
    %23 = vector.broadcast %22 : vector<8x1x128xf32> to vector<8x16x128xf32>
    %24 = vector.shape_cast %20 : vector<8x128xf32> to vector<8x1x128xf32>
    %25 = vector.shape_cast %24 : vector<8x1x128xf32> to vector<8x1x128xf32>
    %26 = vector.broadcast %25 : vector<8x1x128xf32> to vector<8x16x128xf32>
    %cst_8 = arith.constant 0.000000e+00 : f32
    %27 = vector.broadcast %cst_8 : f32 to vector<8x128xf32>
    %cst_9 = arith.constant 0.000000e+00 : f32
    %28 = vector.broadcast %cst_9 : f32 to vector<8x128xf32>
    %29 = vector.extract_strided_slice %8 {offsets = [0, 0], sizes = [8, 16], strides = [1, 1]} : vector<8x128xf32> to vector<8x16xf32>
    %30 = vector.shape_cast %29 : vector<8x16xf32> to vector<8x16x1xf32>
    %31 = vector.extract_strided_slice %7 {offsets = [0, 0], sizes = [8, 16], strides = [1, 1]} : vector<8x128xf32> to vector<8x16xf32>
    %32 = vector.shape_cast %31 : vector<8x16xf32> to vector<8x16x1xf32>
    %33 = vector.broadcast %30 : vector<8x16x1xf32> to vector<8x16x128xf32>
    %34 = arith.mulf %33, %23 : vector<8x16x128xf32>
    %35 = arith.subf %34, %26 : vector<8x16x128xf32>
    %36 = arith.truncf %35 : vector<8x16x128xf32> to vector<8x16x128xbf16>
    %37 = math.exp %36 : vector<8x16x128xbf16>
    %38 = arith.extf %37 : vector<8x16x128xbf16> to vector<8x16x128xf32>
    %39 = vector.broadcast %32 : vector<8x16x1xf32> to vector<8x16x128xf32>
    %40 = arith.mulf %38, %39 : vector<8x16x128xf32>
    %cst_10 = arith.constant dense<0.000000e+00> : vector<8x128xf32>
    %41 = vector.multi_reduction <add>, %40, %cst_10 [1] : vector<8x16x128xf32> to vector<8x128xf32>
    %42 = arith.addf %27, %41 : vector<8x128xf32>
    %cst_11 = arith.constant dense<0.000000e+00> : vector<8x128xf32>
    %43 = vector.multi_reduction <add>, %38, %cst_11 [1] : vector<8x16x128xf32> to vector<8x128xf32>
    %44 = arith.addf %28, %43 : vector<8x128xf32>
    %45 = vector.extract_strided_slice %8 {offsets = [0, 16], sizes = [8, 16], strides = [1, 1]} : vector<8x128xf32> to vector<8x16xf32>
    %46 = vector.shape_cast %45 : vector<8x16xf32> to vector<8x16x1xf32>
    %47 = vector.extract_strided_slice %7 {offsets = [0, 16], sizes = [8, 16], strides = [1, 1]} : vector<8x128xf32> to vector<8x16xf32>
    %48 = vector.shape_cast %47 : vector<8x16xf32> to vector<8x16x1xf32>
    %49 = vector.broadcast %46 : vector<8x16x1xf32> to vector<8x16x128xf32>
    %50 = arith.mulf %49, %23 : vector<8x16x128xf32>
    %51 = arith.subf %50, %26 : vector<8x16x128xf32>
    %52 = arith.truncf %51 : vector<8x16x128xf32> to vector<8x16x128xbf16>
    %53 = math.exp %52 : vector<8x16x128xbf16>
    %54 = arith.extf %53 : vector<8x16x128xbf16> to vector<8x16x128xf32>
    %55 = vector.broadcast %48 : vector<8x16x1xf32> to vector<8x16x128xf32>
    %56 = arith.mulf %54, %55 : vector<8x16x128xf32>
    %cst_12 = arith.constant dense<0.000000e+00> : vector<8x128xf32>
    %57 = vector.multi_reduction <add>, %56, %cst_12 [1] : vector<8x16x128xf32> to vector<8x128xf32>
    %58 = arith.addf %42, %57 : vector<8x128xf32>
    %cst_13 = arith.constant dense<0.000000e+00> : vector<8x128xf32>
    %59 = vector.multi_reduction <add>, %54, %cst_13 [1] : vector<8x16x128xf32> to vector<8x128xf32>
    %60 = arith.addf %44, %59 : vector<8x128xf32>
    %61 = vector.extract_strided_slice %8 {offsets = [0, 32], sizes = [8, 16], strides = [1, 1]} : vector<8x128xf32> to vector<8x16xf32>
    %62 = vector.shape_cast %61 : vector<8x16xf32> to vector<8x16x1xf32>
    %63 = vector.extract_strided_slice %7 {offsets = [0, 32], sizes = [8, 16], strides = [1, 1]} : vector<8x128xf32> to vector<8x16xf32>
    %64 = vector.shape_cast %63 : vector<8x16xf32> to vector<8x16x1xf32>
    %65 = vector.broadcast %62 : vector<8x16x1xf32> to vector<8x16x128xf32>
    %66 = arith.mulf %65, %23 : vector<8x16x128xf32>
    %67 = arith.subf %66, %26 : vector<8x16x128xf32>
    %68 = arith.truncf %67 : vector<8x16x128xf32> to vector<8x16x128xbf16>
    %69 = math.exp %68 : vector<8x16x128xbf16>
    %70 = arith.extf %69 : vector<8x16x128xbf16> to vector<8x16x128xf32>
    %71 = vector.broadcast %64 : vector<8x16x1xf32> to vector<8x16x128xf32>
    %72 = arith.mulf %70, %71 : vector<8x16x128xf32>
    %cst_14 = arith.constant dense<0.000000e+00> : vector<8x128xf32>
    %73 = vector.multi_reduction <add>, %72, %cst_14 [1] : vector<8x16x128xf32> to vector<8x128xf32>
    %74 = arith.addf %58, %73 : vector<8x128xf32>
    %cst_15 = arith.constant dense<0.000000e+00> : vector<8x128xf32>
    %75 = vector.multi_reduction <add>, %70, %cst_15 [1] : vector<8x16x128xf32> to vector<8x128xf32>
    %76 = arith.addf %60, %75 : vector<8x128xf32>
    %77 = vector.extract_strided_slice %8 {offsets = [0, 48], sizes = [8, 16], strides = [1, 1]} : vector<8x128xf32> to vector<8x16xf32>
    %78 = vector.shape_cast %77 : vector<8x16xf32> to vector<8x16x1xf32>
    %79 = vector.extract_strided_slice %7 {offsets = [0, 48], sizes = [8, 16], strides = [1, 1]} : vector<8x128xf32> to vector<8x16xf32>
    %80 = vector.shape_cast %79 : vector<8x16xf32> to vector<8x16x1xf32>
    %81 = vector.broadcast %78 : vector<8x16x1xf32> to vector<8x16x128xf32>
    %82 = arith.mulf %81, %23 : vector<8x16x128xf32>
    %83 = arith.subf %82, %26 : vector<8x16x128xf32>
    %84 = arith.truncf %83 : vector<8x16x128xf32> to vector<8x16x128xbf16>
    %85 = math.exp %84 : vector<8x16x128xbf16>
    %86 = arith.extf %85 : vector<8x16x128xbf16> to vector<8x16x128xf32>
    %87 = vector.broadcast %80 : vector<8x16x1xf32> to vector<8x16x128xf32>
    %88 = arith.mulf %86, %87 : vector<8x16x128xf32>
    %cst_16 = arith.constant dense<0.000000e+00> : vector<8x128xf32>
    %89 = vector.multi_reduction <add>, %88, %cst_16 [1] : vector<8x16x128xf32> to vector<8x128xf32>
    %90 = arith.addf %74, %89 : vector<8x128xf32>
    %cst_17 = arith.constant dense<0.000000e+00> : vector<8x128xf32>
    %91 = vector.multi_reduction <add>, %86, %cst_17 [1] : vector<8x16x128xf32> to vector<8x128xf32>
    %92 = arith.addf %76, %91 : vector<8x128xf32>
    %93 = vector.extract_strided_slice %8 {offsets = [0, 64], sizes = [8, 16], strides = [1, 1]} : vector<8x128xf32> to vector<8x16xf32>
    %94 = vector.shape_cast %93 : vector<8x16xf32> to vector<8x16x1xf32>
    %95 = vector.extract_strided_slice %7 {offsets = [0, 64], sizes = [8, 16], strides = [1, 1]} : vector<8x128xf32> to vector<8x16xf32>
    %96 = vector.shape_cast %95 : vector<8x16xf32> to vector<8x16x1xf32>
    %97 = vector.broadcast %94 : vector<8x16x1xf32> to vector<8x16x128xf32>
    %98 = arith.mulf %97, %23 : vector<8x16x128xf32>
    %99 = arith.subf %98, %26 : vector<8x16x128xf32>
    %100 = arith.truncf %99 : vector<8x16x128xf32> to vector<8x16x128xbf16>
    %101 = math.exp %100 : vector<8x16x128xbf16>
    %102 = arith.extf %101 : vector<8x16x128xbf16> to vector<8x16x128xf32>
    %103 = vector.broadcast %96 : vector<8x16x1xf32> to vector<8x16x128xf32>
    %104 = arith.mulf %102, %103 : vector<8x16x128xf32>
    %cst_18 = arith.constant dense<0.000000e+00> : vector<8x128xf32>
    %105 = vector.multi_reduction <add>, %104, %cst_18 [1] : vector<8x16x128xf32> to vector<8x128xf32>
    %106 = arith.addf %90, %105 : vector<8x128xf32>
    %cst_19 = arith.constant dense<0.000000e+00> : vector<8x128xf32>
    %107 = vector.multi_reduction <add>, %102, %cst_19 [1] : vector<8x16x128xf32> to vector<8x128xf32>
    %108 = arith.addf %92, %107 : vector<8x128xf32>
    %109 = vector.extract_strided_slice %8 {offsets = [0, 80], sizes = [8, 16], strides = [1, 1]} : vector<8x128xf32> to vector<8x16xf32>
    %110 = vector.shape_cast %109 : vector<8x16xf32> to vector<8x16x1xf32>
    %111 = vector.extract_strided_slice %7 {offsets = [0, 80], sizes = [8, 16], strides = [1, 1]} : vector<8x128xf32> to vector<8x16xf32>
    %112 = vector.shape_cast %111 : vector<8x16xf32> to vector<8x16x1xf32>
    %113 = vector.broadcast %110 : vector<8x16x1xf32> to vector<8x16x128xf32>
    %114 = arith.mulf %113, %23 : vector<8x16x128xf32>
    %115 = arith.subf %114, %26 : vector<8x16x128xf32>
    %116 = arith.truncf %115 : vector<8x16x128xf32> to vector<8x16x128xbf16>
    %117 = math.exp %116 : vector<8x16x128xbf16>
    %118 = arith.extf %117 : vector<8x16x128xbf16> to vector<8x16x128xf32>
    %119 = vector.broadcast %112 : vector<8x16x1xf32> to vector<8x16x128xf32>
    %120 = arith.mulf %118, %119 : vector<8x16x128xf32>
    %cst_20 = arith.constant dense<0.000000e+00> : vector<8x128xf32>
    %121 = vector.multi_reduction <add>, %120, %cst_20 [1] : vector<8x16x128xf32> to vector<8x128xf32>
    %122 = arith.addf %106, %121 : vector<8x128xf32>
    %cst_21 = arith.constant dense<0.000000e+00> : vector<8x128xf32>
    %123 = vector.multi_reduction <add>, %118, %cst_21 [1] : vector<8x16x128xf32> to vector<8x128xf32>
    %124 = arith.addf %108, %123 : vector<8x128xf32>
    %125 = vector.extract_strided_slice %8 {offsets = [0, 96], sizes = [8, 16], strides = [1, 1]} : vector<8x128xf32> to vector<8x16xf32>
    %126 = vector.shape_cast %125 : vector<8x16xf32> to vector<8x16x1xf32>
    %127 = vector.extract_strided_slice %7 {offsets = [0, 96], sizes = [8, 16], strides = [1, 1]} : vector<8x128xf32> to vector<8x16xf32>
    %128 = vector.shape_cast %127 : vector<8x16xf32> to vector<8x16x1xf32>
    %129 = vector.broadcast %126 : vector<8x16x1xf32> to vector<8x16x128xf32>
    %130 = arith.mulf %129, %23 : vector<8x16x128xf32>
    %131 = arith.subf %130, %26 : vector<8x16x128xf32>
    %132 = arith.truncf %131 : vector<8x16x128xf32> to vector<8x16x128xbf16>
    %133 = math.exp %132 : vector<8x16x128xbf16>
    %134 = arith.extf %133 : vector<8x16x128xbf16> to vector<8x16x128xf32>
    %135 = vector.broadcast %128 : vector<8x16x1xf32> to vector<8x16x128xf32>
    %136 = arith.mulf %134, %135 : vector<8x16x128xf32>
    %cst_22 = arith.constant dense<0.000000e+00> : vector<8x128xf32>
    %137 = vector.multi_reduction <add>, %136, %cst_22 [1] : vector<8x16x128xf32> to vector<8x128xf32>
    %138 = arith.addf %122, %137 : vector<8x128xf32>
    %cst_23 = arith.constant dense<0.000000e+00> : vector<8x128xf32>
    %139 = vector.multi_reduction <add>, %134, %cst_23 [1] : vector<8x16x128xf32> to vector<8x128xf32>
    %140 = arith.addf %124, %139 : vector<8x128xf32>
    %141 = vector.extract_strided_slice %8 {offsets = [0, 112], sizes = [8, 16], strides = [1, 1]} : vector<8x128xf32> to vector<8x16xf32>
    %142 = vector.shape_cast %141 : vector<8x16xf32> to vector<8x16x1xf32>
    %143 = vector.extract_strided_slice %7 {offsets = [0, 112], sizes = [8, 16], strides = [1, 1]} : vector<8x128xf32> to vector<8x16xf32>
    %144 = vector.shape_cast %143 : vector<8x16xf32> to vector<8x16x1xf32>
    %145 = vector.broadcast %142 : vector<8x16x1xf32> to vector<8x16x128xf32>
    %146 = arith.mulf %145, %23 : vector<8x16x128xf32>
    %147 = arith.subf %146, %26 : vector<8x16x128xf32>
    %148 = arith.truncf %147 : vector<8x16x128xf32> to vector<8x16x128xbf16>
    %149 = math.exp %148 : vector<8x16x128xbf16>
    %150 = arith.extf %149 : vector<8x16x128xbf16> to vector<8x16x128xf32>
    %151 = vector.broadcast %144 : vector<8x16x1xf32> to vector<8x16x128xf32>
    %152 = arith.mulf %150, %151 : vector<8x16x128xf32>
    %cst_24 = arith.constant dense<0.000000e+00> : vector<8x128xf32>
    %153 = vector.multi_reduction <add>, %152, %cst_24 [1] : vector<8x16x128xf32> to vector<8x128xf32>
    %154 = arith.addf %138, %153 : vector<8x128xf32>
    %cst_25 = arith.constant dense<0.000000e+00> : vector<8x128xf32>
    %155 = vector.multi_reduction <add>, %150, %cst_25 [1] : vector<8x16x128xf32> to vector<8x128xf32>
    %156 = arith.addf %140, %155 : vector<8x128xf32>
    %157 = tpu.reciprocal %156 {approx = true} : vector<8x128xf32> -> vector<8x128xf32>
    %158 = arith.mulf %154, %157 : vector<8x128xf32>
    %159 = arith.truncf %158 : vector<8x128xf32> to vector<8x128xbf16>
    %c0_26 = arith.constant 0 : index
    %c0_27 = arith.constant 0 : index
    %160 = vector.load %arg4[%c0_26, %c0_27] : memref<128x1024xbf16, #tpu.memory_space<vmem>>, vector<128x1024xbf16>
    %cst_28 = arith.constant dense<0.000000e+00> : vector<8x1024xf32>
    %161 = tpu.matmul %159, %160, %cst_28 {dimension_numbers = #tpu.dot_dimension_numbers<[1], [0], [0], [1], [0, 0, 1, 1], [], []>} : vector<8x128xbf16>, vector<128x1024xbf16>, vector<8x1024xf32> -> vector<8x1024xf32>
    %c0_29 = arith.constant 0 : index
    %c0_30 = arith.constant 0 : index
    %162 = vector.load %arg5[%c0_29, %c0_30] : memref<1x1024xf32, #tpu.memory_space<vmem>>, vector<1x1024xf32>
    %163 = vector.broadcast %162 : vector<1x1024xf32> to vector<8x1024xf32>
    %164 = arith.addf %161, %163 : vector<8x1024xf32>
    %165 = arith.addf %164, %0 : vector<8x1024xf32>
    %c0_31 = arith.constant 0 : index
    %c0_32 = arith.constant 0 : index
    %166 = vector.load %arg6[%c0_31, %c0_32] : memref<8x1024xf32, #tpu.memory_space<vmem>>, vector<8x1024xf32>
    tpu.vector_store %arg6[%c0_31, %c0_32], %165 {strides = array<i32>} : memref<8x1024xf32, #tpu.memory_space<vmem>>, vector<8x1024xf32>,
    return
  }
  func.func @transform_0(%arg0: i32) -> (i32, i32) {
    %c0_i32 = arith.constant 0 : i32
    %c0_i32_0 = arith.constant 0 : i32
    return %arg0, %c0_i32 : i32, i32
  }
  func.func @transform_1(%arg0: i32) -> (i32, i32) {
    %c0_i32 = arith.constant 0 : i32
    %c0_i32_0 = arith.constant 0 : i32
    %c0_i32_1 = arith.constant 0 : i32
    return %c0_i32, %c0_i32_0 : i32, i32
  }
  func.func @transform_2(%arg0: i32) -> (i32, i32) {
    %c0_i32 = arith.constant 0 : i32
    %c0_i32_0 = arith.constant 0 : i32
    %c0_i32_1 = arith.constant 0 : i32
    return %c0_i32, %c0_i32_0 : i32, i32
  }
  func.func @transform_3(%arg0: i32) -> (i32, i32) {
    %c0_i32 = arith.constant 0 : i32
    %c0_i32_0 = arith.constant 0 : i32
    %c0_i32_1 = arith.constant 0 : i32
    return %c0_i32, %c0_i32_0 : i32, i32
  }
  func.func @transform_4(%arg0: i32) -> (i32, i32) {
    %c0_i32 = arith.constant 0 : i32
    %c0_i32_0 = arith.constant 0 : i32
    %c0_i32_1 = arith.constant 0 : i32
    return %c0_i32, %c0_i32_0 : i32, i32
  }
  func.func @transform_5(%arg0: i32) -> (i32, i32) {
    %c0_i32 = arith.constant 0 : i32
    %c0_i32_0 = arith.constant 0 : i32
    return %arg0, %c0_i32 : i32, i32
  }
}

</mosaic_0001>

<bundles_post_ra>
// kernel: tpu_custom_call.1
= control target key start
LH: loop header
LB: loop body
LE: loop exit
PB: predicated region body
PF: predicated region fallthrough
CT: control target
= control target key end

     0   :  { %10 = vsyncpa [#allocation3], 0  ;;  %s9207_s0 = inlined_call_operand.hbm [shape: f32[16,1024], index: 0, kind: input, shape index: {}, may-alias: {0,5}]   ;;  %s9208_s1 = inlined_call_operand.hbm [shape: bf16[1024,384], index: 1, kind: input, shape index: {}]   ;;  %s9209_s2 = inlined_call_operand.vmem [shape: f32[1,384], index: 2, kind: input, shape index: {}]   ;;  %s9210_s3 = inlined_call_operand.hbm [shape: bf16[128,1024], index: 3, kind: input, shape index: {}]   ;;  %s9211_s4 = inlined_call_operand.vmem [shape: f32[1,1024], index: 4, kind: input, shape index: {}]   ;;  %s9212_s5 = inlined_call_operand.hbm [shape: f32[16,1024], index: 5, kind: output, shape index: {}, may-alias: {0,5}]  }
   0x1   :  { %12 = vsyncpa [#allocation3 + $0x1], 0 }
   0x2   :  { %13 = vsyncpa [#allocation6], 0 }
   0x3   :  { %14 = vsyncpa [#allocation4], 0 }
   0x4   :  { %16 = vsyncpa [#allocation4 + $0x1], 0  ;;  %s6783_s18 = smov 0   ;;  %s6785_s19 = smov 0  }
   0x5   :  { %s6787_s20 = smov 0   ;;  %s6789_s21 = smov 0  }
   0x6 LB: > { %s6804_s22 = sadd.s32 4294967295, %s6741_s21   ;;  %s5726_s23 = sadd.s32 4294967294, %s6741_s21   ;;  %s6741_s21 = sphi %s6789_s21, %s9832_s21   ;;  %s6737_s20 = sphi %s6787_s20, %s9831_s20   ;;  %s6733_s19 = sphi %s6785_s19, %s9830_s19   ;;  %s6729_s18 = sphi %s6783_s18, %s9829_s18  }
   0x7   : > { %p42_p0 = scmp.ne.s32.totalorder %s6733_s19, %s6729_s18  ;;  %p9213_p1 = scmp.eq.s32.totalorder %s6804_s22, 0 }
   0x8   : > { %p156_p3 = scmp.eq.s32.totalorder %s5726_s23, 1  ;;  %p5727_p5 = scmp.ge.s32.totalorder %s6741_s21, 1 }
   0x9   : > { %p6813_p4 = por %p9213_p1, %p42_p0  ;;  %p163_p7 = scmp.lt.s32.totalorder %s6741_s21, 3 }
   0xa   : > { %p6818_p6 = por %p156_p3, %p42_p0  ;;  %s6743_s27 = smov [#allocation5]  }
   0xb   : > { %s9347_s24 = scalar_select %p6813_p4, 1, 0 }
   0xc   : > { %s9348_s25 = scalar_select %p6818_p6, 1, 0 }
   0xd   : > { %p6823_p8 = pnand %p5727_p5, %p163_p7  ;;  %s175_s28 = sshll.u32 %s6743_s27, 4  ;;  %s6827_s28 = int_to_ptr.vmem [resolvable:$true] %s175_s28 }
   0xe   : > { %s6744_s30 = smov [#allocation7]   ;;  %s6585_s9 = scalar_lea.hbm %s9208_s1, 24576 }
   0xf   : > { %p6116_p9 = pneg %p6823_p8  ;;  %s191_s6 = sshll.u32 %s6744_s30, 4  ;;  %s6838_s6 = int_to_ptr.vmem [resolvable:$true] %s191_s6 }
  0x10   : > { %p6586_p12 = scmp.ne.s32.totalorder %s9208_s1, %s6585_s9  ;;  %p6592_p5 = scmp.lt.u32.totalorder %s6585_s9, %s9208_s1 }
  0x11   : > { %p6834_p11 = pnand %p6116_p9, %p9213_p1 }
  0x13   : > { %p6587_p13 = pneg %p6834_p11 }
  0x15   : > { %p6588_p0 = pnand %p6587_p13, %p6586_p12 }
  0x17   : > { %p6589_p3 = pneg %p6588_p0 }
  0x19   : > { %p6594_p7 = pnand %p6592_p5, %p6589_p3 }
  0x1b   : > { %6597 = shalt.err (!%p6594_p7)
}
  0x1c   : > { %s6598_s14 = scalar_lea.vmem %s6827_s28, 24576  ;;  %p6606_p2 = scmp.lt.s32.totalorder %s6827_s28, %s6827_s28 }
  0x1d   : > { %p6599_p9 = scmp.ne.s32.totalorder %s6827_s28, %s6598_s14  ;;  %p6607_p12 = scmp.lt.s32.totalorder %s6598_s14, %s6598_s14 }
  0x1f   : > { %p6601_p10 = pnand %p6599_p9, %p6587_p13  ;;  %p6608_p0 = por %p6607_p12, %p6606_p2 }
  0x21   : > { %p6602_p1 = pneg %p6601_p10 }
  0x23   : > { %p6609_p6 = pnand %p6608_p0, %p6602_p1 }
  0x25   : > { %6612 = shalt.err (!%p6609_p6)
}
  0x26   : > { %s6745_s15 = smov 192   ;;  %s6746_s16 = smov 12  }
  0x27   : > { %6119 = dma.hbm_to_vmem [thread:$0]  (!%p6834_p11), %s9208_s1, 24576, %s6827_s28, [#allocation6], %s6745_s15, %s6745_s15, %s6746_s16  }
  0x28   : > { %s6613_s7 = scalar_lea.hbm %s9210_s3, 8192 }
  0x29   : > { %p6614_p2 = scmp.ne.s32.totalorder %s9210_s3, %s6613_s7  ;;  %p6620_p10 = scmp.lt.u32.totalorder %s6613_s7, %s9210_s3 }
  0x2b   : > { %p6616_p1 = pnand %p6614_p2, %p6587_p13 }
  0x2d   : > { %p6617_p6 = pneg %p6616_p1 }
  0x2f   : > { %p6622_p3 = pnand %p6620_p10, %p6617_p6 }
  0x31   : > { %6625 = shalt.err (!%p6622_p3)
}
  0x32   : > { %s6626_s28 = scalar_lea.vmem %s6838_s6, 8192  ;;  %p6634_p12 = scmp.lt.s32.totalorder %s6838_s6, %s6838_s6 }
  0x33   : > { %p6627_p5 = scmp.ne.s32.totalorder %s6838_s6, %s6626_s28  ;;  %p6635_p0 = scmp.lt.s32.totalorder %s6626_s28, %s6626_s28 }
  0x35   : > { %p6629_p7 = pnand %p6627_p5, %p6587_p13  ;;  %p6636_p2 = por %p6635_p0, %p6634_p12 }
  0x37   : > { %p6630_p9 = pneg %p6629_p7 }
  0x39   : > { %p6637_p1 = pnand %p6636_p2, %p6630_p9 }
  0x3b   : > { %6640 = shalt.err (!%p6637_p1)
}
  0x3c   : > { %s6747_s12 = smov 512   ;;  %s6748_s13 = smov 32  }
  0x3d   : > { %6122 = dma.hbm_to_vmem [thread:$0]  (!%p6834_p11), %s9210_s3, 8192, %s6838_s6, [#allocation6], %s6747_s12, %s6747_s12, %s6748_s13  }
  0x3e   : > { %s6893_s16 = sadd.s32 1, %s6741_s21   ;;  %s29_s23 = sadd.s32 1, %s6737_s20 }
  0x3f   : > { %s26_s17 = ssub.s32 %s6741_s21, %s6893_s16  ;;  %p36_p6 = scmp.ne.s32.totalorder %s6737_s20, %s6733_s19 }
  0x40   : > { %p27_p13 = scmp.eq.s32.totalorder %s26_s17, 0  ;;  %p37_p10 = scmp.eq.s32.totalorder %s6741_s21, 0 }
  0x41   : > { %p9351_p5 = scmp.eq.s32.totalorder %s6804_s22, 1  ;;  %p6133_p9 = scmp.lt.s32.totalorder %s6741_s21, 2 }
  0x42   : > { %s6902_s27 = scalar_select %p27_p13, %s6737_s20, %s29_s23  }
  0x43   : > { %p38_p3 = por %p37_p10, %p36_p6  ;;  %p6906_p7 = por %p9351_p5, %p36_p6 }
  0x44   : > { %s208_s29 = sand.u32 1, %s6737_s20   ;;  %s6000_s6 = sshll.u32 %s6741_s21, 10 }
  0x45   : > { %s9352_s30 = scalar_select %p6906_p7, 1, 0 }
  0x46   : > { %s5731_s7 = sshll.u32 %s208_s29, 6  ;;  %s6916_s10 = scalar_lea.hbm %s9207_s0, %s6000_s6 }
  0x47   : > { %s212_s11 = scalar_lea.vmem [#allocation2], %s5731_s7  ;;  %p6920_p11 = pnand %p6133_p9, %p38_p3 }
  0x48   : > { %s220_s28 = sshll.u32 %s212_s11, 4  ;;  %s209_s13 = scalar_lea.sflag [#allocation3], %s208_s29  ;;  %s6918_s28 = int_to_ptr.vmem [resolvable:$true] %s220_s28 }
  0x49   : > { %s6641_s14 = scalar_lea.hbm %s6916_s10, 1024  ;;  %p6643_p0 = pneg %p6920_p11 }
  0x4a   : > { %p6642_p12 = scmp.ne.s32.totalorder %s6916_s10, %s6641_s14  ;;  %s6646_s23 = scalar_lea.hbm %s9207_s0, 2048 }
  0x4b   : > { %p6647_p13 = scmp.lt.u32.totalorder %s6916_s10, %s9207_s0  ;;  %p6648_p6 = scmp.lt.u32.totalorder %s6646_s23, %s6641_s14 }
  0x4c   : > { %p6644_p2 = pnand %p6643_p0, %p6642_p12  ;;  %p6650_p3 = scmp.lt.u32.totalorder %s6641_s14, %s6916_s10 }
  0x4d   : > { %p6649_p10 = por %p6648_p6, %p6647_p13 }
  0x4e   : > { %p6645_p1 = pneg %p6644_p2 }
  0x4f   : > { %p6651_p5 = por %p6650_p3, %p6649_p10 }
  0x51   : > { %p6652_p9 = pnand %p6651_p5, %p6645_p1 }
  0x53   : > { %6655 = shalt.err (!%p6652_p9)
}
  0x54   : > { %s6656_s29 = scalar_lea.vmem %s6918_s28, 1024  ;;  %s6749_s8 = smov [#allocation2]  }
  0x55   : > { %p6657_p12 = scmp.ne.s32.totalorder %s6918_s28, %s6656_s29  ;;  %s6661_s9 = sshll.u32 %s6749_s8, 4  ;;  %s6662_s9 = int_to_ptr.vmem [resolvable:$false] %s6661_s9 }
  0x56   : > { %s6663_s11 = scalar_lea.vmem %s6662_s9, 2048  ;;  %p6664_p4 = scmp.lt.s32.totalorder %s6918_s28, %s6662_s9 }
  0x57   : > { %p6659_p2 = pnand %p6657_p12, %p6643_p0  ;;  %p6665_p13 = scmp.lt.s32.totalorder %s6663_s11, %s6656_s29 }
  0x59   : > { %p6660_p7 = pneg %p6659_p2  ;;  %p6666_p6 = por %p6665_p13, %p6664_p4 }
  0x5b   : > { %p6667_p10 = pnand %p6666_p6, %p6660_p7 }
  0x5d   : > { %6670 = shalt.err (!%p6667_p10)
}
  0x5e   : > { %6126 = dma.hbm_to_vmem [thread:$0]  (!%p6920_p11), %s6916_s10, 1024, %s6918_s28, %s209_s13  }
  0x5f   : > { %229 = sbr.rel (%p6823_p8) target bundleno = 1742 (0x6ce), region = 40 }
  0x66   : > { %s6952_s14 = sand.u32 1, %s6733_s19   ;;  %p9354_p4 = scmp.ne.s32.totalorder %s9347_s24, 0 }
  0x67   : > { %s5735_s15 = sshll.u32 %s6952_s14, 6  ;;  %s232_s17 = scalar_lea.sflag [#allocation3], %s6952_s14 }
  0x68   : > { %s6958_s23 = scalar_lea.vmem [#allocation2], %s5735_s15 }
  0x69   : > { %6716 = dma.done.wait (%p9354_p4), %s232_s17, 1024  }
  0x6a   : > { %6718 = vsyncadd (%p9354_p4), %s232_s17, 4294966272  ;;  %p9355_p7 = scmp.eq.s32.totalorder %s6804_s22, 0 }
  0x6c   : > { %6720 = dma.done.wait (%p9355_p7), [#allocation6], 32768   ;;  %p9356_p8 = pmov %p9355_p7 }
  0x6d   : > { %v6177_v0 = vld [vmem:[#allocation5 + $0x4] ss:$12 sps:$4 sm:$0xff]   ;;  %v6179_v1 = vld [vmem:[#allocation5] ss:$12 sps:$4 sm:$0xff]   ;;  %v6180_v2 = vld [vmem:[#allocation5 + $0x1c] ss:$12 sps:$4 sm:$0xff]  }
  0x6e   : > { %6722 = vsyncadd (%p9356_p8), [#allocation6], 4294934528  ;;  %1584 = vmatprep.subr.bf16.mxu0 %v6177_v0  ;;  %v6182_v3 = vld [vmem:[#allocation5 + $0x18] ss:$12 sps:$4 sm:$0xff]   ;;  %v6183_v4 = vld [vmem:[#allocation5 + $0x34] ss:$12 sps:$4 sm:$0xff]  }
  0x6f   : > { %1585 = vmatpush1.bf16.msra.mxu0 %v6179_v1  ;;  %v6185_v5 = vld [vmem:[#allocation5 + $0x30] ss:$12 sps:$4 sm:$0xff]   ;;  %v6186_v6 = vld [vmem:[#allocation5 + $0x4c] ss:$12 sps:$4 sm:$0xff]   ;;  %v6188_v7 = vld [vmem:[#allocation5 + $0x48] ss:$12 sps:$4 sm:$0xff]  }
  0x70   : > { %1586 = vmatprep.subr.bf16.mxu0 %v6180_v2  ;;  %v6189_v8 = vld [vmem:[#allocation5 + $0x64] ss:$12 sps:$4 sm:$0xff]   ;;  %v6191_v9 = vld [vmem:[#allocation5 + $0x60] ss:$12 sps:$4 sm:$0xff]   ;;  %v6192_v10 = vld [vmem:[#allocation5 + $0x7c] ss:$12 sps:$4 sm:$0xff]  }
  0x71   : > { %v6194_v11 = vld [vmem:[#allocation5 + $0x78] ss:$12 sps:$4 sm:$0xff]   ;;  %v6195_v12 = vld [vmem:[#allocation5 + $0x94] ss:$12 sps:$4 sm:$0xff]   ;;  %v272_v13 = vld [vmem:[%s6958_s23 + $0x8] sm:$0xff]  ;;  %vm5106_vm1 = vcmask 1041409  }
  0x72   : > { %v280_v14 = vpack.c.bf16 %v272_v13, %v272_v13  ;;  %v6197_v15 = vld [vmem:[#allocation5 + $0x90] ss:$12 sps:$4 sm:$0xff]   ;;  %v6198_v16 = vld [vmem:[#allocation5 + $0xac] ss:$12 sps:$4 sm:$0xff]   ;;  %v6200_v17 = vld [vmem:[#allocation5 + $0xa8] ss:$12 sps:$4 sm:$0xff]  }
  0x73   : > { %1587 = vmatpush1.bf16.msra.mxu0 %v6182_v3  ;;  %v6201_v18 = vld [vmem:[#allocation5 + $0xc4] ss:$12 sps:$4 sm:$0xff]   ;;  %v6203_v19 = vld [vmem:[#allocation5 + $0xc0] ss:$12 sps:$4 sm:$0xff]   ;;  %v6204_v20 = vld [vmem:[#allocation5 + $0xdc] ss:$12 sps:$4 sm:$0xff]  }
  0x74   : > { %1588 = vmatprep.subr.bf16.mxu0 %v6183_v4  ;;  %1616 = vmatprep.mubr.bf16.mxu0 %v280_v14  ;;  %v6206_v21 = vld [vmem:[#allocation5 + $0xd8] ss:$12 sps:$4 sm:$0xff]   ;;  %v6207_v22 = vld [vmem:[#allocation5 + $0xf4] ss:$12 sps:$4 sm:$0xff]   ;;  %v6209_v23 = vld [vmem:[#allocation5 + $0xf0] ss:$12 sps:$4 sm:$0xff]  }
  0x75   : > { %1780 = vmatprep.mubr.bf16.mxu1 %v280_v14  ;;  %v6210_v24 = vld [vmem:[#allocation5 + $0x10c] ss:$12 sps:$4 sm:$0xff]   ;;  %v6212_v25 = vld [vmem:[#allocation5 + $0x108] ss:$12 sps:$4 sm:$0xff]   ;;  %v6213_v26 = vld [vmem:[#allocation5 + $0x124] ss:$12 sps:$4 sm:$0xff]  }
  0x76   : > { %v6215_v27 = vld [vmem:[#allocation5 + $0x120] ss:$12 sps:$4 sm:$0xff]   ;;  %v6216_v28 = vld [vmem:[#allocation5 + $0x13c] ss:$12 sps:$4 sm:$0xff]   ;;  %v6218_v29 = vld [vmem:[#allocation5 + $0x138] ss:$12 sps:$4 sm:$0xff]  }
  0x77   : > { %1589 = vmatpush1.bf16.msra.mxu0 %v6185_v5  ;;  %v6219_v30 = vld [vmem:[#allocation5 + $0x154] ss:$12 sps:$4 sm:$0xff]   ;;  %v6221_v31 = vld [vmem:[#allocation5 + $0x150] ss:$12 sps:$4 sm:$0xff]   ;;  %v6222_v32 = vld [vmem:[#allocation5 + $0x16c] ss:$12 sps:$4 sm:$0xff]  }
  0x78   : > { %1590 = vmatprep.subr.bf16.mxu0 %v6186_v6  ;;  %v6224_v33 = vld [vmem:[#allocation5 + $0x168] ss:$12 sps:$4 sm:$0xff]   ;;  %v6227_v34 = vld [vmem:[#allocation5 + $0x184] ss:$12 sps:$4 sm:$0xff]   ;;  %v274_v36 = vld [vmem:[%s6958_s23 + $0x18] sm:$0xff]  ;;  %vm5108_vm2 = vcmask 1042434  }
  0x79   : > { %v271_v35 = vld [vmem:[%s6958_s23] sm:$0xff]  ;;  %v6973_v39 = vpack.c.bf16 %v274_v36, %v274_v36  ;;  %v6230_v40 = vld [vmem:[#allocation5 + $0x19c] ss:$12 sps:$4 sm:$0xff]   ;;  %v6236_v44 = vld [vmem:[#allocation5 + $0x1cc] ss:$12 sps:$4 sm:$0xff]   ;;  %vm5110_vm3 = vcmask 1043459  }
  0x7a   : > { %v6971_v37 = vpack.c.bf16 %v271_v35, %v271_v35  ;;  %v6225_v38 = vld [vmem:[#allocation5 + $0x180] ss:$12 sps:$4 sm:$0xff]   ;;  %v6228_v41 = vld [vmem:[#allocation5 + $0x198] ss:$12 sps:$4 sm:$0xff]   ;;  %v6231_v43 = vld [vmem:[#allocation5 + $0x1b0] ss:$12 sps:$4 sm:$0xff]  }
  0x7b   : > { %1591 = vmatpush1.bf16.msra.mxu0 %v6188_v7  ;;  %v6233_v42 = vld [vmem:[#allocation5 + $0x1b4] ss:$12 sps:$4 sm:$0xff]   ;;  %v6239_v46 = vld [vmem:[#allocation5 + $0x1e4] ss:$12 sps:$4 sm:$0xff]   ;;  %v6242_v48 = vld [vmem:[#allocation5 + $0x1fc] ss:$12 sps:$4 sm:$0xff]  }
  0x7c   : > { %1592 = vmatprep.subr.bf16.mxu0 %v6189_v8  ;;  %v6234_v45 = vld [vmem:[#allocation5 + $0x1c8] ss:$12 sps:$4 sm:$0xff]   ;;  %v6237_v47 = vld [vmem:[#allocation5 + $0x1e0] ss:$12 sps:$4 sm:$0xff]   ;;  %v6240_v49 = vld [vmem:[#allocation5 + $0x1f8] ss:$12 sps:$4 sm:$0xff]  }
  0x7d   : > { %v6245_v50 = vld [vmem:[#allocation5 + $0x214] ss:$12 sps:$4 sm:$0xff]   ;;  %v6243_v51 = vld [vmem:[#allocation5 + $0x210] ss:$12 sps:$4 sm:$0xff]   ;;  %v6248_v52 = vld [vmem:[#allocation5 + $0x22c] ss:$12 sps:$4 sm:$0xff]  }
  0x7e   : > { %v6246_v53 = vld [vmem:[#allocation5 + $0x228] ss:$12 sps:$4 sm:$0xff]   ;;  %v6251_v54 = vld [vmem:[#allocation5 + $0x244] ss:$12 sps:$4 sm:$0xff]   ;;  %v6249_v55 = vld [vmem:[#allocation5 + $0x240] ss:$12 sps:$4 sm:$0xff]  }
  0x7f   : > { %1593 = vmatpush1.bf16.msra.mxu0 %v6191_v9  ;;  %v6254_v56 = vld [vmem:[#allocation5 + $0x25c] ss:$12 sps:$4 sm:$0xff]   ;;  %v6252_v57 = vld [vmem:[#allocation5 + $0x258] ss:$12 sps:$4 sm:$0xff]   ;;  %v6257_v58 = vld [vmem:[#allocation5 + $0x274] ss:$12 sps:$4 sm:$0xff]  }
  0x80   : > { %1594 = vmatprep.subr.bf16.mxu0 %v6192_v10  ;;  %v6255_v59 = vld [vmem:[#allocation5 + $0x270] ss:$12 sps:$4 sm:$0xff]   ;;  %v6260_v60 = vld [vmem:[#allocation5 + $0x28c] ss:$12 sps:$4 sm:$0xff]   ;;  %v6258_v61 = vld [vmem:[#allocation5 + $0x288] ss:$12 sps:$4 sm:$0xff]  }
  0x81   : > { %v6263_v62 = vld [vmem:[#allocation5 + $0x2a4] ss:$12 sps:$4 sm:$0xff]   ;;  %v6261_v63 = vld [vmem:[#allocation5 + $0x2a0] ss:$12 sps:$4 sm:$0xff]   ;;  %v6266_v0 = vld [vmem:[#allocation5 + $0x2bc] ss:$12 sps:$4 sm:$0xff]  }
  0x82   : > { %v6264_v1 = vld [vmem:[#allocation5 + $0x2b8] ss:$12 sps:$4 sm:$0xff]   ;;  %v6269_v2 = vld [vmem:[#allocation5 + $0x2d4] ss:$12 sps:$4 sm:$0xff]   ;;  %v6267_v3 = vld [vmem:[#allocation5 + $0x2d0] ss:$12 sps:$4 sm:$0xff]  }
  0x83   : > { %1595 = vmatpush1.bf16.msra.mxu0 %v6194_v11  ;;  %v6272_v4 = vld [vmem:[#allocation5 + $0x2ec] ss:$12 sps:$4 sm:$0xff]   ;;  %v6270_v5 = vld [vmem:[#allocation5 + $0x2e8] ss:$12 sps:$4 sm:$0xff]   ;;  %v6275_v6 = vld [vmem:[#allocation5 + $0x304] ss:$12 sps:$4 sm:$0xff]  }
  0x84   : > { %1596 = vmatprep.subr.bf16.mxu0 %v6195_v12  ;;  %v273_v7 = vld [vmem:[%s6958_s23 + $0x10] sm:$0xff]  ;;  %v276_v8 = vld [vmem:[%s6958_s23 + $0x28] sm:$0xff]  ;;  %v6381_v35 = vld [vmem:[#allocation5 + $0x158] ss:$12 sps:$4 sm:$0xff]   ;;  %vm5112_vm4 = vcmask 1044484   ;;  %vm5114_vm5 = vcmask 1045509  }
  0x85   : > { %v6273_v9 = vld [vmem:[#allocation5 + $0x300] ss:$12 sps:$4 sm:$0xff]   ;;  %v6979_v10 = vpack.c.bf16 %v273_v7, %v273_v7  ;;  %v6278_v11 = vld [vmem:[#allocation5 + $0x31c] ss:$12 sps:$4 sm:$0xff]   ;;  %v6981_v12 = vpack.c.bf16 %v276_v8, %v276_v8  ;;  %vm5116_vm6 = vcmask 1046534   ;;  %vm5118_vm7 = vcmask 1047559  }
  0x86   : > { %v6369_v13 = vld [vmem:[#allocation5 + $0xc8] ss:$12 sps:$4 sm:$0xff]   ;;  %v6291_v36 = vld [vmem:[#allocation5 + $0x390] ss:$12 sps:$4 sm:$0xff]   ;;  %s9136_s12 = scalar_lea.vmem [#allocation8], %s5735_s15  ;;  %s6001_s13 = sshll.u32 %s6804_s22, 10 }
  0x87   : > { %1597 = vmatpush1.bf16.msra.mxu0 %v6197_v15  ;;  %v6370_v14 = vld [vmem:[#allocation5 + $0x8] ss:$12 sps:$4 sm:$0xff]   ;;  %v6371_v15 = vld [vmem:[#allocation5 + $0xe0] ss:$12 sps:$4 sm:$0xff]   ;;  %6002 = vmatprep.subr.bf16.mxu1 %v6369_v13  ;;  %v6399_v7 = vld [vmem:[#allocation5 + $0x2f0] ss:$12 sps:$4 sm:$0xff]   ;;  %s9161_s8 = scalar_lea.hbm %s9212_s5, %s6001_s13 }
  0x88   : > { %1598 = vmatprep.subr.bf16.mxu0 %v6198_v16  ;;  %v6276_v16 = vld [vmem:[#allocation5 + $0x318] ss:$12 sps:$4 sm:$0xff]   ;;  %6003 = vmatpush3.bf16.msra.mxu1 %v6370_v14  ;;  %v6318_v8 = vld [vmem:[#allocation5 + $0x468] ss:$12 sps:$4 sm:$0xff]   ;;  %v6400_v14 = vld [vmem:[#allocation5 + $0x230] ss:$12 sps:$4 sm:$0xff]  }
  0x89   : > { %6004 = vmatprep.subr.bf16.mxu1 %v6371_v15  ;;  %v278_v13 = vld [vmem:[%s6958_s23 + $0x38] sm:$0xff]  ;;  %s5637_s7 = sshll.u32 %s9136_s12, 4  ;;  %s5623_s22 = scalar_lea.sflag [#allocation4], %s6952_s14  ;;  %s9163_s7 = int_to_ptr.vmem [resolvable:$true] %s5637_s7 }
  0x8a   : > { %s6671_s9 = scalar_lea.vmem %s9163_s7, 1024  ;;  %p9826_p0 = scmp.ne.s32.totalorder %s9352_s30, 0 }
  0x8b   : > { %1599 = vmatpush1.bf16.msra.mxu0 %v6200_v17  ;;  %v6281_v17 = vld [vmem:[#allocation5 + $0x334] ss:$12 sps:$4 sm:$0xff]   ;;  %p6672_p11 = scmp.ne.s32.totalorder %s9163_s7, %s6671_s9  ;;  %s6752_s11 = smov [#allocation8]  }
  0x8c   : > { %1600 = vmatprep.subr.bf16.mxu0 %v6201_v18  ;;  %v6372_v18 = vld [vmem:[#allocation5 + $0x20] ss:$12 sps:$4 sm:$0xff]   ;;  %s6675_s15 = sshll.u32 %s6752_s11, 4  ;;  %s6676_s15 = int_to_ptr.vmem [resolvable:$false] %s6675_s15 }
  0x8d   : > { %6005 = vmatpush3.bf16.msra.mxu1 %v6372_v18  ;;  %v6991_v18 = vpack.c.bf16 %v278_v13, %v278_v13  ;;  %v6431_v13 = vld [vmem:[#allocation5 + $0x5f0] ss:$12 sps:$4 sm:$0xff]   ;;  %p6673_p1 = pnand %p6672_p11, %p9826_p0  ;;  %s6677_s17 = scalar_lea.vmem %s6676_s15, 2048 }
  0x8e   : > { %p6678_p5 = scmp.lt.s32.totalorder %s9163_s7, %s6676_s15  ;;  %p6679_p9 = scmp.lt.s32.totalorder %s6677_s17, %s6671_s9 }
  0x8f   : > { %1601 = vmatpush1.bf16.msra.mxu0 %v6203_v19  ;;  %v6373_v19 = vld [vmem:[#allocation5 + $0xf8] ss:$12 sps:$4 sm:$0xff]   ;;  %p6674_p3 = pneg %p6673_p1 }
  0x90   : > { %1602 = vmatprep.subr.bf16.mxu0 %v6204_v20  ;;  %v6279_v20 = vld [vmem:[#allocation5 + $0x330] ss:$12 sps:$4 sm:$0xff]   ;;  %6006 = vmatprep.subr.bf16.mxu1 %v6373_v19  ;;  %p6680_p12 = por %p6679_p9, %p6678_p5 }
  0x91   : > { %v6326_v19 = vld [vmem:[#allocation5 + $0x49c] ss:$12 sps:$4 sm:$0xff]  }
  0x92   : > { %p6681_p2 = pnand %p6680_p12, %p6674_p3 }
  0x93   : > { %1603 = vmatpush1.bf16.msra.mxu0 %v6206_v21  ;;  %v6284_v21 = vld [vmem:[#allocation5 + $0x34c] ss:$12 sps:$4 sm:$0xff]  }
  0x94   : > { %1604 = vmatprep.subr.bf16.mxu0 %v6207_v22  ;;  %v6374_v22 = vld [vmem:[#allocation5 + $0x38] ss:$12 sps:$4 sm:$0xff]  }
  0x95   : > { %6007 = vmatpush3.bf16.msra.mxu1 %v6374_v22  ;;  %v6324_v22 = vld [vmem:[#allocation5 + $0x498] ss:$12 sps:$4 sm:$0xff]  }
  0x97   : > { %1605 = vmatpush1.bf16.msra.mxu0 %v6209_v23  ;;  %v6375_v23 = vld [vmem:[#allocation5 + $0x110] ss:$12 sps:$4 sm:$0xff]  }
  0x98   : > { %1606 = vmatprep.subr.bf16.mxu0 %v6210_v24  ;;  %v6282_v24 = vld [vmem:[#allocation5 + $0x348] ss:$12 sps:$4 sm:$0xff]   ;;  %6008 = vmatprep.subr.bf16.mxu1 %v6375_v23 }
  0x99   : > { %v6329_v23 = vld [vmem:[#allocation5 + $0x4b4] ss:$12 sps:$4 sm:$0xff]  }
  0x9b   : > { %1607 = vmatpush1.bf16.msra.mxu0 %v6212_v25  ;;  %v6287_v25 = vld [vmem:[#allocation5 + $0x364] ss:$12 sps:$4 sm:$0xff]  }
  0x9c   : > { %1608 = vmatprep.subr.bf16.mxu0 %v6213_v26  ;;  %v6376_v26 = vld [vmem:[#allocation5 + $0x50] ss:$12 sps:$4 sm:$0xff]  }
  0x9d   : > { %6009 = vmatpush3.bf16.msra.mxu1 %v6376_v26  ;;  %v6327_v26 = vld [vmem:[#allocation5 + $0x4b0] ss:$12 sps:$4 sm:$0xff]  }
  0x9f   : > { %1609 = vmatpush1.bf16.msra.mxu0 %v6215_v27  ;;  %v6377_v27 = vld [vmem:[#allocation5 + $0x128] ss:$12 sps:$4 sm:$0xff]  }
  0xa0   : > { %1610 = vmatprep.subr.bf16.mxu0 %v6216_v28  ;;  %v6285_v28 = vld [vmem:[#allocation5 + $0x360] ss:$12 sps:$4 sm:$0xff]   ;;  %6010 = vmatprep.subr.bf16.mxu1 %v6377_v27 }
  0xa1   : > { %v6332_v27 = vld [vmem:[#allocation5 + $0x4cc] ss:$12 sps:$4 sm:$0xff]  }
  0xa3   : > { %1611 = vmatpush1.bf16.msra.mxu0 %v6218_v29  ;;  %v6290_v29 = vld [vmem:[#allocation5 + $0x37c] ss:$12 sps:$4 sm:$0xff]  }
  0xa4   : > { %1612 = vmatprep.subr.bf16.mxu0 %v6219_v30  ;;  %v6378_v30 = vld [vmem:[#allocation5 + $0x68] ss:$12 sps:$4 sm:$0xff]  }
  0xa5   : > { %6011 = vmatpush3.bf16.msra.mxu1 %v6378_v30  ;;  %v6330_v30 = vld [vmem:[#allocation5 + $0x4c8] ss:$12 sps:$4 sm:$0xff]  }
  0xa7   : > { %1613 = vmatpush1.bf16.msra.mxu0 %v6221_v31  ;;  %v6379_v31 = vld [vmem:[#allocation5 + $0x140] ss:$12 sps:$4 sm:$0xff]  }
  0xa8   : > { %1614 = vmatprep.subr.bf16.mxu0 %v6222_v32  ;;  %v6288_v32 = vld [vmem:[#allocation5 + $0x378] ss:$12 sps:$4 sm:$0xff]   ;;  %6012 = vmatprep.subr.bf16.mxu1 %v6379_v31 }
  0xa9   : > { %v6335_v31 = vld [vmem:[#allocation5 + $0x4e4] ss:$12 sps:$4 sm:$0xff]  }
  0xab   : > { %1615 = vmatpush1.bf16.msra.mxu0 %v6224_v33  ;;  %v6293_v33 = vld [vmem:[#allocation5 + $0x394] ss:$12 sps:$4 sm:$0xff]  }
  0xac   : > { %1625 = vmatprep.subr.bf16.mxu0 %v6227_v34  ;;  %v6380_v34 = vld [vmem:[#allocation5 + $0x80] ss:$12 sps:$4 sm:$0xff]  }
  0xad   : > { %6013 = vmatpush3.bf16.msra.mxu1 %v6380_v34  ;;  %v6410_v34 = vld [vmem:[#allocation5 + $0x368] ss:$12 sps:$4 sm:$0xff]  }
  0xae   : > { %1617 = vmatmul.mubr.bf16.vlgmr.msra.gmra.mrb[0].mxu0 %v6971_v37  ;;  %6014 = vmatprep.subr.bf16.mxu1 %v6381_v35  ;;  %v6411_v35 = vld [vmem:[#allocation5 + $0x440] ss:$12 sps:$4 sm:$0xff]  }
  0xaf   : > { %1626 = vmatpush1.bf16.msra.mxu0 %v6225_v38  ;;  %1657 = vmatprep.mubr.bf16.mxu0 %v6973_v39  ;;  %v6296_v38 = vld [vmem:[#allocation5 + $0x3ac] ss:$12 sps:$4 sm:$0xff]  }
  0xb0   : > { %1627 = vmatprep.subr.bf16.mxu0 %v6230_v40  ;;  %v6382_v40 = vld [vmem:[#allocation5 + $0x98] ss:$12 sps:$4 sm:$0xff]  }
  0xb1   : > { %6015 = vmatpush3.bf16.msra.mxu1 %v6382_v40  ;;  %v6412_v40 = vld [vmem:[#allocation5 + $0x380] ss:$12 sps:$4 sm:$0xff]  }
  0xb3   : > { %1628 = vmatpush1.bf16.msra.mxu0 %v6228_v41  ;;  %v6383_v41 = vld [vmem:[#allocation5 + $0x170] ss:$12 sps:$4 sm:$0xff]  }
  0xb4   : > { %1629 = vmatprep.subr.bf16.mxu0 %v6233_v42  ;;  %v6294_v42 = vld [vmem:[#allocation5 + $0x3a8] ss:$12 sps:$4 sm:$0xff]   ;;  %6016 = vmatprep.subr.bf16.mxu1 %v6383_v41  ;;  %v6413_v41 = vld [vmem:[#allocation5 + $0x458] ss:$12 sps:$4 sm:$0xff]  }
  0xb7   : > { %1630 = vmatpush1.bf16.msra.mxu0 %v6231_v43  ;;  %v6299_v43 = vld [vmem:[#allocation5 + $0x3c4] ss:$12 sps:$4 sm:$0xff]  }
  0xb8   : > { %1631 = vmatprep.subr.bf16.mxu0 %v6236_v44  ;;  %v6384_v44 = vld [vmem:[#allocation5 + $0xb0] ss:$12 sps:$4 sm:$0xff]  }
  0xb9   : > { %6017 = vmatpush3.bf16.msra.mxu1 %v6384_v44  ;;  %v6414_v44 = vld [vmem:[#allocation5 + $0x398] ss:$12 sps:$4 sm:$0xff]  }
  0xbb   : > { %1632 = vmatpush1.bf16.msra.mxu0 %v6234_v45  ;;  %v6385_v45 = vld [vmem:[#allocation5 + $0x248] ss:$12 sps:$4 sm:$0xff]  }
  0xbc   : > { %1633 = vmatprep.subr.bf16.mxu0 %v6239_v46  ;;  %v6297_v46 = vld [vmem:[#allocation5 + $0x3c0] ss:$12 sps:$4 sm:$0xff]   ;;  %6024 = vmatprep.subr.bf16.mxu1 %v6385_v45  ;;  %v6415_v45 = vld [vmem:[#allocation5 + $0x470] ss:$12 sps:$4 sm:$0xff]  }
  0xbd   : > { %1781 = vmatmul.mubr.bf16.vlgmr.msra.gmra.mrb[0].mxu1 %v6971_v37  ;;  %v6392_v37 = vld [vmem:[#allocation5 + $0x1d0] ss:$12 sps:$4 sm:$0xff]  }
  0xbe   : > { %1820 = vmatprep.mubr.bf16.mxu1 %v6973_v39  ;;  %v6309_v39 = vld [vmem:[#allocation5 + $0x420] ss:$12 sps:$4 sm:$0xff]  }
  0xbf   : > { %1634 = vmatpush1.bf16.msra.mxu0 %v6237_v47  ;;  %v6302_v47 = vld [vmem:[#allocation5 + $0x3dc] ss:$12 sps:$4 sm:$0xff]  }
  0xc0   : > { %1635 = vmatprep.subr.bf16.mxu0 %v6242_v48  ;;  %v6386_v48 = vld [vmem:[#allocation5 + $0x188] ss:$12 sps:$4 sm:$0xff]  }
  0xc1   : > { %6025 = vmatpush3.bf16.msra.mxu1 %v6386_v48  ;;  %v6416_v48 = vld [vmem:[#allocation5 + $0x3b0] ss:$12 sps:$4 sm:$0xff]  }
  0xc3   : > { %1636 = vmatpush1.bf16.msra.mxu0 %v6240_v49  ;;  %v6387_v49 = vld [vmem:[#allocation5 + $0x260] ss:$12 sps:$4 sm:$0xff]  }
  0xc4   : > { %1637 = vmatprep.subr.bf16.mxu0 %v6245_v50  ;;  %v6300_v50 = vld [vmem:[#allocation5 + $0x3d8] ss:$12 sps:$4 sm:$0xff]   ;;  %6026 = vmatprep.subr.bf16.mxu1 %v6387_v49  ;;  %v6417_v49 = vld [vmem:[#allocation5 + $0x548] ss:$12 sps:$4 sm:$0xff]  }
  0xc7   : > { %1638 = vmatpush1.bf16.msra.mxu0 %v6243_v51  ;;  %v6305_v51 = vld [vmem:[#allocation5 + $0x3f4] ss:$12 sps:$4 sm:$0xff]  }
  0xc8   : > { %1639 = vmatprep.subr.bf16.mxu0 %v6248_v52  ;;  %v6388_v52 = vld [vmem:[#allocation5 + $0x1a0] ss:$12 sps:$4 sm:$0xff]  }
  0xc9   : > { %6027 = vmatpush3.bf16.msra.mxu1 %v6388_v52  ;;  %v6418_v52 = vld [vmem:[#allocation5 + $0x488] ss:$12 sps:$4 sm:$0xff]  }
  0xcb   : > { %1640 = vmatpush1.bf16.msra.mxu0 %v6246_v53  ;;  %v6389_v53 = vld [vmem:[#allocation5 + $0x278] ss:$12 sps:$4 sm:$0xff]  }
  0xcc   : > { %1641 = vmatprep.subr.bf16.mxu0 %v6251_v54  ;;  %v6303_v54 = vld [vmem:[#allocation5 + $0x3f0] ss:$12 sps:$4 sm:$0xff]   ;;  %6028 = vmatprep.subr.bf16.mxu1 %v6389_v53  ;;  %v6419_v53 = vld [vmem:[#allocation5 + $0x560] ss:$12 sps:$4 sm:$0xff]  }
  0xcf   : > { %1642 = vmatpush1.bf16.msra.mxu0 %v6249_v55  ;;  %v6308_v55 = vld [vmem:[#allocation5 + $0x40c] ss:$12 sps:$4 sm:$0xff]  }
  0xd0   : > { %1643 = vmatprep.subr.bf16.mxu0 %v6254_v56  ;;  %v6390_v56 = vld [vmem:[#allocation5 + $0x1b8] ss:$12 sps:$4 sm:$0xff]  }
  0xd1   : > { %6029 = vmatpush3.bf16.msra.mxu1 %v6390_v56  ;;  %v6420_v56 = vld [vmem:[#allocation5 + $0x4a0] ss:$12 sps:$4 sm:$0xff]  }
  0xd3   : > { %1644 = vmatpush1.bf16.msra.mxu0 %v6252_v57  ;;  %v6391_v57 = vld [vmem:[#allocation5 + $0x290] ss:$12 sps:$4 sm:$0xff]  }
  0xd4   : > { %1645 = vmatprep.subr.bf16.mxu0 %v6257_v58  ;;  %v6306_v58 = vld [vmem:[#allocation5 + $0x408] ss:$12 sps:$4 sm:$0xff]   ;;  %6030 = vmatprep.subr.bf16.mxu1 %v6391_v57  ;;  %v6421_v57 = vld [vmem:[#allocation5 + $0x578] ss:$12 sps:$4 sm:$0xff]  }
  0xd5   : > { %6031 = vmatpush3.bf16.msra.mxu1 %v6392_v37  ;;  %v6422_v37 = vld [vmem:[#allocation5 + $0x4b8] ss:$12 sps:$4 sm:$0xff]  }
  0xd7   : > { %1646 = vmatpush1.bf16.msra.mxu0 %v6255_v59  ;;  %v6311_v59 = vld [vmem:[#allocation5 + $0x424] ss:$12 sps:$4 sm:$0xff]  }
  0xd8   : > { %1647 = vmatprep.subr.bf16.mxu0 %v6260_v60  ;;  %v6393_v60 = vld [vmem:[#allocation5 + $0x2a8] ss:$12 sps:$4 sm:$0xff]  }
  0xd9   : > { %6032 = vmatprep.subr.bf16.mxu1 %v6393_v60  ;;  %v6423_v60 = vld [vmem:[#allocation5 + $0x590] ss:$12 sps:$4 sm:$0xff]  }
  0xdb   : > { %1648 = vmatpush1.bf16.msra.mxu0 %v6258_v61  ;;  %v6314_v61 = vld [vmem:[#allocation5 + $0x43c] ss:$12 sps:$4 sm:$0xff]  }
  0xdc   : > { %1649 = vmatprep.subr.bf16.mxu0 %v6263_v62  ;;  %v6394_v62 = vld [vmem:[#allocation5 + $0x1e8] ss:$12 sps:$4 sm:$0xff]  }
  0xdd   : > { %6033 = vmatpush3.bf16.msra.mxu1 %v6394_v62  ;;  %v6424_v62 = vld [vmem:[#allocation5 + $0x4d0] ss:$12 sps:$4 sm:$0xff]  }
  0xdf   : > { %1650 = vmatpush1.bf16.msra.mxu0 %v6261_v63  ;;  %v6395_v63 = vld [vmem:[#allocation5 + $0x2c0] ss:$12 sps:$4 sm:$0xff]  }
  0xe0   : > { %1651 = vmatprep.subr.bf16.mxu0 %v6266_v0  ;;  %v6312_v0 = vld [vmem:[#allocation5 + $0x438] ss:$12 sps:$4 sm:$0xff]   ;;  %6034 = vmatprep.subr.bf16.mxu1 %v6395_v63  ;;  %v6425_v63 = vld [vmem:[#allocation5 + $0x5a8] ss:$12 sps:$4 sm:$0xff]  }
  0xe3   : > { %1652 = vmatpush1.bf16.msra.mxu0 %v6264_v1  ;;  %v6317_v1 = vld [vmem:[#allocation5 + $0x454] ss:$12 sps:$4 sm:$0xff]  }
  0xe4   : > { %1653 = vmatprep.subr.bf16.mxu0 %v6269_v2  ;;  %v6396_v2 = vld [vmem:[#allocation5 + $0x200] ss:$12 sps:$4 sm:$0xff]  }
  0xe5   : > { %6035 = vmatpush3.bf16.msra.mxu1 %v6396_v2  ;;  %v6426_v2 = vld [vmem:[#allocation5 + $0x4e8] ss:$12 sps:$4 sm:$0xff]  }
  0xe7   : > { %1654 = vmatpush1.bf16.msra.mxu0 %v6267_v3  ;;  %v6397_v3 = vld [vmem:[#allocation5 + $0x2d8] ss:$12 sps:$4 sm:$0xff]  }
  0xe8   : > { %1655 = vmatprep.subr.bf16.mxu0 %v6272_v4  ;;  %v6315_v4 = vld [vmem:[#allocation5 + $0x450] ss:$12 sps:$4 sm:$0xff]   ;;  %6036 = vmatprep.subr.bf16.mxu1 %v6397_v3  ;;  %v6427_v3 = vld [vmem:[#allocation5 + $0x5c0] ss:$12 sps:$4 sm:$0xff]  }
  0xeb   : > { %1656 = vmatpush1.bf16.msra.mxu0 %v6270_v5  ;;  %v6320_v5 = vld [vmem:[#allocation5 + $0x46c] ss:$12 sps:$4 sm:$0xff]  }
  0xec   : > { %1666 = vmatprep.subr.bf16.mxu0 %v6275_v6  ;;  %v6398_v6 = vld [vmem:[#allocation5 + $0x218] ss:$12 sps:$4 sm:$0xff]  }
  0xed   : > { %6037 = vmatpush3.bf16.msra.mxu1 %v6398_v6  ;;  %v6428_v6 = vld [vmem:[#allocation5 + $0x500] ss:$12 sps:$4 sm:$0xff]  }
  0xee   : > { %1658 = vmatmul.mubr.bf16.vlgmr.msra.gmra.mrb[0].mxu0 %v6979_v10  ;;  %6038 = vmatprep.subr.bf16.mxu1 %v6399_v7  ;;  %v6429_v7 = vld [vmem:[#allocation5 + $0x5d8] ss:$12 sps:$4 sm:$0xff]  }
  0xef   : > { %1667 = vmatpush1.bf16.msra.mxu0 %v6273_v9  ;;  %1698 = vmatprep.mubr.bf16.mxu0 %v6981_v12  ;;  %v275_v9 = vld [vmem:[%s6958_s23 + $0x20] sm:$0xff] }
  0xf0   : > { %1668 = vmatprep.subr.bf16.mxu0 %v6278_v11  ;;  %v6323_v11 = vld [vmem:[#allocation5 + $0x484] ss:$12 sps:$4 sm:$0xff]   ;;  %v6989_v15 = vpack.c.bf16 %v275_v9, %v275_v9  ;;  %v6368_v9 = vld [vmem:[#allocation5 + $0x5ec] ss:$12 sps:$4 sm:$0xff]  }
  0xf1   : > { %6039 = vmatpush3.bf16.msra.mxu1 %v6400_v14  ;;  %v6366_v14 = vld [vmem:[#allocation5 + $0x5e8] ss:$12 sps:$4 sm:$0xff]  }
  0xf3   : > { %1669 = vmatpush1.bf16.msra.mxu0 %v6276_v16  ;;  %v6401_v16 = vld [vmem:[#allocation5 + $0x3c8] ss:$12 sps:$4 sm:$0xff]  }
  0xf4   : > { %1670 = vmatprep.subr.bf16.mxu0 %v6281_v17  ;;  %v6321_v17 = vld [vmem:[#allocation5 + $0x480] ss:$12 sps:$4 sm:$0xff]   ;;  %6046 = vmatprep.subr.bf16.mxu1 %v6401_v16  ;;  %v6432_v16 = vld [vmem:[#allocation5 + $0x530] ss:$12 sps:$4 sm:$0xff]  }
  0xf5   : > { %1821 = vmatmul.mubr.bf16.vlgmr.msra.gmra.mrb[4].mxu1 %v6979_v10  ;;  %v6408_v10 = vld [vmem:[#allocation5 + $0x350] ss:$12 sps:$4 sm:$0xff]  }
  0xf6   : > { %1860 = vmatprep.mubr.bf16.mxu1 %v6981_v12  ;;  %v6333_v12 = vld [vmem:[#allocation5 + $0x4e0] ss:$12 sps:$4 sm:$0xff]  }
  0xf7   : > { %1671 = vmatpush1.bf16.msra.mxu0 %v6279_v20  ;;  %v6402_v20 = vld [vmem:[#allocation5 + $0x308] ss:$12 sps:$4 sm:$0xff]  }
  0xf8   : > { %1672 = vmatprep.subr.bf16.mxu0 %v6284_v21  ;;  %v6403_v21 = vld [vmem:[#allocation5 + $0x3e0] ss:$12 sps:$4 sm:$0xff]   ;;  %6047 = vmatpush3.bf16.msra.mxu1 %v6402_v20 }
  0xf9   : > { %6048 = vmatprep.subr.bf16.mxu1 %v6403_v21  ;;  %v543_v21 = vld [vmem:[%s9209_s2] sm:$0x7] }
  0xfb   : > { %1673 = vmatpush1.bf16.msra.mxu0 %v6282_v24  ;;  %v6404_v24 = vld [vmem:[#allocation5 + $0x320] ss:$12 sps:$4 sm:$0xff]  }
  0xfc   : > { %1674 = vmatprep.subr.bf16.mxu0 %v6287_v25  ;;  %v6405_v25 = vld [vmem:[#allocation5 + $0x3f8] ss:$12 sps:$4 sm:$0xff]   ;;  %6049 = vmatpush3.bf16.msra.mxu1 %v6404_v24 }
  0xfd   : > { %6050 = vmatprep.subr.bf16.mxu1 %v6405_v25 }
  0xff   : > { %1675 = vmatpush1.bf16.msra.mxu0 %v6285_v28  ;;  %v6406_v28 = vld [vmem:[#allocation5 + $0x338] ss:$12 sps:$4 sm:$0xff]  }
 0x100   : > { %1676 = vmatprep.subr.bf16.mxu0 %v6290_v29  ;;  %v6407_v29 = vld [vmem:[#allocation5 + $0x410] ss:$12 sps:$4 sm:$0xff]   ;;  %6051 = vmatpush3.bf16.msra.mxu1 %v6406_v28 }
 0x101   : > { %6052 = vmatprep.subr.bf16.mxu1 %v6407_v29 }
 0x103   : > { %1677 = vmatpush1.bf16.msra.mxu0 %v6288_v32  ;;  %v6409_v32 = vld [vmem:[#allocation5 + $0x428] ss:$12 sps:$4 sm:$0xff]  }
 0x104   : > { %1678 = vmatprep.subr.bf16.mxu0 %v6293_v33  ;;  %v6338_v33 = vld [vmem:[#allocation5 + $0x4fc] ss:$12 sps:$4 sm:$0xff]   ;;  %6053 = vmatpush3.bf16.msra.mxu1 %v6408_v10 }
 0x105   : > { %6054 = vmatprep.subr.bf16.mxu1 %v6409_v32 }
 0x107   : > { %1679 = vmatpush1.bf16.msra.mxu0 %v6291_v36  ;;  %v6336_v36 = vld [vmem:[#allocation5 + $0x4f8] ss:$12 sps:$4 sm:$0xff]  }
 0x108   : > { %1680 = vmatprep.subr.bf16.mxu0 %v6296_v38  ;;  %v6341_v38 = vld [vmem:[#allocation5 + $0x514] ss:$12 sps:$4 sm:$0xff]   ;;  %6055 = vmatpush3.bf16.msra.mxu1 %v6410_v34 }
 0x109   : > { %6056 = vmatprep.subr.bf16.mxu1 %v6411_v35 }
 0x10b   : > { %1681 = vmatpush1.bf16.msra.mxu0 %v6294_v42  ;;  %v6339_v42 = vld [vmem:[#allocation5 + $0x510] ss:$12 sps:$4 sm:$0xff]  }
 0x10c   : > { %1682 = vmatprep.subr.bf16.mxu0 %v6299_v43  ;;  %v6344_v43 = vld [vmem:[#allocation5 + $0x52c] ss:$12 sps:$4 sm:$0xff]   ;;  %6057 = vmatpush3.bf16.msra.mxu1 %v6412_v40 }
 0x10d   : > { %6058 = vmatprep.subr.bf16.mxu1 %v6413_v41 }
 0x10f   : > { %1683 = vmatpush1.bf16.msra.mxu0 %v6297_v46  ;;  %v6342_v46 = vld [vmem:[#allocation5 + $0x528] ss:$12 sps:$4 sm:$0xff]  }
 0x110   : > { %1684 = vmatprep.subr.bf16.mxu0 %v6302_v47  ;;  %v6347_v47 = vld [vmem:[#allocation5 + $0x544] ss:$12 sps:$4 sm:$0xff]   ;;  %6059 = vmatpush3.bf16.msra.mxu1 %v6414_v44 }
 0x111   : > { %6060 = vmatprep.subr.bf16.mxu1 %v6415_v45 }
 0x113   : > { %1685 = vmatpush1.bf16.msra.mxu0 %v6300_v50  ;;  %v6345_v50 = vld [vmem:[#allocation5 + $0x540] ss:$12 sps:$4 sm:$0xff]  }
 0x114   : > { %1686 = vmatprep.subr.bf16.mxu0 %v6305_v51  ;;  %v6350_v51 = vld [vmem:[#allocation5 + $0x55c] ss:$12 sps:$4 sm:$0xff]   ;;  %6061 = vmatpush3.bf16.msra.mxu1 %v6416_v48 }
 0x115   : > { %6068 = vmatprep.subr.bf16.mxu1 %v6417_v49 }
 0x117   : > { %1687 = vmatpush1.bf16.msra.mxu0 %v6303_v54  ;;  %v6348_v54 = vld [vmem:[#allocation5 + $0x558] ss:$12 sps:$4 sm:$0xff]   ;;  %1861 = vmatmul.mubr.bf16.vlgmr.msra.gmra.mrb[8].mxu1 %v6989_v15 }
 0x118   : > { %1688 = vmatprep.subr.bf16.mxu0 %v6308_v55  ;;  %v6353_v55 = vld [vmem:[#allocation5 + $0x574] ss:$12 sps:$4 sm:$0xff]   ;;  %6069 = vmatpush3.bf16.msra.mxu1 %v6418_v52 }
 0x119   : > { %1900 = vmatprep.mubr.bf16.mxu1 %v6991_v18  ;;  %6070 = vmatprep.subr.bf16.mxu1 %v6419_v53 }
 0x11b   : > { %1689 = vmatpush1.bf16.msra.mxu0 %v6306_v58  ;;  %v6351_v58 = vld [vmem:[#allocation5 + $0x570] ss:$12 sps:$4 sm:$0xff]  }
 0x11c   : > { %1690 = vmatprep.subr.bf16.mxu0 %v6311_v59  ;;  %v6356_v59 = vld [vmem:[#allocation5 + $0x58c] ss:$12 sps:$4 sm:$0xff]   ;;  %6071 = vmatpush3.bf16.msra.mxu1 %v6420_v56 }
 0x11d   : > { %6072 = vmatprep.subr.bf16.mxu1 %v6421_v57 }
 0x11f   : > { %1691 = vmatpush1.bf16.msra.mxu0 %v6309_v39  ;;  %v6354_v39 = vld [vmem:[#allocation5 + $0x588] ss:$12 sps:$4 sm:$0xff]  }
 0x120   : > { %1692 = vmatprep.subr.bf16.mxu0 %v6314_v61  ;;  %v6359_v61 = vld [vmem:[#allocation5 + $0x5a4] ss:$12 sps:$4 sm:$0xff]   ;;  %6073 = vmatpush3.bf16.msra.mxu1 %v6422_v37 }
 0x121   : > { %6074 = vmatprep.subr.bf16.mxu1 %v6423_v60 }
 0x123   : > { %1693 = vmatpush1.bf16.msra.mxu0 %v6312_v0  ;;  %v6357_v0 = vld [vmem:[#allocation5 + $0x5a0] ss:$12 sps:$4 sm:$0xff]  }
 0x124   : > { %1694 = vmatprep.subr.bf16.mxu0 %v6317_v1  ;;  %v6362_v1 = vld [vmem:[#allocation5 + $0x5bc] ss:$12 sps:$4 sm:$0xff]   ;;  %6075 = vmatpush3.bf16.msra.mxu1 %v6424_v62 }
 0x125   : > { %6076 = vmatprep.subr.bf16.mxu1 %v6425_v63 }
 0x127   : > { %1695 = vmatpush1.bf16.msra.mxu0 %v6315_v4  ;;  %v6360_v4 = vld [vmem:[#allocation5 + $0x5b8] ss:$12 sps:$4 sm:$0xff]  }
 0x128   : > { %1696 = vmatprep.subr.bf16.mxu0 %v6320_v5  ;;  %v6365_v5 = vld [vmem:[#allocation5 + $0x5d4] ss:$12 sps:$4 sm:$0xff]   ;;  %6077 = vmatpush3.bf16.msra.mxu1 %v6426_v2 }
 0x129   : > { %6078 = vmatprep.subr.bf16.mxu1 %v6427_v3 }
 0x12b   : > { %1697 = vmatpush1.bf16.msra.mxu0 %v6318_v8  ;;  %v6363_v8 = vld [vmem:[#allocation5 + $0x5d0] ss:$12 sps:$4 sm:$0xff]  }
 0x12c   : > { %1707 = vmatprep.subr.bf16.mxu0 %v6323_v11  ;;  %6079 = vmatpush3.bf16.msra.mxu1 %v6428_v6  ;;  %v6430_v11 = vld [vmem:[#allocation5 + $0x518] ss:$12 sps:$4 sm:$0xff]  }
 0x12d   : > { %6080 = vmatprep.subr.bf16.mxu1 %v6429_v7 }
 0x12e   : > { %1699 = vmatmul.mubr.bf16.vlgmr.msra.gmra.mrb[0].mxu0 %v6989_v15  ;;  %v277_v15 = vld [vmem:[%s6958_s23 + $0x30] sm:$0xff] }
 0x12f   : > { %1708 = vmatpush1.bf16.msra.mxu0 %v6321_v17  ;;  %1739 = vmatprep.mubr.bf16.mxu0 %v6991_v18  ;;  %v285_v17 = vpack.c.bf16 %v277_v15, %v277_v15  ;;  %v545_v18 = vlaneseq }
 0x130   : > { %1709 = vmatprep.subr.bf16.mxu0 %v6326_v19  ;;  %6081 = vmatpush3.bf16.msra.mxu1 %v6430_v11 }
 0x131   : > { %6082 = vmatprep.subr.bf16.mxu1 %v6431_v13  ;;  %v7000_v19 = vshrl.u32 %v545_v18, 7 }
 0x133   : > { %1710 = vmatpush1.bf16.msra.mxu0 %v6324_v22  ;;  %v7003_v20 = vsub.s32 0, %v7000_v19  ;;  %v7009_v22 = vsub.s32 1, %v7000_v19  ;;  %v7014_v28 = vsub.s32 2, %v7000_v19  ;;  %v7030_v52 = vsub.s32 3, %v7000_v19 }
 0x134   : > { %1711 = vmatprep.subr.bf16.mxu0 %v6329_v23  ;;  %6083 = vmatpush3.bf16.msra.mxu1 %v6432_v16  ;;  %v7037_v37 = vsub.s32 4, %v7000_v19  ;;  %v7053_v63 = vsub.s32 6, %v7000_v19 }
 0x135   : > { %9357 = vst [vmem:[#allocation12_spill] sm:$0xff] %v7003_v20  ;;  %9358 = vst [vmem:[#allocation13_spill] sm:$0xff] %v7009_v22  ;;  %v548_v23 = vrot.slane %v543_v21, %v7003_v20  ;;  %v552_v24 = vrot.slane %v543_v21, %v7009_v22 }
 0x136   : > { %9359 = vst [vmem:[#allocation14_spill] sm:$0xff] %v7014_v28  ;;  %9360 = vst [vmem:[#allocation15_spill] sm:$0xff] %v7030_v52 }
 0x137   : > { %1712 = vmatpush1.bf16.msra.mxu0 %v6327_v26  ;;  %1901 = vmatmul.mubr.bf16.vlgmr.msra.gmra.mrb[12].mxu1 %v285_v17  ;;  %9362 = vst [vmem:[#allocation17_spill] sm:$0xff] %v7037_v37  ;;  %9366 = vst [vmem:[#allocation21_spill] sm:$0xff] %v7053_v63 }
 0x138   : > { %1713 = vmatprep.subr.bf16.mxu0 %v6332_v27 }
 0x13b   : > { %1714 = vmatpush1.bf16.msra.mxu0 %v6330_v30 }
 0x13c   : > { %1715 = vmatprep.subr.bf16.mxu0 %v6335_v31 }
 0x13f   : > { %1716 = vmatpush1.bf16.msra.mxu0 %v6333_v12 }
 0x140   : > { %1717 = vmatprep.subr.bf16.mxu0 %v6338_v33 }
 0x143   : > { %1718 = vmatpush1.bf16.msra.mxu0 %v6336_v36  ;;  %v556_v36 = vrot.slane %v543_v21, %v7014_v28 }
 0x144   : > { %1719 = vmatprep.subr.bf16.mxu0 %v6341_v38 }
 0x147   : > { %1720 = vmatpush1.bf16.msra.mxu0 %v6339_v42 }
 0x148   : > { %1721 = vmatprep.subr.bf16.mxu0 %v6344_v43 }
 0x14b   : > { %1722 = vmatpush1.bf16.msra.mxu0 %v6342_v46 }
 0x14c   : > { %1723 = vmatprep.subr.bf16.mxu0 %v6347_v47 }
 0x14f   : > { %1724 = vmatpush1.bf16.msra.mxu0 %v6345_v50 }
 0x150   : > { %1725 = vmatprep.subr.bf16.mxu0 %v6350_v51 }
 0x153   : > { %1726 = vmatpush1.bf16.msra.mxu0 %v6348_v54 }
 0x154   : > { %1727 = vmatprep.subr.bf16.mxu0 %v6353_v55 }
 0x157   : > { %1728 = vmatpush1.bf16.msra.mxu0 %v6351_v58 }
 0x158   : > { %1729 = vmatprep.subr.bf16.mxu0 %v6356_v59 }
 0x15b   : > { %1730 = vmatpush1.bf16.msra.mxu0 %v6354_v39 }
 0x15c   : > { %1731 = vmatprep.subr.bf16.mxu0 %v6359_v61  ;;  %v7046_v61 = vsub.s32 5, %v7000_v19 }
 0x15e   : > { %9364 = vst [vmem:[#allocation19_spill] sm:$0xff] %v7046_v61 }
 0x15f   : > { %1732 = vmatpush1.bf16.msra.mxu0 %v6357_v0 }
 0x160   : > { %1733 = vmatprep.subr.bf16.mxu0 %v6362_v1  ;;  %v7060_v1 = vsub.s32 7, %v7000_v19 }
 0x162   : > { %9368 = vst [vmem:[#allocation23_spill] sm:$0xff] %v7060_v1 }
 0x163   : > { %1734 = vmatpush1.bf16.msra.mxu0 %v6360_v4 }
 0x164   : > { %1735 = vmatprep.subr.bf16.mxu0 %v6365_v5 }
 0x167   : > { %1736 = vmatpush1.bf16.msra.mxu0 %v6363_v8 }
 0x168   : > { %1737 = vmatprep.subr.bf16.mxu0 %v6368_v9 }
 0x16b   : > { %1738 = vmatpush1.bf16.msra.mxu0 %v6366_v14 }
 0x16e   : > { %1740 = vmatmul.mubr.bf16.vlgmr.msra.gmra.mrb[0].mxu0 %v285_v17 }
 0x190   : > { %v6018_v25 = vpop.f32.mrb[0].mxu1 }
 0x191   : > { %v6019_v27 = vpop.f32.mrb[1].mxu1 }
 0x192   : > { %v6020_v31 = vadd.f32 %v6019_v27, %v6018_v25  ;;  %v6021_v10 = vpop.f32.mrb[2].mxu1 }
 0x193   : > { %v6022_v33 = vpop.f32.mrb[3].mxu1 }
 0x194   : > { %v1783_v44 = vadd.f32 %v6020_v31, %v556_v36 }
 0x1c8   : > { %v6040_v38 = vpop.f32.mrb[4].mxu1 }
 0x1c9   : > { %v6041_v40 = vpop.f32.mrb[5].mxu1 }
 0x1ca   : > { %v6043_v41 = vpop.f32.mrb[6].mxu1  ;;  %v6042_v45 = vadd.f32 %v6041_v40, %v6040_v38 }
 0x1cb   : > { %v6044_v42 = vpop.f32.mrb[7].mxu1 }
 0x1cc   : > { %v1823_v48 = vadd.f32 %v6042_v45, %v1783_v44 }
 0x1ea   : > { %v6062_v46 = vpop.f32.mrb[8].mxu1 }
 0x1eb   : > { %v6063_v47 = vpop.f32.mrb[9].mxu1 }
 0x1ec   : > { %v6064_v49 = vadd.f32 %v6063_v47, %v6062_v46  ;;  %v6065_v50 = vpop.f32.mrb[10].mxu1 }
 0x1ed   : > { %v6066_v51 = vpop.f32.mrb[11].mxu1 }
 0x1ee   : > { %v1863_v54 = vadd.f32 %v6064_v49, %v1823_v48 }
 0x20a   : > { %v6084_v55 = vpop.f32.mrb[12].mxu1 }
 0x20b   : > { %v6085_v56 = vpop.f32.mrb[13].mxu1 }
 0x20c   : > { %v6086_v57 = vadd.f32 %v6085_v56, %v6084_v55  ;;  %v6087_v58 = vpop.f32.mrb[14].mxu1 }
 0x20d   : > { %v6088_v59 = vpop.f32.mrb[15].mxu1 }
 0x20e   : > { %v7042_v39 = vadd.f32 %v6086_v57, %v1863_v54 }
 0x210   : > { %vm1912_vm0 = vcmp.ge.f32.partialorder %v7042_v39, 0.0 }
 0x241   : > { %v1741_v26 = vpop.f32.mrb[0].mxu0 }
 0x242   : > { %v6090_v29 = vadd.f32 %v1741_v26, %v548_v23  ;;  %v1743_v30 = vpop.f32.mrb[1].mxu0 }
 0x243   : > { %v7016_v32 = vadd.f32 %v1743_v30, %v552_v24  ;;  %v1745_v12 = vpop.f32.mrb[2].mxu0 }
 0x244   : > { %v7019_v34 = vrot.slane %v6090_v29, %v7003_v20  ;;  %v1746_v35 = vpop.f32.mrb[3].mxu0  ;;  %v7025_v43 = vrot.slane %v6090_v29, %v7009_v22  ;;  %v7033_v53 = vrot.slane %v6090_v29, %v7014_v28  ;;  %v7040_v60 = vrot.slane %v6090_v29, %v7030_v52 }
 0x245   : > { %1908 = vmax.xlane.f32.xlu0 %v7016_v32  ;;  %v7049_v62 = vrot.slane %v6090_v29, %v7037_v37  ;;  %v7056_v0 = vrot.slane %v6090_v29, %v7046_v61  ;;  %v7063_v2 = vrot.slane %v6090_v29, %v7053_v63  ;;  %v7068_v3 = vrot.slane %v6090_v29, %v7060_v1 }
 0x246   : > { %2189 = vbcast.lane.b32.xlu1 %v7019_v34, 256  ;;  %9361 = vst [vmem:[#allocation16_spill] sm:$0xff] %v7033_v53  ;;  %9363 = vst [vmem:[#allocation18_spill] sm:$0xff] %v7040_v60  ;;  %v7254_v59 = vrot.slane %v7016_v32, %v7003_v20 }
 0x247   : > { %9365 = vst [vmem:[#allocation20_spill] sm:$0xff] %v7049_v62  ;;  %9367 = vst [vmem:[#allocation22_spill] sm:$0xff] %v7056_v0 }
 0x248   : > { %9369 = vst [vmem:[#allocation24_spill] sm:$0xff] %v7063_v2  ;;  %9370 = vst [vmem:[#allocation25_spill] sm:$0xff] %v7068_v3 }
 0x249   : > { %1910 = vmin.xlane.f32.xlu0 %v7016_v32 }
 0x24a   : > { %2200 = vbcast.lane.b32.xlu1 %v7025_v43, 256 }
 0x24e   : > { %2211 = vbcast.lane.b32.xlu1 %v7033_v53, 256 }
 0x252   : > { %2222 = vbcast.lane.b32.xlu1 %v7040_v60, 256 }
 0x256   : > { %2233 = vbcast.lane.b32.xlu1 %v7049_v62, 256 }
 0x25a   : > { %2244 = vbcast.lane.b32.xlu1 %v7056_v0, 256 }
 0x25e   : > { %2255 = vbcast.lane.b32.xlu1 %v7063_v2, 256 }
 0x25f   : > { %2193 = vbcast.lane.b32.xlu0 %v7019_v34, 264 }
 0x262   : > { %2266 = vbcast.lane.b32.xlu1 %v7068_v3, 256 }
 0x263   : > { %2204 = vbcast.lane.b32.xlu0 %v7025_v43, 264 }
 0x266   : > { %2562 = vbcast.lane.b32.xlu1 %v7019_v34, 272 }
 0x267   : > { %2215 = vbcast.lane.b32.xlu0 %v7033_v53, 264 }
 0x26a   : > { %2570 = vbcast.lane.b32.xlu1 %v7025_v43, 272 }
 0x26b   : > { %2226 = vbcast.lane.b32.xlu0 %v7040_v60, 264 }
 0x26e   : > { %2578 = vbcast.lane.b32.xlu1 %v7033_v53, 272 }
 0x26f   : > { %2237 = vbcast.lane.b32.xlu0 %v7049_v62, 264 }
 0x272   : > { %2586 = vbcast.lane.b32.xlu1 %v7040_v60, 272 }
 0x273   : > { %2248 = vbcast.lane.b32.xlu0 %v7056_v0, 264 }
 0x276   : > { %2914 = vbcast.lane.b32.xlu1 %v7019_v34, 288 }
 0x277   : > { %2259 = vbcast.lane.b32.xlu0 %v7063_v2, 264 }
 0x27a   : > { %2922 = vbcast.lane.b32.xlu1 %v7025_v43, 288 }
 0x27b   : > { %2270 = vbcast.lane.b32.xlu0 %v7068_v3, 264 }
 0x27e   : > { %2594 = vbcast.lane.b32.xlu1 %v7049_v62, 272 }
 0x27f   : > { %2566 = vbcast.lane.b32.xlu0 %v7019_v34, 280 }
 0x282   : > { %2930 = vbcast.lane.b32.xlu1 %v7033_v53, 288 }
 0x283   : > { %2574 = vbcast.lane.b32.xlu0 %v7025_v43, 280 }
 0x286   : > { %2602 = vbcast.lane.b32.xlu1 %v7056_v0, 272 }
 0x287   : > { %2582 = vbcast.lane.b32.xlu0 %v7033_v53, 280 }
 0x28a   : > { %2938 = vbcast.lane.b32.xlu1 %v7040_v60, 288 }
 0x28b   : > { %2590 = vbcast.lane.b32.xlu0 %v7040_v60, 280 }
 0x28e   : > { %3266 = vbcast.lane.b32.xlu1 %v7019_v34, 304 }
 0x28f   : > { %2918 = vbcast.lane.b32.xlu0 %v7019_v34, 296 }
 0x292   : > { %3274 = vbcast.lane.b32.xlu1 %v7025_v43, 304 }
 0x293   : > { %2926 = vbcast.lane.b32.xlu0 %v7025_v43, 296 }
 0x296   : > { %2610 = vbcast.lane.b32.xlu1 %v7063_v2, 272 }
 0x297   : > { %2598 = vbcast.lane.b32.xlu0 %v7049_v62, 280 }
 0x29a   : > { %2946 = vbcast.lane.b32.xlu1 %v7049_v62, 288 }
 0x29b   : > { %2934 = vbcast.lane.b32.xlu0 %v7033_v53, 296 }
 0x29e   : > { %3282 = vbcast.lane.b32.xlu1 %v7033_v53, 304 }
 0x29f   : > { %2606 = vbcast.lane.b32.xlu0 %v7056_v0, 280 }
 0x2a2   : > { %2618 = vbcast.lane.b32.xlu1 %v7068_v3, 272 }
 0x2a3   : > { %2942 = vbcast.lane.b32.xlu0 %v7040_v60, 296 }
 0x2a6   : > { %2954 = vbcast.lane.b32.xlu1 %v7056_v0, 288 }
 0x2a7   : > { %3270 = vbcast.lane.b32.xlu0 %v7019_v34, 312 }
 0x2aa   : > { %3290 = vbcast.lane.b32.xlu1 %v7040_v60, 304 }
 0x2ab   : > { %3278 = vbcast.lane.b32.xlu0 %v7025_v43, 312 }
 0x2ae   : > { %3618 = vbcast.lane.b32.xlu1 %v7019_v34, 320 }
 0x2af   : > { %2614 = vbcast.lane.b32.xlu0 %v7063_v2, 280 }
 0x2b2   : > { %3626 = vbcast.lane.b32.xlu1 %v7025_v43, 320 }
 0x2b3   : > { %2950 = vbcast.lane.b32.xlu0 %v7049_v62, 296 }
 0x2b6   : > { %2962 = vbcast.lane.b32.xlu1 %v7063_v2, 288 }
 0x2b7   : > { %3286 = vbcast.lane.b32.xlu0 %v7033_v53, 312 }
 0x2b8   : > { %v7114_v4 = vpop.permute.xlu1 %2189 }
 0x2ba   : > { %3298 = vbcast.lane.b32.xlu1 %v7049_v62, 304 }
 0x2bb   : > { %2622 = vbcast.lane.b32.xlu0 %v7068_v3, 280 }
 0x2bc   : > { %v7118_v5 = vpop.permute.xlu1 %2200 }
 0x2be   : > { %3634 = vbcast.lane.b32.xlu1 %v7033_v53, 320 }
 0x2bf   : > { %2958 = vbcast.lane.b32.xlu0 %v7056_v0, 296 }
 0x2c0   : > { %v7122_v6 = vpop.permute.xlu1 %2211 }
 0x2c2   : > { %2970 = vbcast.lane.b32.xlu1 %v7068_v3, 288 }
 0x2c3   : > { %3294 = vbcast.lane.b32.xlu0 %v7040_v60, 312 }
 0x2c4   : > { %v7126_v7 = vpop.permute.xlu1 %2222 }
 0x2c6   : > { %3306 = vbcast.lane.b32.xlu1 %v7056_v0, 304 }
 0x2c7   : > { %3622 = vbcast.lane.b32.xlu0 %v7019_v34, 328 }
 0x2c8   : > { %v7130_v8 = vpop.permute.xlu1 %2233 }
 0x2ca   : > { %3642 = vbcast.lane.b32.xlu1 %v7040_v60, 320 }
 0x2cb   : > { %3630 = vbcast.lane.b32.xlu0 %v7025_v43, 328 }
 0x2cc   : > { %v7134_v9 = vpop.permute.xlu1 %2244 }
 0x2ce   : > { %3970 = vbcast.lane.b32.xlu1 %v7019_v34, 336 }
 0x2cf   : > { %2966 = vbcast.lane.b32.xlu0 %v7063_v2, 296 }
 0x2d0   : > { %v7138_v11 = vpop.permute.xlu1 %2255 }
 0x2d2   : > { %v7140_v13 = vpop.xlane.xlu0 %1908  ;;  %3978 = vbcast.lane.b32.xlu1 %v7025_v43, 336 }
 0x2d3   : > { %3302 = vbcast.lane.b32.xlu0 %v7049_v62, 312 }
 0x2d4   : > { %v7144_v14 = vpop.permute.xlu1 %2266 }
 0x2d6   : > { %v7146_v15 = vpop.xlane.xlu0 %1910  ;;  %3314 = vbcast.lane.b32.xlu1 %v7063_v2, 304 }
 0x2d7   : > { %3638 = vbcast.lane.b32.xlu0 %v7033_v53, 328 }
 0x2d8   : > { %v7150_v16 = vpop.permute.xlu1 %2562 }
 0x2d9   : > { %9371 = vst [vmem:[#allocation26_spill] sm:$0xff] %v7150_v16 }
 0x2da   : > { %v7152_v17 = vpop.permute.xlu0 %2193  ;;  %3650 = vbcast.lane.b32.xlu1 %v7049_v62, 320 }
 0x2db   : > { %2974 = vbcast.lane.b32.xlu0 %v7068_v3, 296 }
 0x2dc   : > { %v7156_v18 = vpop.permute.xlu1 %2570 }
 0x2dd   : > { %9372 = vst [vmem:[#allocation27_spill] sm:$0xff] %v7156_v18 }
 0x2de   : > { %v7158_v21 = vpop.permute.xlu0 %2204  ;;  %3986 = vbcast.lane.b32.xlu1 %v7033_v53, 336 }
 0x2df   : > { %3310 = vbcast.lane.b32.xlu0 %v7056_v0, 312 }
 0x2e0   : > { %v7162_v23 = vpop.permute.xlu1 %2578 }
 0x2e1   : > { %9373 = vst [vmem:[#allocation28_spill] sm:$0xff] %v7162_v23 }
 0x2e2   : > { %v7164_v24 = vpop.permute.xlu0 %2215  ;;  %3322 = vbcast.lane.b32.xlu1 %v7068_v3, 304 }
 0x2e3   : > { %3646 = vbcast.lane.b32.xlu0 %v7040_v60, 328 }
 0x2e4   : > { %v7168_v25 = vpop.permute.xlu1 %2586 }
 0x2e5   : > { %9374 = vst [vmem:[#allocation29_spill] sm:$0xff] %v7168_v25 }
 0x2e6   : > { %v7170_v26 = vpop.permute.xlu0 %2226  ;;  %3658 = vbcast.lane.b32.xlu1 %v7056_v0, 320 }
 0x2e7   : > { %3974 = vbcast.lane.b32.xlu0 %v7019_v34, 344 }
 0x2e8   : > { %v7174_v27 = vpop.permute.xlu1 %2914 }
 0x2e9   : > { %9375 = vst [vmem:[#allocation30_spill] sm:$0xff] %v7174_v27 }
 0x2ea   : > { %v7176_v29 = vpop.permute.xlu0 %2237  ;;  %3994 = vbcast.lane.b32.xlu1 %v7040_v60, 336 }
 0x2eb   : > { %3982 = vbcast.lane.b32.xlu0 %v7025_v43, 344 }
 0x2ec   : > { %v7180_v30 = vpop.permute.xlu1 %2922 }
 0x2ed   : > { %9376 = vst [vmem:[#allocation31_spill] sm:$0xff] %v7180_v30 }
 0x2ee   : > { %v7182_v31 = vpop.permute.xlu0 %2248  ;;  %4322 = vbcast.lane.b32.xlu1 %v7019_v34, 352 }
 0x2ef   : > { %3318 = vbcast.lane.b32.xlu0 %v7063_v2, 312 }
 0x2f0   : > { %v7186_v10 = vpop.permute.xlu1 %2594 }
 0x2f1   : > { %9377 = vst [vmem:[#allocation32_spill] sm:$0xff] %v7186_v10 }
 0x2f2   : > { %v7188_v12 = vpop.permute.xlu0 %2259  ;;  %4330 = vbcast.lane.b32.xlu1 %v7025_v43, 352 }
 0x2f3   : > { %3654 = vbcast.lane.b32.xlu0 %v7049_v62, 328 }
 0x2f4   : > { %v7192_v33 = vpop.permute.xlu1 %2930 }
 0x2f5   : > { %9378 = vst [vmem:[#allocation33_spill] sm:$0xff] %v7192_v33 }
 0x2f6   : > { %v7194_v35 = vpop.permute.xlu0 %2270  ;;  %3666 = vbcast.lane.b32.xlu1 %v7063_v2, 320 }
 0x2f7   : > { %3990 = vbcast.lane.b32.xlu0 %v7033_v53, 344 }
 0x2f8   : > { %v7198_v36 = vpop.permute.xlu1 %2602 }
 0x2f9   : > { %9379 = vst [vmem:[#allocation34_spill] sm:$0xff] %v7198_v36 }
 0x2fa   : > { %v7200_v38 = vpop.permute.xlu0 %2566  ;;  %4002 = vbcast.lane.b32.xlu1 %v7049_v62, 336 }
 0x2fb   : > { %9380 = vst [vmem:[#allocation35_spill] sm:$0xff] %v7200_v38  ;;  %3326 = vbcast.lane.b32.xlu0 %v7068_v3, 312 }
 0x2fc   : > { %v7204_v40 = vpop.permute.xlu1 %2938 }
 0x2fd   : > { %9381 = vst [vmem:[#allocation36_spill] sm:$0xff] %v7204_v40 }
 0x2fe   : > { %v7206_v41 = vpop.permute.xlu0 %2574  ;;  %4338 = vbcast.lane.b32.xlu1 %v7033_v53, 352 }
 0x2ff   : > { %9382 = vst [vmem:[#allocation37_spill] sm:$0xff] %v7206_v41  ;;  %3662 = vbcast.lane.b32.xlu0 %v7056_v0, 328 }
 0x300   : > { %v7210_v42 = vpop.permute.xlu1 %3266 }
 0x301   : > { %9383 = vst [vmem:[#allocation38_spill] sm:$0xff] %v7210_v42 }
 0x302   : > { %v7212_v44 = vpop.permute.xlu0 %2582  ;;  %3674 = vbcast.lane.b32.xlu1 %v7068_v3, 320 }
 0x303   : > { %9384 = vst [vmem:[#allocation39_spill] sm:$0xff] %v7212_v44  ;;  %3998 = vbcast.lane.b32.xlu0 %v7040_v60, 344 }
 0x304   : > { %v7216_v45 = vpop.permute.xlu1 %3274 }
 0x305   : > { %9385 = vst [vmem:[#allocation40_spill] sm:$0xff] %v7216_v45 }
 0x306   : > { %v7218_v46 = vpop.permute.xlu0 %2590  ;;  %4010 = vbcast.lane.b32.xlu1 %v7056_v0, 336 }
 0x307   : > { %9386 = vst [vmem:[#allocation41_spill] sm:$0xff] %v7218_v46  ;;  %4326 = vbcast.lane.b32.xlu0 %v7019_v34, 360 }
 0x308   : > { %v7222_v47 = vpop.permute.xlu1 %2610 }
 0x309   : > { %9387 = vst [vmem:[#allocation42_spill] sm:$0xff] %v7222_v47 }
 0x30a   : > { %v7224_v48 = vpop.permute.xlu0 %2918  ;;  %4346 = vbcast.lane.b32.xlu1 %v7040_v60, 352 }
 0x30b   : > { %9388 = vst [vmem:[#allocation43_spill] sm:$0xff] %v7224_v48  ;;  %4334 = vbcast.lane.b32.xlu0 %v7025_v43, 360 }
 0x30c   : > { %v7228_v49 = vpop.permute.xlu1 %2946 }
 0x30d   : > { %9389 = vst [vmem:[#allocation44_spill] sm:$0xff] %v7228_v49 }
 0x30e   : > { %v7230_v50 = vpop.permute.xlu0 %2926  ;;  %4674 = vbcast.lane.b32.xlu1 %v7019_v34, 368 }
 0x30f   : > { %9390 = vst [vmem:[#allocation45_spill] sm:$0xff] %v7230_v50  ;;  %3670 = vbcast.lane.b32.xlu0 %v7063_v2, 328 }
 0x310   : > { %v7234_v51 = vpop.permute.xlu1 %3282 }
 0x311   : > { %9391 = vst [vmem:[#allocation46_spill] sm:$0xff] %v7234_v51 }
 0x312   : > { %v7236_v54 = vpop.permute.xlu0 %2598  ;;  %4682 = vbcast.lane.b32.xlu1 %v7025_v43, 368 }
 0x313   : > { %9392 = vst [vmem:[#allocation47_spill] sm:$0xff] %v7236_v54  ;;  %4006 = vbcast.lane.b32.xlu0 %v7049_v62, 344 }
 0x314   : > { %v7240_v55 = vpop.permute.xlu1 %2618 }
 0x315   : > { %9393 = vst [vmem:[#allocation48_spill] sm:$0xff] %v7240_v55 }
 0x316   : > { %v7242_v56 = vpop.permute.xlu0 %2934  ;;  %4018 = vbcast.lane.b32.xlu1 %v7063_v2, 336 }
 0x317   : > { %9394 = vst [vmem:[#allocation49_spill] sm:$0xff] %v7242_v56  ;;  %4342 = vbcast.lane.b32.xlu0 %v7033_v53, 360 }
 0x318   : > { %v7246_v57 = vpop.permute.xlu1 %2954 }
 0x319   : > { %9395 = vst [vmem:[#allocation50_spill] sm:$0xff] %v7246_v57 }
 0x31a   : > { %v7248_v58 = vpop.permute.xlu0 %2606  ;;  %4354 = vbcast.lane.b32.xlu1 %v7049_v62, 352 }
 0x31b   : > { %9396 = vst [vmem:[#allocation51_spill] sm:$0xff] %v7248_v58  ;;  %3678 = vbcast.lane.b32.xlu0 %v7068_v3, 328  ;;  %v7270_v3 = vrot.slane %v7016_v32, %v7009_v22 }
 0x31c   : > { %v7256_v51 = vpop.permute.xlu1 %3290 }
 0x31d   : > { %9397 = vst [vmem:[#allocation52_spill] sm:$0xff] %v7256_v51 }
 0x31e   : > { %v7258_v55 = vpop.permute.xlu0 %2942  ;;  %2101 = vbcast.lane.b32.xlu1 %v7254_v59, 256 }
 0x31f   : > { %9398 = vst [vmem:[#allocation53_spill] sm:$0xff] %v7258_v55  ;;  %4014 = vbcast.lane.b32.xlu0 %v7056_v0, 344 }
 0x320   : > { %v7262_v49 = vpop.permute.xlu1 %3618 }
 0x321   : > { %9399 = vst [vmem:[#allocation54_spill] sm:$0xff] %v7262_v49  ;;  %v7280_v49 = vrot.slane %v7016_v32, %v7014_v28 }
 0x322   : > { %v7264_v57 = vpop.permute.xlu0 %3270  ;;  %2105 = vbcast.lane.b32.xlu1 %v7254_v59, 264 }
 0x323   : > { %9400 = vst [vmem:[#allocation55_spill] sm:$0xff] %v7264_v57  ;;  %4350 = vbcast.lane.b32.xlu0 %v7040_v60, 360 }
 0x324   : > { %v7272_v53 = vpop.permute.xlu1 %3626 }
 0x325   : > { %9401 = vst [vmem:[#allocation56_spill] sm:$0xff] %v7272_v53 }
 0x326   : > { %v7274_v51 = vpop.permute.xlu0 %3278  ;;  %2116 = vbcast.lane.b32.xlu1 %v7270_v3, 264 }
 0x327   : > { %9402 = vst [vmem:[#allocation57_spill] sm:$0xff] %v7274_v51  ;;  %4678 = vbcast.lane.b32.xlu0 %v7019_v34, 376  ;;  %v7296_v34 = vrot.slane %v7016_v32, %v7030_v52  ;;  %v7312_v52 = vrot.slane %v7016_v32, %v7037_v37  ;;  %v7332_v37 = vrot.slane %v7016_v32, %v7053_v63 }
 0x328   : > { %v7282_v0 = vpop.permute.xlu1 %2962 }
 0x329   : > { %9403 = vst [vmem:[#allocation58_spill] sm:$0xff] %v7282_v0 }
 0x32a   : > { %v7284_v47 = vpop.permute.xlu0 %2614  ;;  %2123 = vbcast.lane.b32.xlu1 %v7280_v49, 256 }
 0x32b   : > { %9404 = vst [vmem:[#allocation59_spill] sm:$0xff] %v7284_v47  ;;  %4686 = vbcast.lane.b32.xlu0 %v7025_v43, 376 }
 0x32c   : > { %v7288_v22 = vpop.permute.xlu1 %3298 }
 0x32d   : > { %9405 = vst [vmem:[#allocation60_spill] sm:$0xff] %v7288_v22 }
 0x32e   : > { %v7290_v53 = vpop.permute.xlu0 %2950  ;;  %2127 = vbcast.lane.b32.xlu1 %v7280_v49, 264 }
 0x32f   : > { %9406 = vst [vmem:[#allocation61_spill] sm:$0xff] %v7290_v53  ;;  %4022 = vbcast.lane.b32.xlu0 %v7063_v2, 344 }
 0x330   : > { %v7298_v28 = vpop.permute.xlu1 %3634 }
 0x331   : > { %9407 = vst [vmem:[#allocation62_spill] sm:$0xff] %v7298_v28 }
 0x332   : > { %v7300_v0 = vpop.permute.xlu0 %3286  ;;  %2134 = vbcast.lane.b32.xlu1 %v7296_v34, 256 }
 0x333   : > { %9408 = vst [vmem:[#allocation63_spill] sm:$0xff] %v7300_v0  ;;  %4358 = vbcast.lane.b32.xlu0 %v7049_v62, 360 }
 0x334   : > { %v7304_v43 = vpop.permute.xlu1 %2970 }
 0x335   : > { %9409 = vst [vmem:[#allocation64_spill] sm:$0xff] %v7304_v43  ;;  %v7322_v43 = vrot.slane %v7016_v32, %v7046_v61  ;;  %v7342_v61 = vrot.slane %v7016_v32, %v7060_v1 }
 0x336   : > { %v7306_v22 = vpop.permute.xlu0 %2622  ;;  %2138 = vbcast.lane.b32.xlu1 %v7296_v34, 264 }
 0x337   : > { %9410 = vst [vmem:[#allocation65_spill] sm:$0xff] %v7306_v22  ;;  %2112 = vbcast.lane.b32.xlu0 %v7270_v3, 256 }
 0x338   : > { %v7314_v2 = vpop.permute.xlu1 %3306 }
 0x339   : > { %9411 = vst [vmem:[#allocation66_spill] sm:$0xff] %v7314_v2 }
 0x33a   : > { %v7316_v28 = vpop.permute.xlu0 %2958  ;;  %2145 = vbcast.lane.b32.xlu1 %v7312_v52, 256 }
 0x33b   : > { %9412 = vst [vmem:[#allocation67_spill] sm:$0xff] %v7316_v28  ;;  %2149 = vbcast.lane.b32.xlu0 %v7312_v52, 264 }
 0x33c   : > { %v7324_v62 = vpop.permute.xlu1 %3642 }
 0x33d   : > { %9413 = vst [vmem:[#allocation68_spill] sm:$0xff] %v7324_v62 }
 0x33e   : > { %v7326_v60 = vpop.permute.xlu0 %3294  ;;  %2156 = vbcast.lane.b32.xlu1 %v7322_v43, 256 }
 0x33f   : > { %9414 = vst [vmem:[#allocation69_spill] sm:$0xff] %v7326_v60  ;;  %2160 = vbcast.lane.b32.xlu0 %v7322_v43, 264 }
 0x340   : > { %v7334_v2 = vpop.permute.xlu1 %3970 }
 0x341   : > { %9415 = vst [vmem:[#allocation70_spill] sm:$0xff] %v7334_v2 }
 0x342   : > { %v7336_v28 = vpop.permute.xlu0 %3622  ;;  %2167 = vbcast.lane.b32.xlu1 %v7332_v37, 256 }
 0x343   : > { %9416 = vst [vmem:[#allocation71_spill] sm:$0xff] %v7336_v28  ;;  %2171 = vbcast.lane.b32.xlu0 %v7332_v37, 264 }
 0x344   : > { %v7344_v62 = vpop.permute.xlu1 %3978 }
 0x345   : > { %9417 = vst [vmem:[#allocation72_spill] sm:$0xff] %v7344_v62 }
 0x346   : > { %v7346_v60 = vpop.permute.xlu0 %3630  ;;  %2178 = vbcast.lane.b32.xlu1 %v7342_v61, 256 }
 0x347   : > { %9418 = vst [vmem:[#allocation73_spill] sm:$0xff] %v7346_v60  ;;  %2182 = vbcast.lane.b32.xlu0 %v7342_v61, 264 }
 0x348   : > { %v7350_v63 = vpop.permute.xlu1 %3314 }
 0x349   : > { %9419 = vst [vmem:[#allocation74_spill] sm:$0xff] %v7350_v63 }
 0x34a   : > { %v7352_v2 = vpop.permute.xlu0 %2966  ;;  %2498 = vbcast.lane.b32.xlu1 %v7254_v59, 272 }
 0x34b   : > { %9420 = vst [vmem:[#allocation75_spill] sm:$0xff] %v7352_v2  ;;  %2502 = vbcast.lane.b32.xlu0 %v7254_v59, 280 }
 0x34c   : > { %v7356_v28 = vpop.permute.xlu1 %3650 }
 0x34d   : > { %9421 = vst [vmem:[#allocation76_spill] sm:$0xff] %v7356_v28 }
 0x34e   : > { %v7358_v32 = vpop.permute.xlu0 %3302  ;;  %2506 = vbcast.lane.b32.xlu1 %v7270_v3, 272 }
 0x34f   : > { %9422 = vst [vmem:[#allocation77_spill] sm:$0xff] %v7358_v32  ;;  %2510 = vbcast.lane.b32.xlu0 %v7270_v3, 280 }
 0x350   : > { %v7362_v1 = vpop.permute.xlu1 %3986 }
 0x351   : > { %9423 = vst [vmem:[#allocation78_spill] sm:$0xff] %v7362_v1 }
 0x352   : > { %v7364_v62 = vpop.permute.xlu0 %3638  ;;  %2514 = vbcast.lane.b32.xlu1 %v7280_v49, 272 }
 0x353   : > { %9424 = vst [vmem:[#allocation79_spill] sm:$0xff] %v7364_v62  ;;  %2518 = vbcast.lane.b32.xlu0 %v7280_v49, 280 }
 0x354   : > { %v7368_v63 = vpop.permute.xlu1 %3322 }
 0x355   : > { %9425 = vst [vmem:[#allocation80_spill] sm:$0xff] %v7368_v63 }
 0x356   : > { %v7370_v2 = vpop.permute.xlu0 %2974  ;;  %2522 = vbcast.lane.b32.xlu1 %v7296_v34, 272 }
 0x357   : > { %9426 = vst [vmem:[#allocation81_spill] sm:$0xff] %v7370_v2  ;;  %2526 = vbcast.lane.b32.xlu0 %v7296_v34, 280 }
 0x358   : > { %v7374_v28 = vpop.permute.xlu1 %3658 }
 0x359   : > { %9427 = vst [vmem:[#allocation82_spill] sm:$0xff] %v7374_v28 }
 0x35a   : > { %v7376_v32 = vpop.permute.xlu0 %3310  ;;  %2850 = vbcast.lane.b32.xlu1 %v7254_v59, 288 }
 0x35b   : > { %9428 = vst [vmem:[#allocation83_spill] sm:$0xff] %v7376_v32  ;;  %2854 = vbcast.lane.b32.xlu0 %v7254_v59, 296 }
 0x35c   : > { %v7380_v1 = vpop.permute.xlu1 %3994 }
 0x35d   : > { %9429 = vst [vmem:[#allocation84_spill] sm:$0xff] %v7380_v1 }
 0x35e   : > { %v7382_v62 = vpop.permute.xlu0 %3646  ;;  %2858 = vbcast.lane.b32.xlu1 %v7270_v3, 288 }
 0x35f   : > { %9430 = vst [vmem:[#allocation85_spill] sm:$0xff] %v7382_v62  ;;  %2862 = vbcast.lane.b32.xlu0 %v7270_v3, 296 }
 0x360   : > { %v7386_v63 = vpop.permute.xlu1 %4322 }
 0x361   : > { %9431 = vst [vmem:[#allocation86_spill] sm:$0xff] %v7386_v63 }
 0x362   : > { %v7388_v2 = vpop.permute.xlu0 %3974  ;;  %2530 = vbcast.lane.b32.xlu1 %v7312_v52, 272 }
 0x363   : > { %9432 = vst [vmem:[#allocation87_spill] sm:$0xff] %v7388_v2  ;;  %2534 = vbcast.lane.b32.xlu0 %v7312_v52, 280 }
 0x364   : > { %v7392_v28 = vpop.permute.xlu1 %4330 }
 0x365   : > { %9433 = vst [vmem:[#allocation88_spill] sm:$0xff] %v7392_v28 }
 0x366   : > { %v7394_v32 = vpop.permute.xlu0 %3982  ;;  %2866 = vbcast.lane.b32.xlu1 %v7280_v49, 288 }
 0x367   : > { %9434 = vst [vmem:[#allocation89_spill] sm:$0xff] %v7394_v32  ;;  %2870 = vbcast.lane.b32.xlu0 %v7280_v49, 296 }
 0x368   : > { %v7398_v1 = vpop.permute.xlu1 %3666 }
 0x369   : > { %9435 = vst [vmem:[#allocation90_spill] sm:$0xff] %v7398_v1 }
 0x36a   : > { %v7400_v62 = vpop.permute.xlu0 %3318  ;;  %2538 = vbcast.lane.b32.xlu1 %v7322_v43, 272 }
 0x36b   : > { %9436 = vst [vmem:[#allocation91_spill] sm:$0xff] %v7400_v62  ;;  %2542 = vbcast.lane.b32.xlu0 %v7322_v43, 280 }
 0x36c   : > { %v7404_v63 = vpop.permute.xlu1 %4002 }
 0x36d   : > { %9437 = vst [vmem:[#allocation92_spill] sm:$0xff] %v7404_v63 }
 0x36e   : > { %v7406_v2 = vpop.permute.xlu0 %3654  ;;  %2874 = vbcast.lane.b32.xlu1 %v7296_v34, 288 }
 0x36f   : > { %9438 = vst [vmem:[#allocation93_spill] sm:$0xff] %v7406_v2  ;;  %2878 = vbcast.lane.b32.xlu0 %v7296_v34, 296 }
 0x370   : > { %v7410_v28 = vpop.permute.xlu1 %4338 }
 0x371   : > { %9439 = vst [vmem:[#allocation94_spill] sm:$0xff] %v7410_v28 }
 0x372   : > { %v7412_v32 = vpop.permute.xlu0 %3990  ;;  %3202 = vbcast.lane.b32.xlu1 %v7254_v59, 304 }
 0x373   : > { %9440 = vst [vmem:[#allocation95_spill] sm:$0xff] %v7412_v32  ;;  %3206 = vbcast.lane.b32.xlu0 %v7254_v59, 312  ;;  %v6750_v32 = vmov 1966171168  }
 0x374   : > { %v7416_v1 = vpop.permute.xlu1 %3674  ;;  %v1919_v60 = vunpack.c.l.s4 %v6750_v32  ;;  %v1914_v32 = vmul.f32 %v7146_v15, %v7042_v39 }
 0x375   : > { %9441 = vst [vmem:[#allocation96_spill] sm:$0xff] %v7416_v1 }
 0x376   : > { %v7418_v62 = vpop.permute.xlu0 %3326  ;;  %3210 = vbcast.lane.b32.xlu1 %v7270_v3, 304 }
 0x377   : > { %9442 = vst [vmem:[#allocation97_spill] sm:$0xff] %v7418_v62  ;;  %3214 = vbcast.lane.b32.xlu0 %v7270_v3, 312  ;;  %v1920_v62 = vunpack.c.0.s8 %v1919_v60 }
 0x378   : > { %v7422_v63 = vpop.permute.xlu1 %4010 }
 0x379   : > { %9443 = vst [vmem:[#allocation98_spill] sm:$0xff] %v7422_v63 }
 0x37a   : > { %v7424_v2 = vpop.permute.xlu0 %3662  ;;  %2546 = vbcast.lane.b32.xlu1 %v7332_v37, 272 }
 0x37b   : > { %9444 = vst [vmem:[#allocation99_spill] sm:$0xff] %v7424_v2  ;;  %2550 = vbcast.lane.b32.xlu0 %v7332_v37, 280 }
 0x37c   : > { %v7428_v28 = vpop.permute.xlu1 %4346 }
 0x37d   : > { %9445 = vst [vmem:[#allocation100_spill] sm:$0xff] %v7428_v28  ;;  %v7443_v28 = vsub.s32 %v1920_v62, %v7000_v19 }
 0x37e   : > { %v7430_v22 = vpop.permute.xlu0 %3998  ;;  %2882 = vbcast.lane.b32.xlu1 %v7312_v52, 288 }
 0x37f   : > { %9446 = vst [vmem:[#allocation101_spill] sm:$0xff] %v7430_v22  ;;  %2886 = vbcast.lane.b32.xlu0 %v7312_v52, 296  ;;  %v1924_v60 = vrot.slane %v7042_v39, %v7443_v28 }
 0x380   : > { %v7434_v1 = vpop.permute.xlu1 %4674 }
 0x381   : > { %9447 = vst [vmem:[#allocation102_spill] sm:$0xff] %v7434_v1  ;;  %v1940_v15 = vrot.slane %v1924_v60, %v7443_v28 }
 0x382   : > { %v7436_v63 = vpop.permute.xlu0 %4326  ;;  %3218 = vbcast.lane.b32.xlu1 %v7280_v49, 304 }
 0x383   : > { %9448 = vst [vmem:[#allocation103_spill] sm:$0xff] %v7436_v63  ;;  %3222 = vbcast.lane.b32.xlu0 %v7280_v49, 312  ;;  %v1962_v51 = vcombine.high %v1940_v15, %v1940_v15 }
 0x384   : > { %v7440_v2 = vpop.permute.xlu1 %4682 }
 0x385   : > { %9449 = vst [vmem:[#allocation104_spill] sm:$0xff] %v7440_v2  ;;  %v1913_v2 = vmul.f32 %v7140_v13, %v7042_v39 }
 0x386   : > { %v7447_v22 = vpop.permute.xlu0 %4334  ;;  %2554 = vbcast.lane.b32.xlu1 %v7342_v61, 272 }
 0x387   : > { %9450 = vst [vmem:[#allocation105_spill] sm:$0xff] %v7447_v22  ;;  %2558 = vbcast.lane.b32.xlu0 %v7342_v61, 280  ;;  %v7458_v19 = vsel %vm1912_vm0, %v1913_v2, %v1914_v32  ;;  %v7473_v2 = vrot.slane %v1940_v15, %v7003_v20 }
 0x388   : > { %v7456_v1 = vpop.permute.xlu1 %4018  ;;  %v2014_v63 = vrot.slane %v7458_v19, %v7443_v28 }
 0x389   : > { %9451 = vst [vmem:[#allocation106_spill] sm:$0xff] %v7456_v1  ;;  %9455 = vst [vmem:[#allocation110_spill] sm:$0xff] %v7473_v2 }
 0x38a   : > { %v7460_v62 = vpop.permute.xlu0 %3670  ;;  %2890 = vbcast.lane.b32.xlu1 %v7322_v43, 288  ;;  %v2030_v32 = vrot.slane %v2014_v63, %v7443_v28  ;;  %v2022_v15 = vcombine.high %v2014_v63, %v2014_v63 }
 0x38b   : > { %9452 = vst [vmem:[#allocation107_spill] sm:$0xff] %v7460_v62  ;;  %2894 = vbcast.lane.b32.xlu0 %v7322_v43, 296 }
 0x38c   : > { %v7465_v22 = vpop.permute.xlu1 %4354  ;;  %v2052_v40 = vcombine.high %v2030_v32, %v2030_v32 }
 0x38d   : > { %9453 = vst [vmem:[#allocation108_spill] sm:$0xff] %v7465_v22 }
 0x38e   : > { %v7469_v0 = vpop.permute.xlu0 %4006  ;;  %3226 = vbcast.lane.b32.xlu1 %v7296_v34, 304 }
 0x38f   : > { %9454 = vst [vmem:[#allocation109_spill] sm:$0xff] %v7469_v0  ;;  %3230 = vbcast.lane.b32.xlu0 %v7296_v34, 312  ;;  %v7483_v0 = vrot.slane %v2030_v32, %v7003_v20 }
 0x390   : > { %v2102_v13 = vpop.permute.xlu1 %2101 }
 0x391   : > { %v2272_v22 = vmul.f32 %v2102_v13, %v7473_v2  ;;  %9457 = vst [vmem:[#allocation112_spill] sm:$0xff] %v7483_v0  ;;  %v1932_v13 = vcombine.high %v1924_v60, %v1924_v60 }
 0x392   : > { %v7477_v1 = vpop.permute.xlu0 %4342  ;;  %3554 = vbcast.lane.b32.xlu1 %v7254_v59, 320 }
 0x393   : > { %9456 = vst [vmem:[#allocation111_spill] sm:$0xff] %v7477_v1  ;;  %3558 = vbcast.lane.b32.xlu0 %v7254_v59, 328  ;;  %v2288_v45 = vsub.f32 %v2272_v22, %v7483_v0  ;;  %v1954_v22 = vrot.slane %v1932_v13, %v7443_v28 }
 0x394   : > { %v2106_v62 = vpop.permute.xlu1 %2105 }
 0x395   : > { %v2273_v53 = vmul.f32 %v2106_v62, %v7473_v2  ;;  %v7498_v62 = vrot.slane %v1962_v51, %v7003_v20  ;;  %v1964_v60 = vcombine.high %v1954_v22, %v1954_v22  ;;  %v7511_v51 = vrot.slane %v2052_v40, %v7003_v20 }
 0x396   : > { %v7486_v47 = vpop.permute.xlu0 %3678  ;;  %3562 = vbcast.lane.b32.xlu1 %v7270_v3, 320 }
 0x397   : > { %9458 = vst [vmem:[#allocation113_spill] sm:$0xff] %v7486_v47  ;;  %v2289_v1 = vsub.f32 %v2273_v53, %v7483_v0  ;;  %3566 = vbcast.lane.b32.xlu0 %v7270_v3, 328 }
 0x398   : > { %v7492_v57 = vpop.permute.xlu1 %2116 }
 0x399   : > { %v2304_v42 = vpack.c.bf16 %v2289_v1, %v2288_v45  ;;  %v7508_v45 = vrot.slane %v2022_v15, %v7443_v28  ;;  %v1917_v15 = vcombine.high %v7042_v39, %v7042_v39  ;;  %v2007_v39 = vcombine.high %v7458_v19, %v7458_v19 }
 0x39a   : > { %v7494_v55 = vpop.permute.xlu0 %4014  ;;  %2898 = vbcast.lane.b32.xlu1 %v7332_v37, 288 }
 0x39b   : > { %9459 = vst [vmem:[#allocation114_spill] sm:$0xff] %v7494_v55  ;;  %v2313_v47 = vmul.bf16 1069105081, %v2304_v42  ;;  %2902 = vbcast.lane.b32.xlu0 %v7332_v37, 296  ;;  %v2054_v40 = vcombine.high %v7508_v45, %v7508_v45 }
 0x39c   : > { %v2124_v53 = vpop.permute.xlu1 %2123 }
 0x39d   : > { %6433 = vpow.bf16 %v2313_v47  ;;  %v2276_v1 = vmul.f32 %v2124_v53, %v7498_v62  ;;  %v7515_v47 = vrot.slane %v1964_v60, %v7003_v20  ;;  %v7536_v36 = vrot.slane %v2054_v40, %v7003_v20 }
 0x39e   : > { %v7502_v58 = vpop.permute.xlu0 %4350  ;;  %3234 = vbcast.lane.b32.xlu1 %v7312_v52, 304 }
 0x39f   : > { %9460 = vst [vmem:[#allocation115_spill] sm:$0xff] %v7502_v58  ;;  %3238 = vbcast.lane.b32.xlu0 %v7312_v52, 312  ;;  %v2292_v13 = vsub.f32 %v2276_v1, %v7511_v51  ;;  %9463 = vst [vmem:[#allocation118_spill] sm:$0xff] %v7536_v36 }
 0x3a0   : > { %v2128_v42 = vpop.permute.xlu1 %2127 }
 0x3a1   : > { %v2277_v63 = vmul.f32 %v2128_v42, %v7498_v62 }
 0x3a2   : > { %v7517_v32 = vpop.permute.xlu0 %4678  ;;  %3570 = vbcast.lane.b32.xlu1 %v7280_v49, 320 }
 0x3a3   : > { %9461 = vst [vmem:[#allocation116_spill] sm:$0xff] %v7517_v32  ;;  %v2293_v53 = vsub.f32 %v2277_v63, %v7511_v51  ;;  %3574 = vbcast.lane.b32.xlu0 %v7280_v49, 328  ;;  %v1931_v63 = vrot.slane %v1917_v15, %v7443_v28 }
 0x3a4   : > { %v2135_v42 = vpop.permute.xlu1 %2134 }
 0x3a5   : > { %v2306_v58 = vpack.c.bf16 %v2293_v53, %v2292_v13  ;;  %v2278_v60 = vmul.f32 %v2135_v42, %v7515_v47 }
 0x3a6   : > { %v7528_v55 = vpop.permute.xlu0 %4686  ;;  %2906 = vbcast.lane.b32.xlu1 %v7342_v61, 288 }
 0x3a7   : > { %9462 = vst [vmem:[#allocation117_spill] sm:$0xff] %v7528_v55  ;;  %v2319_v32 = vmul.bf16 1069105081, %v2306_v58  ;;  %2910 = vbcast.lane.b32.xlu0 %v7342_v61, 296  ;;  %v1933_v55 = vcombine.high %v1931_v63, %v1931_v63  ;;  %v2294_v58 = vsub.f32 %v2278_v60, %v7536_v36 }
 0x3a8   : > { %v6434_v1 = vpop.eup %6433  ;;  %v2139_v56 = vpop.permute.xlu1 %2138 }
 0x3a9   : > { %v2336_v13 = vunpack.c.l.bf16 %v6434_v1  ;;  %v2337_v53 = vunpack.c.h.bf16 %v6434_v1  ;;  %6435 = vpow.bf16 %v2319_v32  ;;  %v2279_v42 = vmul.f32 %v2139_v56, %v7515_v47 }
 0x3aa   : > { %v7540_v33 = vpop.permute.xlu0 %4022  ;;  %3242 = vbcast.lane.b32.xlu1 %v7322_v43, 304  ;;  %v2021_v32 = vrot.slane %v2007_v39, %v7443_v28  ;;  %v1947_v56 = vrot.slane %v1931_v63, %v7443_v28 }
 0x3ab   : > { %9464 = vst [vmem:[#allocation119_spill] sm:$0xff] %v7540_v33  ;;  %v2352_v15 = vmul.f32 %v2336_v13, %v7114_v4  ;;  %v2353_v19 = vmul.f32 %v2337_v53, %v7152_v17  ;;  %v2432_v54 = vadd.f32 %v2337_v53, %v2336_v13  ;;  %v2295_v40 = vsub.f32 %v2279_v42, %v7536_v36 }
 0x3ac   : > { %3246 = vbcast.lane.b32.xlu0 %v7322_v43, 312  ;;  %v2146_v1 = vpop.permute.xlu1 %2145  ;;  %v7550_v33 = vrot.slane %v1954_v22, %v7003_v20  ;;  %v1961_v4 = vrot.slane %v1933_v55, %v7443_v28  ;;  %v1963_v39 = vcombine.high %v1947_v56, %v1947_v56  ;;  %v2023_v53 = vcombine.high %v2021_v32, %v2021_v32 }
 0x3ad   : > { %v2368_v10 = vadd.f32 %v2353_v19, %v2352_v15  ;;  %v2307_v60 = vpack.c.bf16 %v2295_v40, %v2294_v58  ;;  %v2433_v50 = vrot.slane %v2432_v54, 4  ;;  %v7558_v58 = vrot.slane %v1947_v56, %v7003_v20 }
 0x3ae   : > { %9465 = vst [vmem:[#allocation120_spill] sm:$0xff] %v7550_v33  ;;  %v7552_v30 = vpop.permute.xlu0 %4358  ;;  %3578 = vbcast.lane.b32.xlu1 %v7296_v34, 320  ;;  %v1965_v63 = vcombine.high %v1961_v4, %v1961_v4  ;;  %v2037_v22 = vrot.slane %v2021_v32, %v7443_v28  ;;  %v2275_v19 = vmul.f32 %v7492_v57, %v7550_v33 }
 0x3af   : > { %9466 = vst [vmem:[#allocation121_spill] sm:$0xff] %v7552_v30  ;;  %v2369_v17 = vrot.slane %v2368_v10, 4  ;;  %v2322_v13 = vmul.bf16 1069105081, %v2307_v60  ;;  %v2434_v15 = vadd.f32 %v2433_v50, %v2432_v54  ;;  %v7567_v48 = vrot.slane %v1961_v4, %v7003_v20 }
 0x3b0   : > { %3582 = vbcast.lane.b32.xlu0 %v7296_v34, 328  ;;  %v2157_v42 = vpop.permute.xlu1 %2156  ;;  %v7570_v56 = vrot.slane %v1963_v39, %v7003_v20  ;;  %v7573_v50 = vrot.slane %v2023_v53, %v7443_v28  ;;  %v7577_v54 = vrot.slane %v7508_v45, %v7003_v20  ;;  %v2053_v4 = vcombine.high %v2037_v22, %v2037_v22 }
 0x3b1   : > { %6437 = vpow.bf16 %v2322_v13  ;;  %v2370_v55 = vadd.f32 %v2369_v17, %v2368_v10  ;;  %9467 = vst [vmem:[#allocation122_spill] sm:$0xff] %v7567_v48  ;;  %v7580_v10 = vrot.slane %v1965_v63, %v7003_v20  ;;  %v2280_v13 = vmul.f32 %v2146_v1, %v7558_v58 }
 0x3b2   : > { %v2113_v40 = vpop.permute.xlu0 %2112  ;;  %3906 = vbcast.lane.b32.xlu1 %v7254_v59, 336  ;;  %v2291_v39 = vsub.f32 %v2275_v19, %v7577_v54  ;;  %v7587_v45 = vrot.slane %v2037_v22, %v7003_v20  ;;  %v7597_v44 = vrot.slane %v7573_v50, %v7003_v20 }
 0x3b3   : > { %v2274_v60 = vmul.f32 %v2113_v40, %v7550_v33  ;;  %v2435_v40 = vrot.slane %v2434_v15, 2  ;;  %v2371_v53 = vrot.slane %v2370_v55, 2 }
 0x3b4   : > { %3910 = vbcast.lane.b32.xlu0 %v7254_v59, 344  ;;  %v6436_v30 = vpop.eup %6435  ;;  %v2168_v57 = vpop.permute.xlu1 %2167  ;;  %9468 = vst [vmem:[#allocation123_spill] sm:$0xff] %v7587_v45  ;;  %9469 = vst [vmem:[#allocation124_spill] sm:$0xff] %v7597_v44  ;;  %v2296_v23 = vsub.f32 %v2280_v13, %v7587_v45 }
 0x3b5   : > { %v2340_v32 = vunpack.c.l.bf16 %v6436_v30  ;;  %v2341_v17 = vunpack.c.h.bf16 %v6436_v30  ;;  %v2290_v27 = vsub.f32 %v2274_v60, %v7577_v54  ;;  %v2055_v30 = vcombine.high %v7573_v50, %v7573_v50 }
 0x3b6   : > { %v2150_v28 = vpop.permute.xlu0 %2149  ;;  %3914 = vbcast.lane.b32.xlu1 %v7270_v3, 336 }
 0x3b7   : > { %v2356_v63 = vmul.f32 %v2340_v32, %v7122_v6  ;;  %v2357_v46 = vmul.f32 %v2341_v17, %v7164_v24  ;;  %v2446_v1 = vadd.f32 %v2341_v17, %v2340_v32  ;;  %v2305_v19 = vpack.c.bf16 %v2291_v39, %v2290_v27 }
 0x3b8   : > { %3918 = vbcast.lane.b32.xlu0 %v7270_v3, 344  ;;  %v2281_v60 = vmul.f32 %v2150_v28, %v7558_v58  ;;  %v2179_v25 = vpop.permute.xlu1 %2178  ;;  %v2282_v6 = vmul.f32 %v2157_v42, %v7567_v48  ;;  %v2436_v24 = vadd.f32 %v2435_v40, %v2434_v15  ;;  %v7604_v27 = vrot.slane %v2053_v4, %v7003_v20 }
 0x3b9   : > { %v2382_v22 = vadd.f32 %v2357_v46, %v2356_v63  ;;  %v2447_v41 = vrot.slane %v2446_v1, 4  ;;  %v2316_v18 = vmul.bf16 1069105081, %v2305_v19  ;;  %v2372_v32 = vadd.f32 %v2371_v53, %v2370_v55 }
 0x3ba   : > { %v2297_v38 = vsub.f32 %v2281_v60, %v7587_v45  ;;  %v2161_v16 = vpop.permute.xlu0 %2160  ;;  %3250 = vbcast.lane.b32.xlu1 %v7332_v37, 304  ;;  %v2284_v42 = vmul.f32 %v2168_v57, %v7570_v56  ;;  %v2437_v4 = vrot.slane %v2436_v24, 1  ;;  %v2298_v55 = vsub.f32 %v2282_v6, %v7597_v44 }
 0x3bb   : > { %v2383_v17 = vrot.slane %v2382_v22, 4  ;;  %v2283_v50 = vmul.f32 %v2161_v16, %v7567_v48  ;;  %v2448_v13 = vadd.f32 %v2447_v41, %v2446_v1  ;;  %6439 = vpow.bf16 %v2316_v18 }
 0x3bc   : > { %3254 = vbcast.lane.b32.xlu0 %v7332_v37, 312  ;;  %v6438_v46 = vpop.eup %6437  ;;  %v2308_v15 = vpack.c.bf16 %v2297_v38, %v2296_v23  ;;  %v2499_v40 = vpop.permute.xlu1 %2498  ;;  %v2373_v38 = vrot.slane %v2372_v32, 1  ;;  %v2300_v57 = vsub.f32 %v2284_v42, %v7604_v27 }
 0x3bd   : > { %v2384_v39 = vadd.f32 %v2383_v17, %v2382_v22  ;;  %v2342_v28 = vunpack.c.l.bf16 %v6438_v46  ;;  %v2343_v63 = vunpack.c.h.bf16 %v6438_v46  ;;  %v2299_v19 = vsub.f32 %v2283_v50, %v7597_v44 }
 0x3be   : > { %v2449_v60 = vrot.slane %v2448_v13, 2  ;;  %v2325_v53 = vmul.bf16 1069105081, %v2308_v15  ;;  %v2172_v16 = vpop.permute.xlu0 %2171  ;;  %3586 = vbcast.lane.b32.xlu1 %v7312_v52, 320  ;;  %v2286_v15 = vmul.f32 %v2179_v25, %v7580_v10  ;;  %v7628_v25 = vadd.f32 %v2437_v4, %v2436_v24 }
 0x3bf   : > { %v2385_v48 = vrot.slane %v2384_v39, 2  ;;  %v2358_v18 = vmul.f32 %v2342_v28, %v7126_v7  ;;  %v2359_v41 = vmul.f32 %v2343_v63, %v7170_v26  ;;  %v2453_v23 = vadd.f32 %v2343_v63, %v2342_v28 }
 0x3c0   : > { %3590 = vbcast.lane.b32.xlu0 %v7312_v52, 328  ;;  %6441 = vpow.bf16 %v2325_v53  ;;  %v2309_v1 = vpack.c.bf16 %v2299_v19, %v2298_v55  ;;  %v2507_v22 = vpop.permute.xlu1 %2506  ;;  %v2450_v17 = vadd.f32 %v2449_v60, %v2448_v13  ;;  %v2285_v46 = vmul.f32 %v2172_v16, %v7570_v56 }
 0x3c1   : > { %v2389_v6 = vadd.f32 %v2359_v41, %v2358_v18  ;;  %v2454_v50 = vrot.slane %v2453_v23, 4  ;;  %v2624_v7 = vmul.f32 %v2499_v40, %v7473_v2  ;;  %v2386_v28 = vadd.f32 %v2385_v48, %v2384_v39 }
 0x3c2   : > { %v2328_v44 = vmul.bf16 1069105081, %v2309_v1  ;;  %v2183_v26 = vpop.permute.xlu0 %2182  ;;  %3922 = vbcast.lane.b32.xlu1 %v7280_v49, 336  ;;  %v2301_v42 = vsub.f32 %v2285_v46, %v7604_v27  ;;  %v7622_v19 = vmul.f32 %v2507_v22, %v7550_v33  ;;  %v7626_v13 = vrot.slane %v2055_v30, %v7003_v20 }
 0x3c3   : > { %v2390_v63 = vrot.slane %v2389_v6, 4  ;;  %v2455_v45 = vadd.f32 %v2454_v50, %v2453_v23  ;;  %v2287_v40 = vmul.f32 %v2183_v26, %v7580_v10  ;;  %v2451_v55 = vrot.slane %v2450_v17, 1 }
 0x3c4   : > { %3926 = vbcast.lane.b32.xlu0 %v7280_v49, 344  ;;  %9470 = vst [vmem:[#allocation125_spill] sm:$0xff] %v7626_v13  ;;  %6443 = vpow.bf16 %v2328_v44  ;;  %v2515_v60 = vpop.permute.xlu1 %2514  ;;  %v2310_v39 = vpack.c.bf16 %v2301_v42, %v2300_v57  ;;  %v2387_v53 = vrot.slane %v2386_v28, 1  ;;  %v7633_v16 = vadd.f32 %v2373_v38, %v2372_v32 }
 0x3c5   : > { %v7631_v48 = vadd.f32 %v2390_v63, %v2389_v6  ;;  %v2302_v18 = vsub.f32 %v2286_v15, %v7626_v13  ;;  %v2640_v41 = vsub.f32 %v2624_v7, %v7483_v0  ;;  %v2303_v30 = vsub.f32 %v2287_v40, %v7626_v13 }
 0x3c6   : > { %v2503_v23 = vpop.permute.xlu0 %2502  ;;  %3258 = vbcast.lane.b32.xlu1 %v7342_v61, 304  ;;  %v6440_v44 = vpop.eup %6439  ;;  %v2456_v24 = vrot.slane %v2455_v45, 2  ;;  %v2331_v4 = vmul.bf16 1069105081, %v2310_v39  ;;  %v2642_v1 = vsub.f32 %v7622_v19, %v7577_v54  ;;  %v7642_v57 = vmul.f32 %v2515_v60, %v7498_v62 }
 0x3c7   : > { %9471 = vst [vmem:[#allocation126_spill] sm:$0xff] %v7631_v48  ;;  %v2338_v32 = vunpack.c.l.bf16 %v6440_v44  ;;  %v2339_v38 = vunpack.c.h.bf16 %v6440_v44  ;;  %v2311_v22 = vpack.c.bf16 %v2303_v30, %v2302_v18  ;;  %v2625_v6 = vmul.f32 %v2503_v23, %v7473_v2 }
 0x3c8   : > { %3262 = vbcast.lane.b32.xlu0 %v7342_v61, 312  ;;  %v2523_v50 = vpop.permute.xlu1 %2522  ;;  %6445 = vpow.bf16 %v2331_v4  ;;  %v7647_v15 = vadd.f32 %v2387_v53, %v2386_v28  ;;  %v7649_v7 = vadd.f32 %v2451_v55, %v2450_v17  ;;  %v7654_v39 = vadd.f32 %v2456_v24, %v2455_v45 }
 0x3c9   : > { %v2354_v26 = vmul.f32 %v2338_v32, %v7118_v5  ;;  %v2355_v63 = vmul.f32 %v2339_v38, %v7158_v21  ;;  %v2439_v42 = vadd.f32 %v2339_v38, %v2338_v32  ;;  %v2334_v19 = vmul.bf16 1069105081, %v2311_v22 }
 0x3ca   : > { %9472 = vst [vmem:[#allocation127_spill] sm:$0xff] %v7647_v15  ;;  %9473 = vst [vmem:[#allocation128_spill] sm:$0xff] %v7649_v7  ;;  %v2511_v40 = vpop.permute.xlu0 %2510  ;;  %3594 = vbcast.lane.b32.xlu1 %v7322_v43, 320  ;;  %v2641_v28 = vsub.f32 %v2625_v6, %v7483_v0  ;;  %v7662_v44 = vmul.f32 %v2523_v50, %v7515_v47 }
 0x3cb   : > { %v6442_v60 = vpop.eup %6441  ;;  %9474 = vst [vmem:[#allocation129_spill] sm:$0xff] %v7654_v39  ;;  %v2627_v17 = vmul.f32 %v2511_v40, %v7550_v33  ;;  %v2375_v5 = vadd.f32 %v2355_v63, %v2354_v26  ;;  %v2440_v55 = vrot.slane %v2439_v42, 4  ;;  %6447 = vpow.bf16 %v2334_v19 }
 0x3cc   : > { %3598 = vbcast.lane.b32.xlu0 %v7322_v43, 328  ;;  %v2344_v21 = vunpack.c.l.bf16 %v6442_v60  ;;  %v2345_v53 = vunpack.c.h.bf16 %v6442_v60  ;;  %v2851_v30 = vpop.permute.xlu1 %2850  ;;  %v2656_v23 = vpack.c.bf16 %v2641_v28, %v2640_v41 }
 0x3cd   : > { %v2643_v45 = vsub.f32 %v2627_v17, %v7577_v54  ;;  %v2376_v24 = vrot.slane %v2375_v5, 4  ;;  %v2441_v4 = vadd.f32 %v2440_v55, %v2439_v42  ;;  %v7669_v41 = vmul.f32 %v2851_v30, %v7473_v2 }
 0x3ce   : > { %v2360_v32 = vmul.f32 %v2344_v21, %v7130_v8  ;;  %v2361_v38 = vmul.f32 %v2345_v53, %v7176_v29  ;;  %v2519_v22 = vpop.permute.xlu0 %2518  ;;  %3930 = vbcast.lane.b32.xlu1 %v7296_v34, 336  ;;  %v2460_v26 = vadd.f32 %v2345_v53, %v2344_v21  ;;  %v2665_v63 = vmul.bf16 1069105081, %v2656_v23 }
 0x3cf   : > { %v6444_v6 = vpop.eup %6443  ;;  %v2657_v40 = vpack.c.bf16 %v2643_v45, %v2642_v1  ;;  %v2377_v50 = vadd.f32 %v2376_v24, %v2375_v5  ;;  %v2442_v19 = vrot.slane %v2441_v4, 2 }
 0x3d0   : > { %3934 = vbcast.lane.b32.xlu0 %v7296_v34, 344  ;;  %v2396_v60 = vadd.f32 %v2361_v38, %v2360_v32  ;;  %v2346_v42 = vunpack.c.l.bf16 %v6444_v6  ;;  %v2859_v28 = vpop.permute.xlu1 %2858  ;;  %v2461_v8 = vrot.slane %v2460_v26, 4  ;;  %v2347_v17 = vunpack.c.h.bf16 %v6444_v6 }
 0x3d1   : > { %6449 = vpow.bf16 %v2665_v63  ;;  %v2668_v29 = vmul.bf16 1069105081, %v2657_v40  ;;  %v2378_v55 = vrot.slane %v2377_v50, 2  ;;  %v2443_v46 = vadd.f32 %v2442_v19, %v2441_v4 }
 0x3d2   : > { %v2397_v18 = vrot.slane %v2396_v60, 4  ;;  %v2362_v21 = vmul.f32 %v2346_v42, %v7134_v9  ;;  %v7673_v1 = vpop.permute.xlu0 %2526  ;;  %4258 = vbcast.lane.b32.xlu1 %v7254_v59, 352  ;;  %v2462_v53 = vadd.f32 %v2461_v8, %v2460_v26  ;;  %v2363_v5 = vmul.f32 %v2347_v17, %v7182_v31 }
 0x3d3   : > { %v2467_v30 = vadd.f32 %v2347_v17, %v2346_v42  ;;  %6451 = vpow.bf16 %v2668_v29  ;;  %v6446_v23 = vpop.eup %6445  ;;  %v2379_v45 = vadd.f32 %v2378_v55, %v2377_v50  ;;  %v2444_v24 = vrot.slane %v2443_v46, 1 }
 0x3d4   : > { %4262 = vbcast.lane.b32.xlu0 %v7254_v59, 360  ;;  %v7678_v32 = vadd.f32 %v2397_v18, %v2396_v60  ;;  %v2629_v4 = vmul.f32 %v2519_v22, %v7498_v62  ;;  %v7681_v38 = vpop.permute.xlu1 %2530  ;;  %v2463_v9 = vrot.slane %v2462_v53, 2  ;;  %v2403_v6 = vadd.f32 %v2363_v5, %v2362_v21 }
 0x3d5   : > { %v2468_v63 = vrot.slane %v2467_v30, 4  ;;  %v2348_v40 = vunpack.c.l.bf16 %v6446_v23  ;;  %v2380_v31 = vrot.slane %v2379_v45, 1  ;;  %v2349_v19 = vunpack.c.h.bf16 %v6446_v23 }
 0x3d6   : > { %9475 = vst [vmem:[#allocation130_spill] sm:$0xff] %v7678_v32  ;;  %v7686_v8 = vpop.permute.xlu0 %2854  ;;  %4266 = vbcast.lane.b32.xlu1 %v7270_v3, 352  ;;  %v7689_v18 = vadd.f32 %v2463_v9, %v2462_v53  ;;  %v2404_v22 = vrot.slane %v2403_v6, 4  ;;  %v6448_v17 = vpop.eup %6447  ;;  %v2645_v5 = vsub.f32 %v2629_v4, %v7511_v51  ;;  %v7699_v26 = vadd.f32 %v2444_v24, %v2443_v46 }
 0x3d7   : > { %v2469_v50 = vadd.f32 %v2468_v63, %v2467_v30  ;;  %v2364_v60 = vmul.f32 %v2348_v40, %v7138_v11  ;;  %v2365_v29 = vmul.f32 %v2349_v19, %v7188_v12  ;;  %v2474_v55 = vadd.f32 %v2349_v19, %v2348_v40 }
 0x3d8   : > { %9476 = vst [vmem:[#allocation131_spill] sm:$0xff] %v7689_v18  ;;  %4270 = vbcast.lane.b32.xlu0 %v7270_v3, 360  ;;  %v7697_v23 = vpop.permute.xlu1 %2866  ;;  %v2350_v9 = vunpack.c.l.bf16 %v6448_v17  ;;  %v2351_v42 = vunpack.c.h.bf16 %v6448_v17  ;;  %v9477_v12 = vsub.f32 %v7642_v57, %v7511_v51  ;;  %v7708_v4 = vadd.f32 %v2380_v31, %v2379_v45 }
 0x3d9   : > { %v2470_v30 = vrot.slane %v2469_v50, 2  ;;  %v2410_v11 = vadd.f32 %v2365_v29, %v2364_v60  ;;  %v2475_v63 = vrot.slane %v2474_v55, 4  ;;  %v7711_v24 = vadd.f32 %v2404_v22, %v2403_v6 }
 0x3da   : > { %v2658_v40 = vpack.c.bf16 %v2645_v5, %v9477_v12  ;;  %v7705_v19 = vpop.permute.xlu0 %2862  ;;  %3602 = vbcast.lane.b32.xlu1 %v7332_v37, 320  ;;  %v2366_v53 = vmul.f32 %v2350_v9, %v7144_v14  ;;  %v2367_v29 = vmul.f32 %v2351_v42, %v7194_v35  ;;  %v2481_v57 = vadd.f32 %v2351_v42, %v2350_v9  ;;  %v9480_v35 = vld [vmem:[#allocation26_spill] sm:$0xff]  ;;  %v9481_v42 = vld [vmem:[#allocation35_spill] sm:$0xff] }
 0x3db   : > { %9478 = vst [vmem:[#allocation132_spill] sm:$0xff] %v7711_v24  ;;  %v2476_v17 = vadd.f32 %v2475_v63, %v2474_v55  ;;  %v7717_v5 = vmul.f32 %v2859_v28, %v7550_v33  ;;  %v7721_v45 = vadd.f32 %v2470_v30, %v2469_v50  ;;  %v2411_v21 = vrot.slane %v2410_v11, 4 }
 0x3dc   : > { %3606 = vbcast.lane.b32.xlu0 %v7332_v37, 328  ;;  %v6450_v60 = vpop.eup %6449  ;;  %v7719_v12 = vpop.permute.xlu1 %2538  ;;  %v2671_v6 = vmul.bf16 1069105081, %v2658_v40  ;;  %v2482_v20 = vrot.slane %v2481_v57, 4  ;;  %v2631_v55 = vmul.f32 %v7673_v1, %v7515_v47  ;;  %v7729_v30 = vadd.f32 %v2367_v29, %v2366_v53 }
 0x3dd   : > { %9479 = vst [vmem:[#allocation133_spill] sm:$0xff] %v7721_v45  ;;  %v2688_v31 = vunpack.c.l.bf16 %v6450_v60  ;;  %v2689_v46 = vunpack.c.h.bf16 %v6450_v60  ;;  %v2477_v14 = vrot.slane %v2476_v17, 2  ;;  %v2994_v32 = vsub.f32 %v7717_v5, %v7577_v54  ;;  %v9484_v45 = vld [vmem:[#allocation27_spill] sm:$0xff] }
 0x3de   : > { %v6452_v22 = vpop.eup %6451  ;;  %v2535_v63 = vpop.permute.xlu0 %2534  ;;  %3938 = vbcast.lane.b32.xlu1 %v7312_v52, 336  ;;  %9482 = vst [vmem:[#allocation26_spill] sm:$0xff] %v7729_v30  ;;  %v7731_v40 = vadd.f32 %v2482_v20, %v2481_v57  ;;  %6453 = vpow.bf16 %v2671_v6  ;;  %v2647_v53 = vsub.f32 %v2631_v55, %v7536_v36  ;;  %v9488_v6 = vsub.f32 %v7662_v44, %v7536_v36 }
 0x3df   : > { %v2704_v28 = vmul.f32 %v2688_v31, %v9480_v35  ;;  %v2705_v9 = vmul.f32 %v2689_v46, %v9481_v42  ;;  %v2784_v18 = vadd.f32 %v2689_v46, %v2688_v31  ;;  %v2690_v50 = vunpack.c.l.bf16 %v6452_v22  ;;  %v9486_v46 = vld [vmem:[#allocation37_spill] sm:$0xff] }
 0x3e0   : > { %3942 = vbcast.lane.b32.xlu0 %v7312_v52, 344  ;;  %9483 = vst [vmem:[#allocation35_spill] sm:$0xff] %v7731_v40  ;;  %v2691_v60 = vunpack.c.h.bf16 %v6452_v22  ;;  %v7735_v1 = vpop.permute.xlu1 %2874  ;;  %v7738_v42 = vadd.f32 %v2411_v21, %v2410_v11  ;;  %v7745_v29 = vadd.f32 %v2477_v14, %v2476_v17  ;;  %v2977_v22 = vmul.f32 %v7686_v8, %v7473_v2  ;;  %v9494_v40 = vld [vmem:[#allocation124_spill] sm:$0xff] }
 0x3e1   : > { %v2720_v39 = vadd.f32 %v2705_v9, %v2704_v28  ;;  %v2785_v48 = vrot.slane %v2784_v18, 4  ;;  %v2706_v35 = vmul.f32 %v2690_v50, %v9484_v45  ;;  %v2659_v55 = vpack.c.bf16 %v2647_v53, %v9488_v6 }
 0x3e2   : > { %9485 = vst [vmem:[#allocation27_spill] sm:$0xff] %v7738_v42  ;;  %v2707_v31 = vmul.f32 %v2691_v60, %v9486_v46  ;;  %v2791_v24 = vadd.f32 %v2691_v60, %v2690_v50  ;;  %v7742_v20 = vpop.permute.xlu0 %2870  ;;  %4274 = vbcast.lane.b32.xlu1 %v7280_v49, 352  ;;  %9487 = vst [vmem:[#allocation37_spill] sm:$0xff] %v7745_v29  ;;  %v2632_v60 = vmul.f32 %v7681_v38, %v7558_v58 }
 0x3e3   : > { %v2721_v57 = vrot.slane %v2720_v39, 4  ;;  %v2786_v5 = vadd.f32 %v2785_v48, %v2784_v18  ;;  %v2993_v48 = vsub.f32 %v2977_v22, %v7483_v0  ;;  %v2674_v50 = vmul.bf16 1069105081, %v2659_v55 }
 0x3e4   : > { %4278 = vbcast.lane.b32.xlu0 %v7280_v49, 360  ;;  %v2727_v11 = vadd.f32 %v2707_v31, %v2706_v35  ;;  %v2792_v45 = vrot.slane %v2791_v24, 4  ;;  %v7754_v28 = vpop.permute.xlu1 %3202  ;;  %v9489_v31 = vsub.f32 %v7669_v41, %v7483_v0  ;;  %v7769_v38 = vmul.f32 %v7697_v23, %v7498_v62 }
 0x3e5   : > { %v2722_v14 = vadd.f32 %v2721_v57, %v2720_v39  ;;  %v2787_v9 = vrot.slane %v2786_v5, 2  ;;  %v2979_v39 = vmul.f32 %v7705_v19, %v7550_v33  ;;  %6455 = vpow.bf16 %v2674_v50  ;;  %v9491_v50 = vld [vmem:[#allocation122_spill] sm:$0xff] }
 0x3e6   : > { %v2728_v18 = vrot.slane %v2727_v11, 4  ;;  %v2793_v8 = vadd.f32 %v2792_v45, %v2791_v24  ;;  %v2543_v35 = vpop.permute.xlu0 %2542  ;;  %3610 = vbcast.lane.b32.xlu1 %v7342_v61, 320  ;;  %v3008_v53 = vpack.c.bf16 %v2993_v48, %v9489_v31  ;;  %v9490_v48 = vld [vmem:[#allocation123_spill] sm:$0xff]  ;;  %v2633_v31 = vmul.f32 %v2535_v63, %v7558_v58 }
 0x3e7   : > { %v2723_v46 = vrot.slane %v2722_v14, 2  ;;  %v2788_v44 = vadd.f32 %v2787_v9, %v2786_v5  ;;  %v2995_v41 = vsub.f32 %v2979_v39, %v7577_v54  ;;  %v2648_v19 = vsub.f32 %v2632_v60, %v9490_v48 }
 0x3e8   : > { %3614 = vbcast.lane.b32.xlu0 %v7342_v61, 328  ;;  %v2729_v57 = vadd.f32 %v2728_v18, %v2727_v11  ;;  %v2794_v24 = vrot.slane %v2793_v8, 2  ;;  %v7771_v22 = vpop.permute.xlu1 %3210  ;;  %v3017_v6 = vmul.bf16 1069105081, %v3008_v53  ;;  %v2649_v60 = vsub.f32 %v2633_v31, %v9490_v48 }
 0x3e9   : > { %v2724_v45 = vadd.f32 %v2723_v46, %v2722_v14  ;;  %v2789_v5 = vrot.slane %v2788_v44, 1  ;;  %v3009_v23 = vpack.c.bf16 %v2995_v41, %v2994_v32  ;;  %v2634_v14 = vmul.f32 %v7719_v12, %v9491_v50  ;;  %v6454_v46 = vpop.eup %6453 }
 0x3ea   : > { %v2730_v55 = vrot.slane %v2729_v57, 2  ;;  %v2795_v9 = vadd.f32 %v2794_v24, %v2793_v8  ;;  %v7776_v11 = vpop.permute.xlu0 %2878  ;;  %3946 = vbcast.lane.b32.xlu1 %v7322_v43, 336  ;;  %6457 = vpow.bf16 %v3017_v6  ;;  %v2692_v17 = vunpack.c.l.bf16 %v6454_v46 }
 0x3eb   : > { %v2725_v18 = vrot.slane %v2724_v45, 1  ;;  %v2790_v53 = vadd.f32 %v2789_v5, %v2788_v44  ;;  %v2693_v21 = vunpack.c.h.bf16 %v6454_v46  ;;  %v2996_v6 = vsub.f32 %v7769_v38, %v7511_v51  ;;  %v9492_v44 = vld [vmem:[#allocation28_spill] sm:$0xff]  ;;  %v9493_v5 = vld [vmem:[#allocation39_spill] sm:$0xff] }
 0x3ec   : > { %3950 = vbcast.lane.b32.xlu0 %v7322_v43, 344  ;;  %v2731_v39 = vadd.f32 %v2730_v55, %v2729_v57  ;;  %v2796_v8 = vrot.slane %v2795_v9, 1  ;;  %v7783_v24 = vpop.permute.xlu1 %2546  ;;  %v3020_v29 = vmul.bf16 1069105081, %v3009_v23  ;;  %v2660_v12 = vpack.c.bf16 %v2649_v60, %v2648_v19 }
 0x3ed   : > { %v2726_v63 = vadd.f32 %v2725_v18, %v2724_v45  ;;  %v2708_v57 = vmul.f32 %v2692_v17, %v9492_v44  ;;  %v2709_v55 = vmul.f32 %v2693_v21, %v9493_v5  ;;  %v2798_v31 = vadd.f32 %v2693_v21, %v2692_v17 }
 0x3ee   : > { %v2732_v32 = vrot.slane %v2731_v39, 1  ;;  %v2797_v41 = vadd.f32 %v2796_v8, %v2795_v9  ;;  %v7787_v42 = vpop.permute.xlu0 %3206  ;;  %4282 = vbcast.lane.b32.xlu1 %v7296_v34, 352  ;;  %v2650_v45 = vsub.f32 %v2634_v14, %v9494_v40  ;;  %v7795_v18 = vadd.f32 %v2790_v53, %v7628_v25 }
 0x3ef   : > { %6459 = vpow.bf16 %v3020_v29  ;;  %v2677_v38 = vmul.bf16 1069105081, %v2660_v12  ;;  %v7799_v9 = vmul.f32 %v7735_v1, %v7515_v47  ;;  %v2734_v46 = vadd.f32 %v2709_v55, %v2708_v57  ;;  %v9496_v55 = vld [vmem:[#allocation41_spill] sm:$0xff] }
 0x3f0   : > { %4286 = vbcast.lane.b32.xlu0 %v7296_v34, 360  ;;  %v7801_v19 = vpop.permute.xlu1 %2882  ;;  %v2733_v23 = vadd.f32 %v2732_v32, %v2731_v39  ;;  %v2799_v8 = vrot.slane %v2798_v31, 4  ;;  %v2981_v21 = vmul.f32 %v7742_v20, %v7498_v62  ;;  %v7806_v17 = vadd.f32 %v2726_v63, %v7633_v16  ;;  %v6456_v1 = vpop.eup %6455 }
 0x3f1   : > { %v7809_v25 = vadd.f32 %v2797_v41, %v7699_v26  ;;  %6461 = vpow.bf16 %v2677_v38  ;;  %v2635_v29 = vmul.f32 %v2543_v35, %v9491_v50  ;;  %v2735_v53 = vrot.slane %v2734_v46, 4 }
 0x3f2   : > { %v7812_v14 = vpop.permute.xlu0 %3214  ;;  %4610 = vbcast.lane.b32.xlu1 %v7254_v59, 368  ;;  %v2800_v39 = vadd.f32 %v2799_v8, %v2798_v31  ;;  %v2997_v60 = vsub.f32 %v2981_v21, %v7511_v51  ;;  %v7818_v20 = vmul.f32 %v7754_v28, %v7473_v2  ;;  %v2694_v16 = vunpack.c.l.bf16 %v6456_v1 }
 0x3f3   : > { %v2695_v26 = vunpack.c.h.bf16 %v6456_v1  ;;  %v2651_v63 = vsub.f32 %v2635_v29, %v9494_v40  ;;  %v7827_v41 = vadd.f32 %v2733_v23, %v7708_v4  ;;  %v7831_v28 = vmul.f32 %v7771_v22, %v7550_v33 }
 0x3f4   : > { %4614 = vbcast.lane.b32.xlu0 %v7254_v59, 376  ;;  %v7824_v32 = vpop.permute.xlu1 %3218  ;;  %v2801_v12 = vrot.slane %v2800_v39, 2  ;;  %v3010_v44 = vpack.c.bf16 %v2997_v60, %v2996_v6  ;;  %v9495_v59 = vld [vmem:[#allocation29_spill] sm:$0xff]  ;;  %v7838_v29 = vadd.f32 %v2735_v53, %v2734_v46  ;;  %v2983_v6 = vmul.f32 %v7776_v11, %v7515_v47 }
 0x3f5   : > { %v6458_v57 = vpop.eup %6457  ;;  %v2710_v5 = vmul.f32 %v2694_v16, %v9495_v59  ;;  %v2711_v31 = vmul.f32 %v2695_v26, %v9496_v55  ;;  %v2805_v38 = vadd.f32 %v2695_v26, %v2694_v16  ;;  %v2661_v8 = vpack.c.bf16 %v2651_v63, %v2650_v45  ;;  %v9499_v16 = vld [vmem:[#allocation30_spill] sm:$0xff]  ;;  %v9500_v63 = vld [vmem:[#allocation43_spill] sm:$0xff] }
 0x3f6   : > { %v7835_v21 = vpop.permute.xlu0 %2550  ;;  %4618 = vbcast.lane.b32.xlu1 %v7270_v3, 368  ;;  %9497 = vst [vmem:[#allocation123_spill] sm:$0xff] %v7838_v29  ;;  %v3040_v4 = vunpack.c.l.bf16 %v6458_v57  ;;  %v3041_v23 = vunpack.c.h.bf16 %v6458_v57  ;;  %v3023_v60 = vmul.bf16 1069105081, %v3010_v44  ;;  %v7845_v45 = vadd.f32 %v2801_v12, %v2800_v39 }
 0x3f7   : > { %v2741_v22 = vadd.f32 %v2711_v31, %v2710_v5  ;;  %v2806_v1 = vrot.slane %v2805_v38, 4  ;;  %v2680_v59 = vmul.bf16 1069105081, %v2661_v8  ;;  %v7860_v11 = vmul.f32 %v7783_v24, %v7570_v56  ;;  %v9502_v5 = vld [vmem:[#allocation31_spill] sm:$0xff] }
 0x3f8   : > { %4622 = vbcast.lane.b32.xlu0 %v7270_v3, 376  ;;  %v7843_v55 = vpop.permute.xlu1 %2554  ;;  %9498 = vst [vmem:[#allocation122_spill] sm:$0xff] %v7845_v45  ;;  %v3056_v26 = vmul.f32 %v3040_v4, %v9499_v16  ;;  %v3057_v46 = vmul.f32 %v3041_v23, %v9500_v63  ;;  %v3136_v53 = vadd.f32 %v3041_v23, %v3040_v4  ;;  %6463 = vpow.bf16 %v3023_v60 }
 0x3f9   : > { %v2742_v35 = vrot.slane %v2741_v22, 4  ;;  %v2807_v57 = vadd.f32 %v2806_v1, %v2805_v38  ;;  %6465 = vpow.bf16 %v2680_v59 }
 0x3fa   : > { %v7851_v3 = vpop.permute.xlu0 %2886  ;;  %3954 = vbcast.lane.b32.xlu1 %v7332_v37, 336  ;;  %v6460_v44 = vpop.eup %6459  ;;  %v3072_v39 = vadd.f32 %v3057_v46, %v3056_v26  ;;  %v3137_v12 = vrot.slane %v3136_v53, 4  ;;  %v2999_v26 = vsub.f32 %v2983_v6, %v7536_v36 }
 0x3fb   : > { %v3042_v8 = vunpack.c.l.bf16 %v6460_v44  ;;  %v3043_v38 = vunpack.c.h.bf16 %v6460_v44  ;;  %v7866_v63 = vadd.f32 %v2742_v35, %v2741_v22  ;;  %v2808_v46 = vrot.slane %v2807_v57, 2  ;;  %v9503_v44 = vld [vmem:[#allocation45_spill] sm:$0xff] }
 0x3fc   : > { %3958 = vbcast.lane.b32.xlu0 %v7332_v37, 344  ;;  %v7862_v4 = vpop.permute.xlu1 %2890  ;;  %v6462_v23 = vpop.eup %6461  ;;  %v3073_v60 = vrot.slane %v3072_v39, 4  ;;  %v3138_v16 = vadd.f32 %v3137_v12, %v3136_v53  ;;  %v9504_v35 = vsub.f32 %v7799_v9, %v7536_v36 }
 0x3fd   : > { %9501 = vst [vmem:[#allocation28_spill] sm:$0xff] %v7866_v63  ;;  %v3058_v31 = vmul.f32 %v3042_v8, %v9502_v5  ;;  %v3059_v59 = vmul.f32 %v3043_v38, %v9503_v44  ;;  %v3143_v7 = vadd.f32 %v3043_v38, %v3042_v8  ;;  %v2696_v29 = vunpack.c.l.bf16 %v6462_v23  ;;  %v9506_v38 = vld [vmem:[#allocation47_spill] sm:$0xff] }
 0x3fe   : > { %v7870_v30 = vpop.permute.xlu0 %3222  ;;  %4290 = vbcast.lane.b32.xlu1 %v7312_v52, 352  ;;  %v3074_v24 = vadd.f32 %v3073_v60, %v3072_v39  ;;  %v3139_v15 = vrot.slane %v3138_v16, 2  ;;  %v2697_v12 = vunpack.c.h.bf16 %v6462_v23  ;;  %v3011_v6 = vpack.c.bf16 %v2999_v26, %v9504_v35  ;;  %v9505_v39 = vld [vmem:[#allocation32_spill] sm:$0xff] }
 0x3ff   : > { %v3079_v53 = vadd.f32 %v3059_v59, %v3058_v31  ;;  %v3144_v45 = vrot.slane %v3143_v7, 4  ;;  %v2712_v60 = vmul.f32 %v2696_v29, %v9505_v39  ;;  %v3329_v35 = vmul.f32 %v7787_v42, %v7473_v2 }
 0x400   : > { %4294 = vbcast.lane.b32.xlu0 %v7312_v52, 360  ;;  %v7879_v5 = vpop.permute.xlu1 %3226  ;;  %v3075_v44 = vrot.slane %v3074_v24, 2  ;;  %v3140_v1 = vadd.f32 %v3139_v15, %v3138_v16  ;;  %v2713_v40 = vmul.f32 %v2697_v12, %v9506_v38  ;;  %v2812_v13 = vadd.f32 %v2697_v12, %v2696_v29  ;;  %v9511_v12 = vld [vmem:[#allocation33_spill] sm:$0xff] }
 0x401   : > { %v3080_v8 = vrot.slane %v3079_v53, 4  ;;  %v3026_v31 = vmul.bf16 1069105081, %v3011_v6  ;;  %v3145_v59 = vadd.f32 %v3144_v45, %v3143_v7  ;;  %v7892_v6 = vadd.f32 %v2808_v46, %v2807_v57 }
 0x402   : > { %v7883_v23 = vpop.permute.xlu0 %2558  ;;  %4626 = vbcast.lane.b32.xlu1 %v7280_v49, 368  ;;  %v3076_v9 = vadd.f32 %v3075_v44, %v3074_v24  ;;  %v3141_v26 = vrot.slane %v3140_v1, 1  ;;  %v2748_v16 = vadd.f32 %v2713_v40, %v2712_v60  ;;  %v2813_v39 = vrot.slane %v2812_v13, 4 }
 0x403   : > { %9507 = vst [vmem:[#allocation39_spill] sm:$0xff] %v7883_v23  ;;  %v3081_v15 = vadd.f32 %v3080_v8, %v3079_v53  ;;  %6467 = vpow.bf16 %v3026_v31  ;;  %v6464_v29 = vpop.eup %6463  ;;  %9509 = vst [vmem:[#allocation41_spill] sm:$0xff] %v7892_v6  ;;  %v3146_v24 = vrot.slane %v3145_v59, 2  ;;  %v3345_v8 = vsub.f32 %v3329_v35, %v7483_v0  ;;  %v9540_v6 = vld [vmem:[#allocation59_spill] sm:$0xff] }
 0x404   : > { %4630 = vbcast.lane.b32.xlu0 %v7280_v49, 376  ;;  %v7889_v22 = vpop.permute.xlu1 %3554  ;;  %v3077_v38 = vrot.slane %v3076_v9, 1  ;;  %v2749_v7 = vrot.slane %v2748_v16, 4  ;;  %v2814_v45 = vadd.f32 %v2813_v39, %v2812_v13  ;;  %v3044_v36 = vunpack.c.l.bf16 %v6464_v29  ;;  %v6466_v49 = vpop.eup %6465 }
 0x405   : > { %9508 = vst [vmem:[#allocation29_spill] sm:$0xff] %v7889_v22  ;;  %v3082_v44 = vrot.slane %v3081_v15, 2  ;;  %v3142_v40 = vadd.f32 %v3141_v26, %v3140_v1  ;;  %v3147_v53 = vadd.f32 %v3146_v24, %v3145_v59  ;;  %v3045_v60 = vunpack.c.h.bf16 %v6464_v29  ;;  %v9515_v24 = vld [vmem:[#allocation34_spill] sm:$0xff]  ;;  %v9534_v1 = vld [vmem:[#allocation55_spill] sm:$0xff] }
 0x406   : > { %v7894_v42 = vpop.permute.xlu0 %2894  ;;  %3962 = vbcast.lane.b32.xlu1 %v7342_v61, 336  ;;  %v3078_v57 = vadd.f32 %v3077_v38, %v3076_v9  ;;  %v2815_v31 = vrot.slane %v2814_v45, 2  ;;  %v3060_v63 = vmul.f32 %v3044_v36, %v9511_v12  ;;  %v7902_v39 = vadd.f32 %v2749_v7, %v2748_v16 }
 0x407   : > { %9510 = vst [vmem:[#allocation30_spill] sm:$0xff] %v7894_v42  ;;  %v3083_v46 = vadd.f32 %v3082_v44, %v3081_v15  ;;  %v3148_v13 = vrot.slane %v3147_v53, 1  ;;  %v9513_v42 = vld [vmem:[#allocation49_spill] sm:$0xff]  ;;  %v3150_v23 = vadd.f32 %v3045_v60, %v3044_v36  ;;  %v2698_v35 = vunpack.c.l.bf16 %v6466_v49 }
 0x408   : > { %3966 = vbcast.lane.b32.xlu0 %v7342_v61, 344  ;;  %v7900_v22 = vpop.permute.xlu1 %3562  ;;  %9512 = vst [vmem:[#allocation43_spill] sm:$0xff] %v7902_v39  ;;  %v3061_v2 = vmul.f32 %v3045_v60, %v9513_v42  ;;  %v7906_v59 = vadd.f32 %v2815_v31, %v2814_v45  ;;  %v2699_v38 = vunpack.c.h.bf16 %v6466_v49  ;;  %v7913_v16 = vadd.f32 %v3078_v57, %v7806_v17  ;;  %v9517_v49 = vld [vmem:[#allocation51_spill] sm:$0xff] }
 0x409   : > { %v3084_v26 = vrot.slane %v3083_v46, 1  ;;  %v3149_v9 = vadd.f32 %v3148_v13, %v3147_v53  ;;  %v3151_v12 = vrot.slane %v3150_v23, 4  ;;  %v7916_v36 = vadd.f32 %v3142_v40, %v7795_v18 }
 0x40a   : > { %9514 = vst [vmem:[#allocation31_spill] sm:$0xff] %v7906_v59  ;;  %v7908_v29 = vpop.permute.xlu0 %3230  ;;  %4298 = vbcast.lane.b32.xlu1 %v7322_v43, 352  ;;  %v3086_v15 = vadd.f32 %v3061_v2, %v3060_v63  ;;  %v2714_v44 = vmul.f32 %v2698_v35, %v9515_v24  ;;  %v9516_v7 = vsub.f32 %v7818_v20, %v7483_v0 }
 0x40b   : > { %v3085_v53 = vadd.f32 %v3084_v26, %v3083_v46  ;;  %v3152_v63 = vadd.f32 %v3151_v12, %v3150_v23  ;;  %v2715_v60 = vmul.f32 %v2699_v38, %v9517_v49  ;;  %v7927_v17 = vadd.f32 %v3149_v9, %v7809_v25  ;;  %v9519_v49 = vld [vmem:[#allocation53_spill] sm:$0xff] }
 0x40c   : > { %4302 = vbcast.lane.b32.xlu0 %v7322_v43, 360  ;;  %v3360_v45 = vpack.c.bf16 %v3345_v8, %v9516_v7  ;;  %v7922_v42 = vpop.permute.xlu1 %2898  ;;  %v2819_v40 = vadd.f32 %v2699_v38, %v2698_v35  ;;  %v3087_v8 = vrot.slane %v3086_v15, 4  ;;  %v3331_v23 = vmul.f32 %v7812_v14, %v7550_v33 }
 0x40d   : > { %v3153_v13 = vrot.slane %v3152_v63, 2  ;;  %v2755_v46 = vadd.f32 %v2715_v60, %v2714_v44  ;;  %v7939_v35 = vadd.f32 %v3085_v53, %v7827_v41  ;;  %v2984_v24 = vmul.f32 %v7801_v19, %v7558_v58 }
 0x40e   : > { %v3369_v57 = vmul.bf16 1069105081, %v3360_v45  ;;  %v7930_v31 = vpop.permute.xlu0 %3558  ;;  %4634 = vbcast.lane.b32.xlu1 %v7296_v34, 368  ;;  %v6468_v20 = vpop.eup %6467  ;;  %v2820_v26 = vrot.slane %v2819_v40, 4  ;;  %v3347_v44 = vsub.f32 %v3331_v23, %v7577_v54  ;;  %v9518_v45 = vld [vmem:[#allocation36_spill] sm:$0xff]  ;;  %v9521_v41 = vsub.f32 %v7831_v28, %v7577_v54 }
 0x40f   : > { %v3046_v25 = vunpack.c.l.bf16 %v6468_v20  ;;  %v3047_v9 = vunpack.c.h.bf16 %v6468_v20  ;;  %v2756_v38 = vrot.slane %v2755_v46, 4  ;;  %v3332_v19 = vmul.f32 %v7824_v32, %v7498_v62 }
 0x410   : > { %4638 = vbcast.lane.b32.xlu0 %v7296_v34, 376  ;;  %6469 = vpow.bf16 %v3369_v57  ;;  %v7936_v12 = vpop.permute.xlu1 %3234  ;;  %v2821_v7 = vadd.f32 %v2820_v26, %v2819_v40  ;;  %v7949_v57 = vadd.f32 %v3087_v8, %v3086_v15  ;;  %v3361_v53 = vpack.c.bf16 %v3347_v44, %v9521_v41  ;;  %v9526_v41 = vld [vmem:[#allocation125_spill] sm:$0xff] }
 0x411   : > { %v3062_v14 = vmul.f32 %v3046_v25, %v9518_v45  ;;  %v3063_v34 = vmul.f32 %v3047_v9, %v9519_v49  ;;  %v3157_v60 = vadd.f32 %v3047_v9, %v3046_v25  ;;  %v2637_v40 = vmul.f32 %v7835_v21, %v7570_v56 }
 0x412   : > { %v7946_v18 = vpop.permute.xlu0 %3566  ;;  %4306 = vbcast.lane.b32.xlu1 %v7332_v37, 352  ;;  %9520 = vst [vmem:[#allocation45_spill] sm:$0xff] %v7949_v57  ;;  %v7959_v20 = vadd.f32 %v3153_v13, %v3152_v63  ;;  %v2822_v23 = vrot.slane %v2821_v7, 2  ;;  %v3372_v8 = vmul.bf16 1069105081, %v3361_v53  ;;  %v2638_v9 = vmul.f32 %v7843_v55, %v7580_v10 }
 0x413   : > { %v7961_v26 = vadd.f32 %v3063_v34, %v3062_v14  ;;  %v3158_v25 = vrot.slane %v3157_v60, 4  ;;  %v2653_v28 = vsub.f32 %v2637_v40, %v7604_v27  ;;  %v2985_v32 = vmul.f32 %v7851_v3, %v7558_v58 }
 0x414   : > { %4310 = vbcast.lane.b32.xlu0 %v7332_v37, 360  ;;  %9522 = vst [vmem:[#allocation32_spill] sm:$0xff] %v7959_v20  ;;  %v7963_v15 = vpop.permute.xlu1 %3570  ;;  %v7970_v21 = vadd.f32 %v2756_v38, %v2755_v46  ;;  %v7972_v44 = vadd.f32 %v2822_v23, %v2821_v7  ;;  %v3000_v63 = vsub.f32 %v2984_v24, %v9490_v48  ;;  %6471 = vpow.bf16 %v3372_v8 }
 0x415   : > { %v3348_v13 = vsub.f32 %v3332_v19, %v7511_v51  ;;  %v9525_v14 = vsub.f32 %v7860_v11, %v7604_v27  ;;  %v3001_v49 = vsub.f32 %v2985_v32, %v9490_v48  ;;  %v2986_v3 = vmul.f32 %v7862_v4, %v9491_v50  ;;  %v9527_v4 = vld [vmem:[#allocation39_spill] sm:$0xff] }
 0x416   : > { %9523 = vst [vmem:[#allocation47_spill] sm:$0xff] %v7970_v21  ;;  %9524 = vst [vmem:[#allocation33_spill] sm:$0xff] %v7972_v44  ;;  %v7976_v45 = vpop.permute.xlu0 %2902  ;;  %4642 = vbcast.lane.b32.xlu1 %v7312_v52, 368  ;;  %v7987_v38 = vadd.f32 %v3158_v25, %v3157_v60  ;;  %v3333_v24 = vmul.f32 %v7870_v30, %v7498_v62  ;;  %v3334_v7 = vmul.f32 %v7879_v5, %v7515_v47  ;;  %v9529_v25 = vld [vmem:[#allocation118_spill] sm:$0xff]  ;;  %v9531_v30 = vld [vmem:[#allocation29_spill] sm:$0xff] }
 0x417   : > { %v2662_v55 = vpack.c.bf16 %v2653_v28, %v9525_v14  ;;  %v2654_v53 = vsub.f32 %v2638_v9, %v9526_v41  ;;  %v3012_v19 = vpack.c.bf16 %v3001_v49, %v3000_v63  ;;  %v2639_v40 = vmul.f32 %v9527_v4, %v7580_v10  ;;  %v9530_v28 = vld [vmem:[#allocation110_spill] sm:$0xff] }
 0x418   : > { %4646 = vbcast.lane.b32.xlu0 %v7312_v52, 376  ;;  %v7993_v34 = vpop.permute.xlu1 %2906  ;;  %v9528_v52 = vld [vmem:[#allocation124_spill] sm:$0xff]  ;;  %v3349_v60 = vsub.f32 %v3333_v24, %v7511_v51  ;;  %v3350_v8 = vsub.f32 %v3334_v7, %v9529_v25  ;;  %v8003_v32 = vmul.f32 %v9531_v30, %v9530_v28 }
 0x419   : > { %v2683_v11 = vmul.bf16 1069105081, %v2662_v55  ;;  %v3002_v23 = vsub.f32 %v2986_v3, %v9528_v52  ;;  %v3029_v9 = vmul.bf16 1069105081, %v3012_v19  ;;  %v2655_v63 = vsub.f32 %v2639_v40, %v9526_v41  ;;  %v9532_v55 = vld [vmem:[#allocation30_spill] sm:$0xff] }
 0x41a   : > { %v8005_v5 = vpop.permute.xlu0 %3238  ;;  %4314 = vbcast.lane.b32.xlu1 %v7342_v61, 352  ;;  %v2987_v49 = vmul.f32 %v9532_v55, %v9491_v50  ;;  %v3362_v7 = vpack.c.bf16 %v3349_v60, %v3348_v13  ;;  %v3696_v4 = vsub.f32 %v8003_v32, %v7483_v0  ;;  %v8019_v19 = vmul.f32 %v7900_v22, %v7550_v33  ;;  %v9533_v40 = vld [vmem:[#allocation38_spill] sm:$0xff] }
 0x41b   : > { %v6470_v14 = vpop.eup %6469  ;;  %6473 = vpow.bf16 %v2683_v11  ;;  %v2663_v2 = vpack.c.bf16 %v2655_v63, %v2654_v53 }
 0x41c   : > { %4318 = vbcast.lane.b32.xlu0 %v7342_v61, 360  ;;  %v3392_v3 = vunpack.c.l.bf16 %v6470_v14  ;;  %v3393_v24 = vunpack.c.h.bf16 %v6470_v14  ;;  %v8014_v30 = vpop.permute.xlu1 %3242  ;;  %6475 = vpow.bf16 %v3029_v9  ;;  %v3003_v11 = vsub.f32 %v2987_v49, %v9528_v52 }
 0x41d   : > { %v3375_v14 = vmul.bf16 1069105081, %v3362_v7  ;;  %v2686_v60 = vmul.bf16 1069105081, %v2663_v2  ;;  %v3335_v9 = vmul.f32 %v7908_v29, %v7515_v47 }
 0x41e   : > { %v3408_v55 = vmul.f32 %v3392_v3, %v9533_v40  ;;  %v3409_v46 = vmul.f32 %v3393_v24, %v9534_v1  ;;  %v3488_v59 = vadd.f32 %v3393_v24, %v3392_v3  ;;  %v8023_v13 = vpop.permute.xlu0 %3574  ;;  %4650 = vbcast.lane.b32.xlu1 %v7322_v43, 368  ;;  %v3013_v32 = vpack.c.bf16 %v3003_v11, %v3002_v23 }
 0x41f   : > { %6477 = vpow.bf16 %v3375_v14  ;;  %v8033_v1 = vmul.f32 %v7922_v42, %v7570_v56  ;;  %v3351_v23 = vsub.f32 %v3335_v9, %v9529_v25  ;;  %v3681_v3 = vmul.f32 %v7930_v31, %v9530_v28  ;;  %v6472_v24 = vpop.eup %6471 }
 0x420   : > { %4654 = vbcast.lane.b32.xlu0 %v7322_v43, 376  ;;  %v3424_v22 = vadd.f32 %v3409_v46, %v3408_v55  ;;  %v3489_v63 = vrot.slane %v3488_v59, 4  ;;  %v8035_v49 = vpop.permute.xlu1 %3578  ;;  %6479 = vpow.bf16 %v2686_v60  ;;  %v3032_v2 = vmul.bf16 1069105081, %v3013_v32 }
 0x421   : > { %v8044_v46 = vmul.f32 %v7936_v12, %v7558_v58  ;;  %v3394_v11 = vunpack.c.l.bf16 %v6472_v24  ;;  %v3395_v40 = vunpack.c.h.bf16 %v6472_v24  ;;  %v3363_v55 = vpack.c.bf16 %v3351_v23, %v3350_v8  ;;  %v9535_v12 = vld [vmem:[#allocation40_spill] sm:$0xff] }
 0x422   : > { %v3425_v29 = vrot.slane %v3424_v22, 4  ;;  %v3490_v7 = vadd.f32 %v3489_v63, %v3488_v59  ;;  %v8046_v42 = vpop.permute.xlu0 %2910  ;;  %4658 = vbcast.lane.b32.xlu1 %v7332_v37, 368  ;;  %6481 = vpow.bf16 %v3032_v2  ;;  %v3697_v59 = vsub.f32 %v3681_v3, %v7483_v0  ;;  %v9536_v63 = vld [vmem:[#allocation57_spill] sm:$0xff] }
 0x423   : > { %v3410_v9 = vmul.f32 %v3394_v11, %v9535_v12  ;;  %v3411_v43 = vmul.f32 %v3395_v40, %v9536_v63  ;;  %v3495_v53 = vadd.f32 %v3395_v40, %v3394_v11  ;;  %v3378_v39 = vmul.bf16 1069105081, %v3363_v55 }
 0x424   : > { %4662 = vbcast.lane.b32.xlu0 %v7332_v37, 376  ;;  %v3426_v31 = vadd.f32 %v3425_v29, %v3424_v22  ;;  %v3491_v14 = vrot.slane %v3490_v7, 2  ;;  %v8053_v32 = vpop.permute.xlu1 %3906  ;;  %v8057_v23 = vpack.c.bf16 %v3697_v59, %v3696_v4  ;;  %v8061_v37 = vmul.f32 %v7946_v18, %v7550_v33  ;;  %v9539_v59 = vld [vmem:[#allocation42_spill] sm:$0xff] }
 0x425   : > { %v3431_v3 = vadd.f32 %v3411_v43, %v3410_v9  ;;  %v3496_v29 = vrot.slane %v3495_v53, 4  ;;  %v3160_v40 = vrot.slane %v7987_v38, 2  ;;  %6483 = vpow.bf16 %v3378_v39 }
 0x426   : > { %v6474_v24 = vpop.eup %6473  ;;  %v3427_v2 = vrot.slane %v3426_v31, 2  ;;  %v3492_v8 = vadd.f32 %v3491_v14, %v3490_v7  ;;  %v8063_v22 = vpop.permute.xlu0 %3246  ;;  %4666 = vbcast.lane.b32.xlu1 %v7342_v61, 368  ;;  %v9541_v43 = vrot.slane %v7961_v26, 4 }
 0x427   : > { %9537 = vst [vmem:[#allocation49_spill] sm:$0xff] %v8063_v22  ;;  %v2700_v12 = vunpack.c.l.bf16 %v6474_v24  ;;  %v2701_v60 = vunpack.c.h.bf16 %v6474_v24  ;;  %v6476_v11 = vpop.eup %6475  ;;  %v3432_v18 = vrot.slane %v3431_v3, 4  ;;  %v3497_v14 = vadd.f32 %v3496_v29, %v3495_v53 }
 0x428   : > { %4670 = vbcast.lane.b32.xlu0 %v7342_v61, 376  ;;  %v3428_v7 = vadd.f32 %v3427_v2, %v3426_v31  ;;  %v3493_v4 = vrot.slane %v3492_v8, 1  ;;  %v8068_v55 = vpop.permute.xlu1 %3914  ;;  %v8075_v9 = vadd.f32 %v9541_v43, %v7961_v26  ;;  %v3048_v21 = vunpack.c.l.bf16 %v6476_v11  ;;  %v9544_v31 = vld [vmem:[#allocation16_spill] sm:$0xff] }
 0x429   : > { %9538 = vst [vmem:[#allocation34_spill] sm:$0xff] %v8068_v55  ;;  %v2716_v63 = vmul.f32 %v2700_v12, %v9539_v59  ;;  %v2717_v44 = vmul.f32 %v2701_v60, %v9540_v6  ;;  %v2826_v24 = vadd.f32 %v2701_v60, %v2700_v12  ;;  %v3433_v2 = vadd.f32 %v3432_v18, %v3431_v3  ;;  %v9548_v55 = vld [vmem:[#allocation61_spill] sm:$0xff] }
 0x42a   : > { %9542 = vst [vmem:[#allocation51_spill] sm:$0xff] %v8075_v9  ;;  %v3429_v61 = vrot.slane %v3428_v7, 1  ;;  %v8077_v20 = vpop.permute.xlu0 %3582  ;;  %4690 = vbcast.lane.b32.xlu1 %v9544_v31, 368  ;;  %v6478_v39 = vpop.eup %6477  ;;  %v3498_v57 = vrot.slane %v3497_v14, 2  ;;  %v3049_v29 = vunpack.c.h.bf16 %v6476_v11  ;;  %v8082_v59 = vadd.f32 %v3160_v40, %v7987_v38  ;;  %v9546_v9 = vld [vmem:[#allocation44_spill] sm:$0xff]  ;;  %v9550_v38 = vld [vmem:[#allocation25_spill] sm:$0xff] }
 0x42b   : > { %9543 = vst [vmem:[#allocation36_spill] sm:$0xff] %v8077_v20  ;;  %v2762_v53 = vadd.f32 %v2717_v44, %v2716_v63  ;;  %v6480_v6 = vpop.eup %6479  ;;  %v3494_v26 = vadd.f32 %v3493_v4, %v3492_v8  ;;  %v2827_v43 = vrot.slane %v2826_v24, 4  ;;  %v3064_v60 = vmul.f32 %v3048_v21, %v9546_v9 }
 0x42c   : > { %4694 = vbcast.lane.b32.xlu0 %v9544_v31, 376  ;;  %9545 = vst [vmem:[#allocation53_spill] sm:$0xff] %v8082_v59  ;;  %v8085_v12 = vpop.permute.xlu1 %3250  ;;  %v3434_v20 = vrot.slane %v3433_v2, 2  ;;  %v3499_v0 = vadd.f32 %v3498_v57, %v3497_v14  ;;  %v3065_v33 = vmul.f32 %v3049_v29, %v9548_v55  ;;  %v3721_v3 = vmul.bf16 1069105081, %v8057_v23 }
 0x42d   : > { %9547 = vst [vmem:[#allocation125_spill] sm:$0xff] %v8085_v12  ;;  %v6482_v44 = vpop.eup %6481  ;;  %v3430_v11 = vadd.f32 %v3429_v61, %v3428_v7  ;;  %v2828_v18 = vadd.f32 %v2827_v43, %v2826_v24  ;;  %v3164_v63 = vadd.f32 %v3049_v29, %v3048_v21  ;;  %v3396_v31 = vunpack.c.l.bf16 %v6478_v39  ;;  %v9552_v24 = vld [vmem:[#allocation46_spill] sm:$0xff] }
 0x42e   : > { %v8089_v22 = vpop.permute.xlu0 %3910  ;;  %4026 = vbcast.lane.b32.xlu1 %v9550_v38, 336  ;;  %v3435_v8 = vadd.f32 %v3434_v20, %v3433_v2  ;;  %v3500_v40 = vrot.slane %v3499_v0, 1  ;;  %v2763_v4 = vrot.slane %v2762_v53, 4  ;;  %v3100_v9 = vadd.f32 %v3065_v33, %v3064_v60  ;;  %v9553_v2 = vld [vmem:[#allocation63_spill] sm:$0xff]  ;;  %v9555_v12 = vld [vmem:[#allocation22_spill] sm:$0xff] }
 0x42f   : > { %9549 = vst [vmem:[#allocation39_spill] sm:$0xff] %v8089_v22  ;;  %v8094_v57 = vadd.f32 %v3494_v26, %v7916_v36  ;;  %v2829_v55 = vrot.slane %v2828_v18, 2  ;;  %v3165_v23 = vrot.slane %v3164_v63, 4  ;;  %v3397_v14 = vunpack.c.h.bf16 %v6478_v39 }
 0x430   : > { %4030 = vbcast.lane.b32.xlu0 %v9550_v38, 344  ;;  %v8096_v7 = vpop.permute.xlu1 %3586  ;;  %v3436_v21 = vrot.slane %v3435_v8, 1  ;;  %v3501_v61 = vadd.f32 %v3500_v40, %v3499_v0  ;;  %v3412_v29 = vmul.f32 %v3396_v31, %v9552_v24  ;;  %v2702_v43 = vunpack.c.l.bf16 %v6480_v6  ;;  %v6484_v36 = vpop.eup %6483 }
 0x431   : > { %9551 = vst [vmem:[#allocation124_spill] sm:$0xff] %v8094_v57  ;;  %v3101_v59 = vrot.slane %v3100_v9, 4  ;;  %v3166_v20 = vadd.f32 %v3165_v23, %v3164_v63  ;;  %v3413_v22 = vmul.f32 %v3397_v14, %v9553_v2  ;;  %v3502_v33 = vadd.f32 %v3397_v14, %v3396_v31  ;;  %v9558_v23 = vld [vmem:[#allocation48_spill] sm:$0xff] }
 0x432   : > { %v8100_v60 = vpop.permute.xlu0 %3918  ;;  %4362 = vbcast.lane.b32.xlu1 %v9555_v12, 352  ;;  %v8104_v26 = vadd.f32 %v3430_v11, %v7913_v16  ;;  %v3437_v39 = vadd.f32 %v3436_v21, %v3435_v8  ;;  %v8106_v57 = vadd.f32 %v2763_v4, %v2762_v53  ;;  %v2703_v0 = vunpack.c.h.bf16 %v6480_v6 }
 0x433   : > { %9554 = vst [vmem:[#allocation118_spill] sm:$0xff] %v8100_v60  ;;  %v8110_v40 = vadd.f32 %v3501_v61, %v7927_v17  ;;  %v8112_v63 = vadd.f32 %v2829_v55, %v2828_v18  ;;  %v3503_v31 = vrot.slane %v3502_v33, 4  ;;  %v2718_v14 = vmul.f32 %v2702_v43, %v9558_v23  ;;  %v9559_v60 = vld [vmem:[#allocation65_spill] sm:$0xff]  ;;  %v9562_v55 = vld [vmem:[#allocation18_spill] sm:$0xff] }
 0x434   : > { %9556 = vst [vmem:[#allocation110_spill] sm:$0xff] %v8106_v57  ;;  %4366 = vbcast.lane.b32.xlu0 %v9555_v12, 360  ;;  %v8115_v24 = vpop.permute.xlu1 %3922  ;;  %v3167_v2 = vrot.slane %v3166_v20, 2  ;;  %v2719_v16 = vmul.f32 %v2703_v0, %v9559_v60  ;;  %v2833_v11 = vadd.f32 %v2703_v0, %v2702_v43  ;;  %v3050_v8 = vunpack.c.l.bf16 %v6482_v44  ;;  %v9564_v23 = vld [vmem:[#allocation50_spill] sm:$0xff] }
 0x435   : > { %9557 = vst [vmem:[#allocation29_spill] sm:$0xff] %v8112_v63  ;;  %v8119_v53 = vadd.f32 %v3437_v39, %v7939_v35  ;;  %v8121_v6 = vadd.f32 %v3101_v59, %v3100_v9  ;;  %v8123_v4 = vadd.f32 %v3413_v22, %v3412_v29  ;;  %v3051_v17 = vunpack.c.h.bf16 %v6482_v44  ;;  %v9566_v35 = vld [vmem:[#allocation67_spill] sm:$0xff] }
 0x436   : > { %v8125_v18 = vpop.permute.xlu0 %3254  ;;  %4698 = vbcast.lane.b32.xlu1 %v9562_v55, 368  ;;  %v8128_v21 = vadd.f32 %v3503_v31, %v3502_v33  ;;  %v2834_v61 = vrot.slane %v2833_v11, 4  ;;  %v3066_v63 = vmul.f32 %v3050_v8, %v9564_v23  ;;  %v3398_v60 = vunpack.c.l.bf16 %v6484_v36  ;;  %v9569_v33 = vld [vmem:[#allocation52_spill] sm:$0xff] }
 0x437   : > { %9560 = vst [vmem:[#allocation30_spill] sm:$0xff] %v8121_v6  ;;  %9561 = vst [vmem:[#allocation38_spill] sm:$0xff] %v8123_v4  ;;  %v8132_v43 = vadd.f32 %v2719_v16, %v2718_v14  ;;  %v3067_v59 = vmul.f32 %v3051_v17, %v9566_v35  ;;  %v3171_v9 = vadd.f32 %v3051_v17, %v3050_v8  ;;  %v3399_v22 = vunpack.c.h.bf16 %v6484_v36  ;;  %v9571_v6 = vld [vmem:[#allocation69_spill] sm:$0xff]  ;;  %v9572_v35 = vld [vmem:[#allocation24_spill] sm:$0xff] }
 0x438   : > { %9563 = vst [vmem:[#allocation55_spill] sm:$0xff] %v8128_v21  ;;  %4702 = vbcast.lane.b32.xlu0 %v9562_v55, 376  ;;  %v8135_v29 = vpop.permute.xlu1 %3258  ;;  %v8137_v44 = vadd.f32 %v3167_v2, %v3166_v20  ;;  %v8139_v39 = vadd.f32 %v2834_v61, %v2833_v11  ;;  %v3414_v0 = vmul.f32 %v3398_v60, %v9569_v33  ;;  %6485 = vpow.bf16 %v3721_v3  ;;  %v9581_v11 = vld [vmem:[#allocation112_spill] sm:$0xff] }
 0x439   : > { %9565 = vst [vmem:[#allocation40_spill] sm:$0xff] %v8132_v43  ;;  %v8142_v31 = vadd.f32 %v3067_v59, %v3066_v63  ;;  %v3172_v23 = vrot.slane %v3171_v9, 4  ;;  %v3415_v55 = vmul.f32 %v3399_v22, %v9571_v6  ;;  %v3509_v14 = vadd.f32 %v3399_v22, %v3398_v60 }
 0x43a   : > { %9567 = vst [vmem:[#allocation57_spill] sm:$0xff] %v8137_v44  ;;  %9568 = vst [vmem:[#allocation42_spill] sm:$0xff] %v8139_v39  ;;  %v8145_v16 = vpop.permute.xlu0 %3590  ;;  %4370 = vbcast.lane.b32.xlu1 %v9572_v35, 352  ;;  %v3699_v20 = vsub.f32 %v8061_v37, %v7577_v54  ;;  %v3684_v2 = vmul.f32 %v7963_v15, %v7498_v62  ;;  %v2989_v3 = vmul.f32 %v7976_v45, %v7570_v56 }
 0x43b   : > { %9570 = vst [vmem:[#allocation59_spill] sm:$0xff] %v8142_v31  ;;  %v8158_v8 = vadd.f32 %v3172_v23, %v3171_v9  ;;  %v8160_v6 = vadd.f32 %v3415_v55, %v3414_v0  ;;  %v9574_v37 = vsub.f32 %v8019_v19, %v7577_v54  ;;  %v2990_v60 = vmul.f32 %v7993_v34, %v7580_v10  ;;  %v9575_v23 = vld [vmem:[#allocation20_spill] sm:$0xff]  ;;  %v9594_v31 = vld [vmem:[#allocation73_spill] sm:$0xff] }
 0x43c   : > { %4374 = vbcast.lane.b32.xlu0 %v9572_v35, 360  ;;  %v8162_v17 = vpop.permute.xlu1 %3594  ;;  %v3700_v15 = vsub.f32 %v3684_v2, %v7511_v51  ;;  %v3005_v45 = vsub.f32 %v2989_v3, %v7604_v27  ;;  %v3510_v22 = vrot.slane %v3509_v14, 4  ;;  %v3337_v33 = vmul.f32 %v8005_v5, %v7558_v58 }
 0x43d   : > { %9573 = vst [vmem:[#allocation16_spill] sm:$0xff] %v8158_v8  ;;  %v3713_v61 = vpack.c.bf16 %v3699_v20, %v9574_v37  ;;  %v9576_v55 = vsub.f32 %v8033_v1, %v7604_v27  ;;  %v3006_v2 = vsub.f32 %v2990_v60, %v9526_v41  ;;  %v3338_v34 = vmul.f32 %v8014_v30, %v9491_v50 }
 0x43e   : > { %v8175_v0 = vpop.permute.xlu0 %3926  ;;  %4706 = vbcast.lane.b32.xlu1 %v9575_v23, 368  ;;  %v3353_v37 = vsub.f32 %v3337_v33, %v9490_v48  ;;  %v3686_v30 = vmul.f32 %v8035_v49, %v7515_v47  ;;  %v8195_v60 = vadd.f32 %v3510_v22, %v3509_v14  ;;  %v4032_v49 = vmul.f32 %v8053_v32, %v9530_v28  ;;  %v9578_v14 = vld [vmem:[#allocation49_spill] sm:$0xff] }
 0x43f   : > { %v3724_v19 = vmul.bf16 1069105081, %v3713_v61  ;;  %v3014_v20 = vpack.c.bf16 %v3005_v45, %v9576_v55  ;;  %v3685_v61 = vmul.f32 %v8023_v13, %v7498_v62  ;;  %v3354_v45 = vsub.f32 %v3338_v34, %v9528_v52 }
 0x440   : > { %4710 = vbcast.lane.b32.xlu0 %v9575_v23, 376  ;;  %v8190_v9 = vpop.permute.xlu1 %3930  ;;  %v9577_v23 = vsub.f32 %v8044_v46, %v9490_v48  ;;  %v2991_v13 = vmul.f32 %v8046_v42, %v7580_v10  ;;  %v3339_v22 = vmul.f32 %v9578_v14, %v9491_v50  ;;  %v4048_v32 = vsub.f32 %v4032_v49, %v9581_v11 }
 0x441   : > { %6487 = vpow.bf16 %v3724_v19  ;;  %v3035_v1 = vmul.bf16 1069105081, %v3014_v20  ;;  %v3701_v33 = vsub.f32 %v3685_v61, %v7511_v51  ;;  %v3702_v19 = vsub.f32 %v3686_v30, %v9529_v25  ;;  %v9580_v61 = vld [vmem:[#allocation34_spill] sm:$0xff] }
 0x442   : > { %v3364_v55 = vpack.c.bf16 %v3353_v37, %v9577_v23  ;;  %v8203_v3 = vpop.permute.xlu0 %3262  ;;  %4378 = vbcast.lane.b32.xlu1 %v9550_v38, 352  ;;  %v3007_v42 = vsub.f32 %v2991_v13, %v9526_v41  ;;  %v9579_v37 = vld [vmem:[#allocation120_spill] sm:$0xff]  ;;  %v3355_v63 = vsub.f32 %v3339_v22, %v9528_v52 }
 0x443   : > { %6489 = vpow.bf16 %v3035_v1  ;;  %v6486_v46 = vpop.eup %6485  ;;  %v3714_v34 = vpack.c.bf16 %v3701_v33, %v3700_v15  ;;  %v8215_v23 = vmul.f32 %v9580_v61, %v9579_v37  ;;  %v9582_v33 = vld [vmem:[#allocation54_spill] sm:$0xff]  ;;  %v9583_v61 = vld [vmem:[#allocation71_spill] sm:$0xff] }
 0x444   : > { %4382 = vbcast.lane.b32.xlu0 %v9550_v38, 360  ;;  %v3381_v20 = vmul.bf16 1069105081, %v3364_v55  ;;  %v8217_v1 = vpop.permute.xlu1 %4258  ;;  %v3744_v30 = vunpack.c.l.bf16 %v6486_v46  ;;  %v3745_v59 = vunpack.c.h.bf16 %v6486_v46  ;;  %v3015_v36 = vpack.c.bf16 %v3007_v42, %v3006_v2  ;;  %v9584_v2 = vld [vmem:[#allocation36_spill] sm:$0xff] }
 0x445   : > { %v3727_v14 = vmul.bf16 1069105081, %v3714_v34  ;;  %v3365_v46 = vpack.c.bf16 %v3355_v63, %v3354_v45  ;;  %v9585_v34 = vld [vmem:[#allocation125_spill] sm:$0xff] }
 0x446   : > { %6491 = vpow.bf16 %v3381_v20  ;;  %v8223_v55 = vpop.permute.xlu0 %3598  ;;  %4714 = vbcast.lane.b32.xlu1 %v9555_v12, 368  ;;  %v3760_v13 = vmul.f32 %v3744_v30, %v9582_v33  ;;  %v3761_v5 = vmul.f32 %v3745_v59, %v9583_v61  ;;  %v3840_v44 = vadd.f32 %v3745_v59, %v3744_v30  ;;  %v9587_v59 = vld [vmem:[#allocation39_spill] sm:$0xff] }
 0x447   : > { %v3038_v22 = vmul.bf16 1069105081, %v3015_v36  ;;  %v3687_v20 = vmul.f32 %v9584_v2, %v7515_v47  ;;  %v8234_v42 = vmul.f32 %v9585_v34, %v7570_v56  ;;  %6493 = vpow.bf16 %v3727_v14  ;;  %v9589_v34 = vld [vmem:[#allocation118_spill] sm:$0xff] }
 0x448   : > { %4718 = vbcast.lane.b32.xlu0 %v9555_v12, 376  ;;  %v8236_v15 = vpop.permute.xlu1 %4266  ;;  %v3776_v57 = vadd.f32 %v3761_v5, %v3760_v13  ;;  %v3841_v33 = vrot.slane %v3840_v44, 4  ;;  %v4033_v63 = vmul.f32 %v9587_v59, %v9530_v28  ;;  %v3384_v45 = vmul.bf16 1069105081, %v3365_v46 }
 0x449   : > { %9586 = vst [vmem:[#allocation44_spill] sm:$0xff] %v8236_v15  ;;  %v3703_v12 = vsub.f32 %v3687_v20, %v9529_v25  ;;  %v8245_v30 = vmul.f32 %v8096_v7, %v7558_v58  ;;  %6495 = vpow.bf16 %v3038_v22  ;;  %v8256_v7 = vmul.f32 %v9589_v34, %v9579_v37 }
 0x44a   : > { %v8247_v61 = vpop.permute.xlu0 %3934  ;;  %4722 = vbcast.lane.b32.xlu1 %v9572_v35, 368  ;;  %v3777_v5 = vrot.slane %v3776_v57, 4  ;;  %v3842_v13 = vadd.f32 %v3841_v33, %v3840_v44  ;;  %v4049_v14 = vsub.f32 %v4033_v63, %v9581_v11  ;;  %v8260_v59 = vmul.f32 %v8115_v24, %v7498_v62 }
 0x44b   : > { %9588 = vst [vmem:[#allocation61_spill] sm:$0xff] %v8247_v61  ;;  %v3715_v2 = vpack.c.bf16 %v3703_v12, %v3702_v19  ;;  %6497 = vpow.bf16 %v3384_v45 }
 0x44c   : > { %4726 = vbcast.lane.b32.xlu0 %v9572_v35, 376  ;;  %v6488_v46 = vpop.eup %6487  ;;  %9590 = vst [vmem:[#allocation25_spill] sm:$0xff] %v8260_v59  ;;  %v8262_v36 = vpop.permute.xlu1 %3602  ;;  %v3778_v44 = vadd.f32 %v3777_v5, %v3776_v57  ;;  %v3843_v22 = vrot.slane %v3842_v13, 2  ;;  %v8264_v19 = vpack.c.bf16 %v4049_v14, %v4048_v32  ;;  %v9593_v57 = vld [vmem:[#allocation56_spill] sm:$0xff] }
 0x44d   : > { %9591 = vst [vmem:[#allocation46_spill] sm:$0xff] %v8262_v36  ;;  %v3746_v33 = vunpack.c.l.bf16 %v6488_v46  ;;  %v3747_v63 = vunpack.c.h.bf16 %v6488_v46  ;;  %v3730_v49 = vmul.bf16 1069105081, %v3715_v2 }
 0x44e   : > { %v6490_v35 = vpop.eup %6489  ;;  %v8270_v20 = vpop.permute.xlu0 %4262  ;;  %4730 = vbcast.lane.b32.xlu1 %v9550_v38, 368  ;;  %v3779_v24 = vrot.slane %v3778_v44, 2  ;;  %v3844_v8 = vadd.f32 %v3843_v22, %v3842_v13  ;;  %v9597_v22 = vld [vmem:[#allocation75_spill] sm:$0xff] }
 0x44f   : > { %9592 = vst [vmem:[#allocation63_spill] sm:$0xff] %v8270_v20  ;;  %v3762_v5 = vmul.f32 %v3746_v33, %v9593_v57  ;;  %v3763_v46 = vmul.f32 %v3747_v63, %v9594_v31  ;;  %v3847_v32 = vadd.f32 %v3747_v63, %v3746_v33  ;;  %v3052_v14 = vunpack.c.l.bf16 %v6490_v35  ;;  %v9596_v20 = vld [vmem:[#allocation58_spill] sm:$0xff] }
 0x450   : > { %4734 = vbcast.lane.b32.xlu0 %v9550_v38, 376  ;;  %v3053_v2 = vunpack.c.h.bf16 %v6490_v35  ;;  %v8276_v12 = vpop.permute.xlu1 %3938  ;;  %v3780_v34 = vadd.f32 %v3779_v24, %v3778_v44  ;;  %v3845_v43 = vrot.slane %v3844_v8, 1  ;;  %6499 = vpow.bf16 %v3730_v49 }
 0x451   : > { %9595 = vst [vmem:[#allocation22_spill] sm:$0xff] %v8276_v12  ;;  %v6492_v39 = vpop.eup %6491  ;;  %v3783_v21 = vadd.f32 %v3763_v46, %v3762_v5  ;;  %v3848_v4 = vrot.slane %v3847_v32, 4  ;;  %v3068_v13 = vmul.f32 %v3052_v14, %v9596_v20  ;;  %v9599_v5 = vld [vmem:[#allocation124_spill] sm:$0xff] }
 0x452   : > { %v3069_v57 = vmul.f32 %v3053_v2, %v9597_v22  ;;  %v3178_v36 = vadd.f32 %v3053_v2, %v3052_v14  ;;  %v8280_v31 = vpop.permute.xlu0 %4270  ;;  %v3781_v38 = vrot.slane %v3780_v34, 1  ;;  %v3846_v33 = vadd.f32 %v3845_v43, %v3844_v8  ;;  %v6494_v45 = vpop.eup %6493  ;;  %v9601_v20 = vld [vmem:[#allocation60_spill] sm:$0xff] }
 0x453   : > { %9598 = vst [vmem:[#allocation48_spill] sm:$0xff] %v8280_v31  ;;  %v3784_v63 = vrot.slane %v3783_v21, 4  ;;  %v3400_v35 = vunpack.c.l.bf16 %v6492_v39  ;;  %v3849_v61 = vadd.f32 %v3848_v4, %v3847_v32  ;;  %v3401_v44 = vunpack.c.h.bf16 %v6492_v39  ;;  %v9604_v31 = vld [vmem:[#allocation77_spill] sm:$0xff] }
 0x454   : > { %v3114_v12 = vadd.f32 %v3069_v57, %v3068_v13  ;;  %v3179_v59 = vrot.slane %v3178_v36, 4  ;;  %v3782_v24 = vadd.f32 %v3781_v38, %v3780_v34  ;;  %v8283_v49 = vadd.f32 %v3846_v33, %v9599_v5  ;;  %v6496_v22 = vpop.eup %6495  ;;  %v8292_v32 = vpop.permute.xlu1 %4274 }
 0x455   : > { %v3785_v46 = vadd.f32 %v3784_v63, %v3783_v21  ;;  %v3416_v15 = vmul.f32 %v3400_v35, %v9601_v20  ;;  %v9602_v14 = vrot.slane %v8160_v6, 4  ;;  %v3850_v43 = vrot.slane %v3849_v61, 2  ;;  %9605 = vst [vmem:[#allocation50_spill] sm:$0xff] %v8292_v32 }
 0x456   : > { %9600 = vst [vmem:[#allocation65_spill] sm:$0xff] %v8283_v49  ;;  %v3180_v8 = vadd.f32 %v3179_v59, %v3178_v36  ;;  %v3417_v4 = vmul.f32 %v3401_v44, %v9604_v31  ;;  %v8295_v39 = vadd.f32 %v3782_v24, %v8104_v26  ;;  %v3516_v13 = vadd.f32 %v3401_v44, %v3400_v35  ;;  %v8297_v57 = vpop.permute.xlu0 %3606  ;;  %v9610_v24 = vld [vmem:[#allocation62_spill] sm:$0xff]  ;;  %v6498_v44 = vpop.eup %6497 }
 0x457   : > { %v8289_v2 = vadd.f32 %v9602_v14, %v8160_v6  ;;  %v3786_v34 = vrot.slane %v3785_v46, 2  ;;  %v3748_v21 = vunpack.c.l.bf16 %v6494_v45  ;;  %9607 = vst [vmem:[#allocation52_spill] sm:$0xff] %v8297_v57  ;;  %v9608_v38 = vrot.slane %v8195_v60, 2 }
 0x458   : > { %9606 = vst [vmem:[#allocation67_spill] sm:$0xff] %v8295_v39  ;;  %v3851_v6 = vadd.f32 %v3850_v43, %v3849_v61  ;;  %v3115_v63 = vrot.slane %v3114_v12, 4  ;;  %v3452_v36 = vadd.f32 %v3417_v4, %v3416_v15  ;;  %v3181_v31 = vrot.slane %v3180_v8, 2  ;;  %v9611_v39 = vld [vmem:[#allocation79_spill] sm:$0xff]  ;;  %v8309_v43 = vpop.permute.xlu1 %3610 }
 0x459   : > { %9603 = vst [vmem:[#allocation18_spill] sm:$0xff] %v8289_v2  ;;  %v8302_v33 = vadd.f32 %v9608_v38, %v8195_v60  ;;  %v3787_v59 = vadd.f32 %v3786_v34, %v3785_v46  ;;  %v3517_v5 = vrot.slane %v3516_v13, 4  ;;  %v3749_v20 = vunpack.c.h.bf16 %v6494_v45 }
 0x45a   : > { %v3852_v14 = vrot.slane %v3851_v6, 1  ;;  %v3453_v26 = vrot.slane %v3452_v36, 4  ;;  %v3764_v2 = vmul.f32 %v3748_v21, %v9610_v24  ;;  %v3054_v35 = vunpack.c.l.bf16 %v6496_v22  ;;  %v9613_v24 = vld [vmem:[#allocation64_spill] sm:$0xff]  ;;  %v8312_v11 = vpop.permute.xlu0 %3942 }
 0x45b   : > { %9609 = vst [vmem:[#allocation69_spill] sm:$0xff] %v8302_v33  ;;  %v3788_v32 = vrot.slane %v3787_v59, 1  ;;  %v3518_v57 = vadd.f32 %v3517_v5, %v3516_v13  ;;  %v3765_v49 = vmul.f32 %v3749_v20, %v9611_v39  ;;  %v3854_v37 = vadd.f32 %v3749_v20, %v3748_v21  ;;  %v6500_v60 = vpop.eup %6499  ;;  %v9614_v39 = vld [vmem:[#allocation81_spill] sm:$0xff] }
 0x45c   : > { %v3853_v38 = vadd.f32 %v3852_v14, %v3851_v6  ;;  %v8306_v61 = vadd.f32 %v3115_v63, %v3114_v12  ;;  %v3055_v15 = vunpack.c.h.bf16 %v6496_v22  ;;  %v4073_v46 = vmul.bf16 1069105081, %v8264_v19  ;;  %v9619_v14 = vld [vmem:[#allocation66_spill] sm:$0xff] }
 0x45d   : > { %v3789_v45 = vadd.f32 %v3788_v32, %v3787_v59  ;;  %v3519_v4 = vrot.slane %v3518_v57, 2  ;;  %v3855_v34 = vrot.slane %v3854_v37, 4  ;;  %v3070_v33 = vmul.f32 %v3054_v35, %v9613_v24 }
 0x45e   : > { %9612 = vst [vmem:[#allocation24_spill] sm:$0xff] %v8306_v61  ;;  %v8315_v13 = vadd.f32 %v3853_v38, %v8110_v40  ;;  %v3071_v21 = vmul.f32 %v3055_v15, %v9614_v39  ;;  %v3185_v6 = vadd.f32 %v3055_v15, %v3054_v35  ;;  %v3402_v12 = vunpack.c.l.bf16 %v6498_v44 }
 0x45f   : > { %v8319_v22 = vadd.f32 %v3789_v45, %v8119_v53  ;;  %v8321_v19 = vadd.f32 %v3181_v31, %v3180_v8  ;;  %v8323_v63 = vadd.f32 %v3453_v26, %v3452_v36  ;;  %v8325_v32 = vadd.f32 %v3765_v49, %v3764_v2  ;;  %v9623_v8 = vld [vmem:[#allocation83_spill] sm:$0xff]  ;;  %v8337_v49 = vpop.permute.xlu1 %3946  ;;  %v9624_v2 = vld [vmem:[#allocation68_spill] sm:$0xff]  ;;  %v9625_v26 = vld [vmem:[#allocation85_spill] sm:$0xff] }
 0x460   : > { %v8327_v59 = vadd.f32 %v3519_v4, %v3518_v57  ;;  %v3186_v5 = vrot.slane %v3185_v6, 4  ;;  %v3403_v20 = vunpack.c.h.bf16 %v6498_v44  ;;  %v3418_v40 = vmul.f32 %v3402_v12, %v9619_v14  ;;  %v9642_v4 = vld [vmem:[#allocation63_spill] sm:$0xff] }
 0x461   : > { %9615 = vst [vmem:[#allocation20_spill] sm:$0xff] %v8321_v19  ;;  %9616 = vst [vmem:[#allocation49_spill] sm:$0xff] %v8323_v63  ;;  %v8330_v38 = vadd.f32 %v3855_v34, %v3854_v37  ;;  %v3750_v24 = vunpack.c.l.bf16 %v6500_v60  ;;  %v3751_v35 = vunpack.c.h.bf16 %v6500_v60  ;;  %6501 = vpow.bf16 %v4073_v46  ;;  %v8349_v46 = vpop.permute.xlu0 %4278 }
 0x462   : > { %9617 = vst [vmem:[#allocation34_spill] sm:$0xff] %v8325_v32  ;;  %9618 = vst [vmem:[#allocation54_spill] sm:$0xff] %v8327_v59  ;;  %v8332_v15 = vadd.f32 %v3071_v21, %v3070_v33  ;;  %v8334_v53 = vadd.f32 %v3186_v5, %v3185_v6  ;;  %v3419_v36 = vmul.f32 %v3403_v20, %v9623_v8 }
 0x463   : > { %9620 = vst [vmem:[#allocation71_spill] sm:$0xff] %v8330_v38  ;;  %v3523_v31 = vadd.f32 %v3403_v20, %v3402_v12  ;;  %v3766_v57 = vmul.f32 %v3750_v24, %v9624_v2  ;;  %v3767_v44 = vmul.f32 %v3751_v35, %v9625_v26  ;;  %v8341_v45 = vadd.f32 %v3751_v35, %v3750_v24  ;;  %v8377_v26 = vpop.permute.xlu1 %4282  ;;  %v9640_v20 = vld [vmem:[#allocation87_spill] sm:$0xff] }
 0x464   : > { %9621 = vst [vmem:[#allocation36_spill] sm:$0xff] %v8332_v15  ;;  %9622 = vst [vmem:[#allocation125_spill] sm:$0xff] %v8334_v53  ;;  %v9626_v37 = vsub.f32 %v8215_v23, %v7577_v54  ;;  %v9627_v33 = vsub.f32 %v8256_v7, %v7577_v54  ;;  %v8352_v34 = vadd.f32 %v3419_v36, %v3418_v40 }
 0x465   : > { %v3524_v39 = vrot.slane %v3523_v31, 4  ;;  %v3341_v21 = vmul.f32 %v8125_v18, %v7570_v56  ;;  %v8357_v12 = vadd.f32 %v3767_v44, %v3766_v57  ;;  %v3342_v23 = vmul.f32 %v8135_v29, %v7580_v10 }
 0x466   : > { %v4065_v60 = vpack.c.bf16 %v9627_v33, %v9626_v37  ;;  %9628 = vst [vmem:[#allocation39_spill] sm:$0xff] %v8352_v34  ;;  %v3689_v40 = vmul.f32 %v8145_v16, %v7558_v58  ;;  %v3862_v18 = vrot.slane %v8341_v45, 4  ;;  %v9631_v29 = vsub.f32 %v8234_v42, %v7604_v27  ;;  %v8386_v42 = vpop.permute.xlu0 %3614 }
 0x467   : > { %9629 = vst [vmem:[#allocation118_spill] sm:$0xff] %v8357_v12  ;;  %v3357_v14 = vsub.f32 %v3341_v21, %v7604_v27  ;;  %v3358_v35 = vsub.f32 %v3342_v23, %v9526_v41  ;;  %v8369_v8 = vadd.f32 %v3524_v39, %v3523_v31  ;;  %v3690_v57 = vmul.f32 %v8162_v17, %v9491_v50 }
 0x468   : > { %v4076_v5 = vmul.bf16 1069105081, %v4065_v60  ;;  %v3705_v2 = vsub.f32 %v3689_v40, %v9490_v48  ;;  %v4037_v44 = vmul.f32 %v8175_v0, %v7498_v62  ;;  %v4038_v31 = vmul.f32 %v8190_v9, %v7515_v47  ;;  %v9633_v40 = vld [vmem:[#allocation112_spill] sm:$0xff] }
 0x469   : > { %9630 = vst [vmem:[#allocation56_spill] sm:$0xff] %v8369_v8  ;;  %v3366_v36 = vpack.c.bf16 %v3357_v14, %v9631_v29  ;;  %v3343_v37 = vmul.f32 %v8203_v3, %v7580_v10  ;;  %v9632_v60 = vsub.f32 %v8245_v30, %v9490_v48  ;;  %v3706_v39 = vsub.f32 %v3690_v57, %v9528_v52  ;;  %v9634_v29 = vld [vmem:[#allocation120_spill] sm:$0xff] }
 0x46a   : > { %6503 = vpow.bf16 %v4076_v5  ;;  %v4384_v21 = vmul.f32 %v8217_v1, %v9530_v28  ;;  %v4053_v0 = vsub.f32 %v4037_v44, %v7511_v51  ;;  %v4054_v5 = vsub.f32 %v4038_v31, %v9529_v25 }
 0x46b   : > { %v3387_v33 = vmul.bf16 1069105081, %v3366_v36  ;;  %v3716_v17 = vpack.c.bf16 %v3705_v2, %v9632_v60  ;;  %v3359_v9 = vsub.f32 %v3343_v37, %v9526_v41  ;;  %v3691_v3 = vmul.f32 %v8223_v55, %v9491_v50  ;;  %v9635_v36 = vld [vmem:[#allocation44_spill] sm:$0xff]  ;;  %v9636_v60 = vld [vmem:[#allocation25_spill] sm:$0xff] }
 0x46c   : > { %v6502_v23 = vpop.eup %6501  ;;  %v4400_v30 = vsub.f32 %v4384_v21, %v9633_v40  ;;  %v8402_v2 = vmul.f32 %v9635_v36, %v9634_v29  ;;  %v9637_v44 = vsub.f32 %v9636_v60, %v7511_v51  ;;  %v8412_v21 = vpop.permute.xlu1 %4610  ;;  %v9639_v36 = vld [vmem:[#allocation70_spill] sm:$0xff] }
 0x46d   : > { %6505 = vpow.bf16 %v3387_v33  ;;  %v3733_v14 = vmul.bf16 1069105081, %v3716_v17  ;;  %v4096_v57 = vunpack.c.l.bf16 %v6502_v23  ;;  %v4097_v1 = vunpack.c.h.bf16 %v6502_v23  ;;  %v9638_v33 = vld [vmem:[#allocation61_spill] sm:$0xff]  ;;  %v8416_v60 = vpop.permute.xlu0 %3950 }
 0x46e   : > { %v4066_v31 = vpack.c.bf16 %v4053_v0, %v9637_v44  ;;  %v3367_v16 = vpack.c.bf16 %v3359_v9, %v3358_v35  ;;  %v3707_v37 = vsub.f32 %v3691_v3, %v9528_v52  ;;  %v4039_v17 = vmul.f32 %v9638_v33, %v7515_v47  ;;  %v9641_v3 = vld [vmem:[#allocation46_spill] sm:$0xff] }
 0x46f   : > { %6507 = vpow.bf16 %v3733_v14  ;;  %v4112_v24 = vmul.f32 %v4096_v57, %v9639_v36  ;;  %v4113_v23 = vmul.f32 %v4097_v1, %v9640_v20  ;;  %v4192_v7 = vadd.f32 %v4097_v1, %v4096_v57 }
 0x470   : > { %v4079_v6 = vmul.bf16 1069105081, %v4066_v31  ;;  %v3390_v35 = vmul.bf16 1069105081, %v3367_v16  ;;  %v3717_v0 = vpack.c.bf16 %v3707_v37, %v3706_v39  ;;  %v4055_v9 = vsub.f32 %v4039_v17, %v9529_v25  ;;  %v9646_v16 = vld [vmem:[#allocation89_spill] sm:$0xff] }
 0x471   : > { %v8421_v14 = vmul.f32 %v9641_v3, %v7570_v56  ;;  %v4128_v44 = vadd.f32 %v4113_v23, %v4112_v24  ;;  %v4193_v33 = vrot.slane %v4192_v7, 4  ;;  %v4385_v36 = vmul.f32 %v9642_v4, %v9530_v28  ;;  %v9644_v23 = vld [vmem:[#allocation22_spill] sm:$0xff] }
 0x472   : > { %6509 = vpow.bf16 %v4079_v6  ;;  %v3736_v20 = vmul.bf16 1069105081, %v3717_v0  ;;  %v4067_v57 = vpack.c.bf16 %v4055_v9, %v4054_v5  ;;  %v8428_v17 = vadd.f32 %v3862_v18, %v8341_v45  ;;  %v9645_v9 = vld [vmem:[#allocation72_spill] sm:$0xff]  ;;  %v9648_v18 = vld [vmem:[#allocation74_spill] sm:$0xff] }
 0x473   : > { %6511 = vpow.bf16 %v3390_v35  ;;  %v4129_v39 = vrot.slane %v4128_v44, 4  ;;  %v4194_v1 = vadd.f32 %v4193_v33, %v4192_v7  ;;  %v4401_v6 = vsub.f32 %v4385_v36, %v9633_v40  ;;  %v8435_v35 = vpop.permute.xlu1 %4618  ;;  %v8439_v33 = vpop.permute.xlu0 %4286 }
 0x474   : > { %9643 = vst [vmem:[#allocation73_spill] sm:$0xff] %v8428_v17  ;;  %v4082_v24 = vmul.bf16 1069105081, %v4067_v57  ;;  %v8433_v4 = vmul.f32 %v9644_v23, %v7558_v58  ;;  %6513 = vpow.bf16 %v3736_v20 }
 0x475   : > { %v6504_v55 = vpop.eup %6503  ;;  %v4130_v5 = vadd.f32 %v4129_v39, %v4128_v44  ;;  %v4195_v0 = vrot.slane %v4194_v1, 2  ;;  %v8441_v45 = vpack.c.bf16 %v4401_v6, %v4400_v30  ;;  %v9647_v44 = vld [vmem:[#allocation48_spill] sm:$0xff] }
 0x476   : > { %v4098_v31 = vunpack.c.l.bf16 %v6504_v55  ;;  %v4099_v37 = vunpack.c.h.bf16 %v6504_v55  ;;  %v8447_v39 = vmul.f32 %v9647_v44, %v9634_v29  ;;  %6515 = vpow.bf16 %v4082_v24 }
 0x477   : > { %v4131_v57 = vrot.slane %v4130_v5, 2  ;;  %v4196_v23 = vadd.f32 %v4195_v0, %v4194_v1  ;;  %v9649_v1 = vld [vmem:[#allocation91_spill] sm:$0xff]  ;;  %v8455_v24 = vpop.permute.xlu0 %4614 }
 0x478   : > { %v4114_v3 = vmul.f32 %v4098_v31, %v9645_v9  ;;  %v4115_v7 = vmul.f32 %v4099_v37, %v9646_v16  ;;  %v4199_v55 = vadd.f32 %v4099_v37, %v4098_v31  ;;  %v6506_v36 = vpop.eup %6505  ;;  %9651 = vst [vmem:[#allocation75_spill] sm:$0xff] %v8455_v24 }
 0x479   : > { %v3404_v63 = vunpack.c.l.bf16 %v6506_v36  ;;  %v3405_v16 = vunpack.c.h.bf16 %v6506_v36  ;;  %v4132_v31 = vadd.f32 %v4131_v57, %v4130_v5  ;;  %v4197_v20 = vrot.slane %v4196_v23, 1 }
 0x47a   : > { %v4135_v59 = vadd.f32 %v4115_v7, %v4114_v3  ;;  %v4200_v9 = vrot.slane %v4199_v55, 4  ;;  %v6508_v19 = vpop.eup %6507  ;;  %v8453_v7 = vpop.permute.xlu1 %3954 }
 0x47b   : > { %v3420_v61 = vmul.f32 %v3404_v63, %v9648_v18  ;;  %v3421_v0 = vmul.f32 %v3405_v16, %v9649_v1  ;;  %v3530_v3 = vadd.f32 %v3405_v16, %v3404_v63  ;;  %9650 = vst [vmem:[#allocation58_spill] sm:$0xff] %v8453_v7  ;;  %v4133_v44 = vrot.slane %v4132_v31, 1  ;;  %v9652_v18 = vld [vmem:[#allocation65_spill] sm:$0xff]  ;;  %v9654_v16 = vld [vmem:[#allocation76_spill] sm:$0xff]  ;;  %v9657_v7 = vld [vmem:[#allocation67_spill] sm:$0xff] }
 0x47c   : > { %v4136_v30 = vrot.slane %v4135_v59, 4  ;;  %v4201_v6 = vadd.f32 %v4200_v9, %v4199_v55  ;;  %v4198_v12 = vadd.f32 %v4197_v20, %v4196_v23  ;;  %v3752_v36 = vunpack.c.l.bf16 %v6508_v19 }
 0x47d   : > { %v6510_v5 = vpop.eup %6509  ;;  %v3531_v15 = vrot.slane %v3530_v3, 4  ;;  %v3753_v37 = vunpack.c.h.bf16 %v6508_v19  ;;  %v4134_v9 = vadd.f32 %v4133_v44, %v4132_v31  ;;  %v8463_v20 = vadd.f32 %v3421_v0, %v3420_v61 }
 0x47e   : > { %v4137_v34 = vadd.f32 %v4136_v30, %v4135_v59  ;;  %v4202_v53 = vrot.slane %v4201_v6, 2  ;;  %v6512_v55 = vpop.eup %6511  ;;  %v8459_v38 = vadd.f32 %v4198_v12, %v9652_v18  ;;  %v3768_v1 = vmul.f32 %v3752_v36, %v9654_v16  ;;  %v9656_v30 = vld [vmem:[#allocation93_spill] sm:$0xff]  ;;  %v8472_v16 = vpop.permute.xlu1 %4290 }
 0x47f   : > { %9655 = vst [vmem:[#allocation60_spill] sm:$0xff] %v8463_v20  ;;  %v3769_v32 = vmul.f32 %v3753_v37, %v9656_v30  ;;  %v8467_v57 = vadd.f32 %v4134_v9, %v9657_v7  ;;  %v3868_v19 = vadd.f32 %v3753_v37, %v3752_v36  ;;  %v4100_v24 = vunpack.c.l.bf16 %v6510_v5  ;;  %v6514_v23 = vpop.eup %6513  ;;  %v8476_v30 = vpop.permute.xlu0 %4622  ;;  %v9662_v36 = vld [vmem:[#allocation95_spill] sm:$0xff] }
 0x480   : > { %9653 = vst [vmem:[#allocation124_spill] sm:$0xff] %v8459_v38  ;;  %v4138_v63 = vrot.slane %v4137_v34, 2  ;;  %v4203_v59 = vadd.f32 %v4202_v53, %v4201_v6  ;;  %v8469_v44 = vadd.f32 %v3531_v15, %v3530_v3  ;;  %v4101_v12 = vunpack.c.h.bf16 %v6510_v5 }
 0x481   : > { %9658 = vst [vmem:[#allocation77_spill] sm:$0xff] %v8467_v57  ;;  %v4425_v18 = vmul.bf16 1069105081, %v8441_v45  ;;  %v8474_v61 = vadd.f32 %v3769_v32, %v3768_v1  ;;  %v3869_v6 = vrot.slane %v3868_v19, 4  ;;  %v3406_v0 = vunpack.c.l.bf16 %v6512_v55  ;;  %v6516_v3 = vpop.eup %6515 }
 0x482   : > { %v4139_v8 = vadd.f32 %v4138_v63, %v4137_v34  ;;  %v4204_v31 = vrot.slane %v4203_v59, 1  ;;  %9659 = vst [vmem:[#allocation62_spill] sm:$0xff] %v8469_v44  ;;  %v9661_v34 = vld [vmem:[#allocation78_spill] sm:$0xff]  ;;  %v4117_v9 = vmul.f32 %v4101_v12, %v9662_v36  ;;  %v4206_v15 = vadd.f32 %v4101_v12, %v4100_v24 }
 0x483   : > { %9660 = vst [vmem:[#allocation79_spill] sm:$0xff] %v8474_v61  ;;  %v4116_v37 = vmul.f32 %v4100_v24, %v9661_v34  ;;  %v8481_v63 = vadd.f32 %v3869_v6, %v3868_v19  ;;  %v3407_v17 = vunpack.c.h.bf16 %v6512_v55  ;;  %v3754_v38 = vunpack.c.l.bf16 %v6514_v23  ;;  %v9665_v24 = vld [vmem:[#allocation97_spill] sm:$0xff]  ;;  %v9673_v61 = vld [vmem:[#allocation52_spill] sm:$0xff] }
 0x484   : > { %v4140_v53 = vrot.slane %v4139_v8, 1  ;;  %v4205_v7 = vadd.f32 %v4204_v31, %v4203_v59  ;;  %v4207_v57 = vrot.slane %v4206_v15, 4  ;;  %v9664_v31 = vld [vmem:[#allocation80_spill] sm:$0xff]  ;;  %v3755_v55 = vunpack.c.h.bf16 %v6514_v23 }
 0x485   : > { %9663 = vst [vmem:[#allocation64_spill] sm:$0xff] %v8481_v63  ;;  %v3422_v34 = vmul.f32 %v3406_v0, %v9664_v31  ;;  %v3423_v12 = vmul.f32 %v3407_v17, %v9665_v24  ;;  %v8493_v19 = vadd.f32 %v4117_v9, %v4116_v37  ;;  %v4102_v6 = vunpack.c.l.bf16 %v6516_v3  ;;  %v9666_v31 = vld [vmem:[#allocation82_spill] sm:$0xff]  ;;  %v9672_v63 = vld [vmem:[#allocation101_spill] sm:$0xff] }
 0x486   : > { %v4141_v5 = vadd.f32 %v4140_v53, %v4139_v8  ;;  %v8484_v32 = vadd.f32 %v4205_v7, %v8315_v13  ;;  %v3537_v8 = vadd.f32 %v3407_v17, %v3406_v0  ;;  %v8495_v13 = vpop.permute.xlu1 %4626  ;;  %v8498_v36 = vadd.f32 %v4207_v57, %v4206_v15  ;;  %v9669_v7 = vld [vmem:[#allocation99_spill] sm:$0xff]  ;;  %v9671_v53 = vld [vmem:[#allocation84_spill] sm:$0xff] }
 0x487   : > { %v4103_v1 = vunpack.c.h.bf16 %v6516_v3  ;;  %6517 = vpow.bf16 %v4425_v18  ;;  %v3770_v24 = vmul.f32 %v3754_v38, %v9666_v31  ;;  %v3875_v17 = vadd.f32 %v3755_v55, %v3754_v38  ;;  %v9670_v18 = vld [vmem:[#allocation50_spill] sm:$0xff] }
 0x488   : > { %v8488_v59 = vadd.f32 %v4141_v5, %v8319_v22  ;;  %v8500_v22 = vpop.permute.xlu0 %3958  ;;  %v3538_v5 = vrot.slane %v3537_v8, 4  ;;  %v9667_v0 = vsub.f32 %v8402_v2, %v7577_v54  ;;  %v9668_v23 = vsub.f32 %v8447_v39, %v7577_v54 }
 0x489   : > { %v8509_v9 = vadd.f32 %v3423_v12, %v3422_v34  ;;  %v3771_v57 = vmul.f32 %v3755_v55, %v9669_v7  ;;  %v4213_v15 = vadd.f32 %v4103_v1, %v4102_v6  ;;  %v4388_v3 = vmul.f32 %v9670_v18, %v7498_v62 }
 0x48a   : > { %v4417_v37 = vpack.c.bf16 %v9668_v23, %v9667_v0  ;;  %v4118_v45 = vmul.f32 %v4102_v6, %v9671_v53  ;;  %v4119_v31 = vmul.f32 %v4103_v1, %v9672_v63  ;;  %v3693_v2 = vmul.f32 %v9673_v61, %v7570_v56  ;;  %v8526_v63 = vpop.permute.xlu1 %3962 }
 0x48b   : > { %v3876_v44 = vrot.slane %v3875_v17, 4  ;;  %v4214_v20 = vrot.slane %v4213_v15, 4  ;;  %v4404_v39 = vsub.f32 %v4388_v3, %v7511_v51  ;;  %v3694_v34 = vmul.f32 %v8309_v43, %v7580_v10 }
 0x48c   : > { %v4428_v38 = vmul.bf16 1069105081, %v4417_v37  ;;  %v8521_v12 = vadd.f32 %v3538_v5, %v3537_v8  ;;  %v3709_v55 = vsub.f32 %v3693_v2, %v7604_v27  ;;  %v4041_v53 = vmul.f32 %v8312_v11, %v7558_v58  ;;  %v8535_v8 = vpop.permute.xlu0 %4294 }
 0x48d   : > { %v8528_v1 = vadd.f32 %v3771_v57, %v3770_v24  ;;  %v3710_v61 = vsub.f32 %v3694_v34, %v9526_v41  ;;  %v4042_v6 = vmul.f32 %v8337_v49, %v9491_v50  ;;  %v4389_v43 = vmul.f32 %v8349_v46, %v7498_v62 }
 0x48e   : > { %9674 = vst [vmem:[#allocation81_spill] sm:$0xff] %v8521_v12  ;;  %6519 = vpow.bf16 %v4428_v38  ;;  %v8537_v7 = vadd.f32 %v4119_v31, %v4118_v45  ;;  %v9677_v5 = vsub.f32 %v8421_v14, %v7604_v27  ;;  %v4057_v0 = vsub.f32 %v4041_v53, %v9490_v48  ;;  %v8564_v38 = vpop.permute.xlu1 %4298 }
 0x48f   : > { %9675 = vst [vmem:[#allocation66_spill] sm:$0xff] %v8528_v1  ;;  %v3695_v24 = vmul.f32 %v8386_v42, %v7580_v10  ;;  %v8545_v23 = vadd.f32 %v3876_v44, %v3875_v17  ;;  %v8547_v37 = vadd.f32 %v4214_v20, %v4213_v15  ;;  %v4405_v49 = vsub.f32 %v4389_v43, %v7511_v51  ;;  %v9681_v43 = vld [vmem:[#allocation86_spill] sm:$0xff] }
 0x490   : > { %9676 = vst [vmem:[#allocation83_spill] sm:$0xff] %v8537_v7  ;;  %v3718_v11 = vpack.c.bf16 %v3709_v55, %v9677_v5  ;;  %v4043_v46 = vmul.f32 %v8416_v60, %v9491_v50  ;;  %v9680_v57 = vsub.f32 %v8433_v4, %v9490_v48  ;;  %v4390_v18 = vmul.f32 %v8377_v26, %v7515_v47  ;;  %v8566_v53 = vpop.permute.xlu0 %4630 }
 0x491   : > { %9678 = vst [vmem:[#allocation68_spill] sm:$0xff] %v8545_v23  ;;  %9679 = vst [vmem:[#allocation85_spill] sm:$0xff] %v8547_v37  ;;  %v3711_v3 = vsub.f32 %v3695_v24, %v9526_v41  ;;  %v4058_v42 = vsub.f32 %v4042_v6, %v9528_v52  ;;  %v4418_v44 = vpack.c.bf16 %v4405_v49, %v4404_v39  ;;  %v9691_v23 = vld [vmem:[#allocation109_spill] sm:$0xff] }
 0x492   : > { %v3739_v45 = vmul.bf16 1069105081, %v3718_v11  ;;  %v4068_v14 = vpack.c.bf16 %v4057_v0, %v9680_v57  ;;  %v4736_v20 = vmul.f32 %v8412_v21, %v9530_v28  ;;  %v4059_v17 = vsub.f32 %v4043_v46, %v9528_v52  ;;  %v6518_v15 = vpop.eup %6517 }
 0x493   : > { %v3719_v31 = vpack.c.bf16 %v3711_v3, %v3710_v61  ;;  %v4391_v4 = vmul.f32 %v8439_v33, %v7515_v47  ;;  %v4448_v26 = vunpack.c.l.bf16 %v6518_v15  ;;  %v4449_v2 = vunpack.c.h.bf16 %v6518_v15  ;;  %v9682_v61 = vld [vmem:[#allocation103_spill] sm:$0xff]  ;;  %v9684_v15 = vld [vmem:[#allocation58_spill] sm:$0xff] }
 0x494   : > { %6521 = vpow.bf16 %v3739_v45  ;;  %v4085_v60 = vmul.bf16 1069105081, %v4068_v14  ;;  %v4431_v34 = vmul.bf16 1069105081, %v4418_v44  ;;  %v4069_v55 = vpack.c.bf16 %v4059_v17, %v4058_v42 }
 0x495   : > { %v4406_v21 = vsub.f32 %v4390_v18, %v9529_v25  ;;  %v3742_v39 = vmul.bf16 1069105081, %v3719_v31  ;;  %v4407_v6 = vsub.f32 %v4391_v4, %v9529_v25  ;;  %v4464_v5 = vmul.f32 %v4448_v26, %v9681_v43  ;;  %v9683_v18 = vld [vmem:[#allocation75_spill] sm:$0xff] }
 0x496   : > { %6523 = vpow.bf16 %v4085_v60  ;;  %v4465_v11 = vmul.f32 %v4449_v2, %v9682_v61  ;;  %v4544_v0 = vadd.f32 %v4449_v2, %v4448_v26  ;;  %v4752_v33 = vsub.f32 %v4736_v20, %v9633_v40  ;;  %v8583_v20 = vpop.permute.xlu1 %4634  ;;  %v8590_v2 = vpop.permute.xlu0 %3966 }
 0x497   : > { %6525 = vpow.bf16 %v4431_v34  ;;  %v8575_v24 = vmul.f32 %v8435_v35, %v9634_v29  ;;  %v4419_v49 = vpack.c.bf16 %v4407_v6, %v4406_v21  ;;  %v4088_v14 = vmul.bf16 1069105081, %v4069_v55  ;;  %v9686_v55 = vld [vmem:[#allocation105_spill] sm:$0xff]  ;;  %v9689_v6 = vld [vmem:[#allocation124_spill] sm:$0xff] }
 0x498   : > { %6527 = vpow.bf16 %v3742_v39  ;;  %v4480_v45 = vadd.f32 %v4465_v11, %v4464_v5  ;;  %v4545_v57 = vrot.slane %v4544_v0, 4  ;;  %v4737_v3 = vmul.f32 %v9683_v18, %v9530_v28  ;;  %v9685_v28 = vld [vmem:[#allocation88_spill] sm:$0xff] }
 0x499   : > { %v6520_v46 = vpop.eup %6519  ;;  %v4434_v17 = vmul.bf16 1069105081, %v4419_v49  ;;  %v8581_v60 = vmul.f32 %v9684_v15, %v7570_v56  ;;  %v8588_v26 = vmul.f32 %v8472_v16, %v7558_v58  ;;  %6529 = vpow.bf16 %v4088_v14 }
 0x49a   : > { %v4450_v42 = vunpack.c.l.bf16 %v6520_v46  ;;  %v4451_v44 = vunpack.c.h.bf16 %v6520_v46  ;;  %v4481_v31 = vrot.slane %v4480_v45, 4  ;;  %v4546_v35 = vadd.f32 %v4545_v57, %v4544_v0  ;;  %v8600_v15 = vpop.permute.xlu1 %4306 }
 0x49b   : > { %v4753_v4 = vsub.f32 %v4737_v3, %v9633_v40  ;;  %6531 = vpow.bf16 %v4434_v17  ;;  %v8604_v17 = vmul.f32 %v8476_v30, %v9634_v29  ;;  %v9688_v29 = vld [vmem:[#allocation107_spill] sm:$0xff] }
 0x49c   : > { %v4466_v34 = vmul.f32 %v4450_v42, %v9685_v28  ;;  %v4467_v21 = vmul.f32 %v4451_v44, %v9686_v55  ;;  %v4551_v39 = vadd.f32 %v4451_v44, %v4450_v42  ;;  %v4482_v43 = vadd.f32 %v4481_v31, %v4480_v45  ;;  %v9687_v55 = vld [vmem:[#allocation90_spill] sm:$0xff] }
 0x49d   : > { %v4547_v5 = vrot.slane %v4546_v35, 2  ;;  %v4768_v61 = vpack.c.bf16 %v4753_v4, %v4752_v33  ;;  %v8606_v4 = vpop.permute.xlu0 %4302 }
 0x49e   : > { %v4487_v11 = vadd.f32 %v4467_v21, %v4466_v34  ;;  %v4552_v40 = vrot.slane %v4551_v39, 4  ;;  %v4483_v49 = vrot.slane %v4482_v43, 2 }
 0x49f   : > { %v6522_v0 = vpop.eup %6521  ;;  %v4548_v46 = vadd.f32 %v4547_v5, %v4546_v35  ;;  %v4777_v57 = vmul.bf16 1069105081, %v4768_v61 }
 0x4a0   : > { %v4488_v3 = vrot.slane %v4487_v11, 4  ;;  %v4553_v42 = vadd.f32 %v4552_v40, %v4551_v39  ;;  %v3756_v44 = vunpack.c.l.bf16 %v6522_v0  ;;  %v3757_v45 = vunpack.c.h.bf16 %v6522_v0 }
 0x4a1   : > { %v6524_v33 = vpop.eup %6523  ;;  %v4484_v14 = vadd.f32 %v4483_v49, %v4482_v43  ;;  %v4549_v31 = vrot.slane %v4548_v46, 1  ;;  %6533 = vpow.bf16 %v4777_v57  ;;  %v8611_v39 = vmul.f32 %v8495_v13, %v7498_v62 }
 0x4a2   : > { %v6526_v35 = vpop.eup %6525  ;;  %v4489_v28 = vadd.f32 %v4488_v3, %v4487_v11  ;;  %v4554_v34 = vrot.slane %v4553_v42, 2  ;;  %v3772_v21 = vmul.f32 %v3756_v44, %v9687_v55  ;;  %v3882_v40 = vadd.f32 %v3757_v45, %v3756_v44  ;;  %v9690_v55 = vld [vmem:[#allocation92_spill] sm:$0xff]  ;;  %v9692_v44 = vld [vmem:[#allocation77_spill] sm:$0xff] }
 0x4a3   : > { %v6528_v5 = vpop.eup %6527  ;;  %v4485_v61 = vrot.slane %v4484_v14, 1  ;;  %v4550_v43 = vadd.f32 %v4549_v31, %v4548_v46  ;;  %v4104_v0 = vunpack.c.l.bf16 %v6524_v33  ;;  %v3773_v30 = vmul.f32 %v3757_v45, %v9688_v29  ;;  %v8619_v46 = vpop.permute.xlu1 %4642 }
 0x4a4   : > { %v4490_v49 = vrot.slane %v4489_v28, 2  ;;  %v4555_v57 = vadd.f32 %v4554_v34, %v4553_v42  ;;  %v4105_v18 = vunpack.c.h.bf16 %v6524_v33  ;;  %v3883_v3 = vrot.slane %v3882_v40, 4 }
 0x4a5   : > { %v4486_v16 = vadd.f32 %v4485_v61, %v4484_v14  ;;  %v8615_v11 = vadd.f32 %v4550_v43, %v9689_v6  ;;  %v4120_v37 = vmul.f32 %v4104_v0, %v9690_v55  ;;  %v4452_v42 = vunpack.c.l.bf16 %v6526_v35  ;;  %v8626_v6 = vpop.permute.xlu0 %4638  ;;  %v6530_v14 = vpop.eup %6529 }
 0x4a6   : > { %v4491_v7 = vadd.f32 %v4490_v49, %v4489_v28  ;;  %v4556_v13 = vrot.slane %v4555_v57, 1  ;;  %v4121_v1 = vmul.f32 %v4105_v18, %v9691_v23  ;;  %v4220_v12 = vadd.f32 %v4105_v18, %v4104_v0  ;;  %v6532_v18 = vpop.eup %6531 }
 0x4a7   : > { %v8622_v31 = vadd.f32 %v4486_v16, %v9692_v44  ;;  %v4453_v45 = vunpack.c.h.bf16 %v6526_v35  ;;  %v4045_v33 = vmul.f32 %v8500_v22, %v7570_v56  ;;  %v4755_v23 = vsub.f32 %v8604_v17, %v7577_v54  ;;  %v9697_v44 = vld [vmem:[#allocation111_spill] sm:$0xff] }
 0x4a8   : > { %v4492_v34 = vrot.slane %v4491_v7, 1  ;;  %v4557_v61 = vadd.f32 %v4556_v13, %v4555_v57  ;;  %v4221_v28 = vrot.slane %v4220_v12, 4  ;;  %v8630_v43 = vadd.f32 %v3773_v30, %v3772_v21  ;;  %v9696_v57 = vld [vmem:[#allocation94_spill] sm:$0xff] }
 0x4a9   : > { %v8632_v0 = vadd.f32 %v3883_v3, %v3882_v40  ;;  %v8634_v16 = vadd.f32 %v4453_v45, %v4452_v42  ;;  %v3758_v35 = vunpack.c.l.bf16 %v6528_v5  ;;  %v8639_v29 = vadd.f32 %v4121_v1, %v4120_v37  ;;  %v8654_v1 = vpop.permute.xlu1 %4314 }
 0x4aa   : > { %9693 = vst [vmem:[#allocation112_spill] sm:$0xff] %v8630_v43  ;;  %v4493_v49 = vadd.f32 %v4492_v34, %v4491_v7  ;;  %v8637_v22 = vadd.f32 %v4557_v61, %v8484_v32  ;;  %v3759_v55 = vunpack.c.h.bf16 %v6528_v5  ;;  %v8642_v13 = vmul.f32 %v4452_v42, %v9696_v57  ;;  %v9700_v5 = vld [vmem:[#allocation96_spill] sm:$0xff]  ;;  %v9701_v61 = vld [vmem:[#allocation113_spill] sm:$0xff] }
 0x4ab   : > { %9694 = vst [vmem:[#allocation120_spill] sm:$0xff] %v8632_v0  ;;  %9695 = vst [vmem:[#allocation44_spill] sm:$0xff] %v8639_v29  ;;  %v8645_v17 = vmul.f32 %v4453_v45, %v9697_v44  ;;  %v4106_v21 = vunpack.c.l.bf16 %v6530_v14  ;;  %v4107_v30 = vunpack.c.h.bf16 %v6530_v14  ;;  %v8650_v0 = vadd.f32 %v4221_v28, %v4220_v12  ;;  %v8662_v14 = vpop.permute.xlu0 %4310  ;;  %v9702_v12 = vld [vmem:[#allocation98_spill] sm:$0xff]  ;;  %v9710_v44 = vld [vmem:[#allocation115_spill] sm:$0xff] }
 0x4ac   : > { %v6534_v40 = vpop.eup %6533  ;;  %v8648_v3 = vadd.f32 %v4493_v49, %v8488_v59  ;;  %v8652_v7 = vadd.f32 %v3759_v55, %v3758_v35  ;;  %v4454_v32 = vunpack.c.l.bf16 %v6532_v18  ;;  %v8658_v42 = vmul.f32 %v3758_v35, %v9700_v5  ;;  %v9705_v35 = vld [vmem:[#allocation100_spill] sm:$0xff] }
 0x4ad   : > { %9698 = vst [vmem:[#allocation25_spill] sm:$0xff] %v8650_v0  ;;  %v8660_v45 = vadd.f32 %v4107_v30, %v4106_v21  ;;  %v4455_v34 = vunpack.c.h.bf16 %v6532_v18  ;;  %v8665_v59 = vmul.f32 %v3759_v55, %v9701_v61  ;;  %v8668_v28 = vmul.f32 %v4106_v21, %v9702_v12  ;;  %v9704_v0 = vld [vmem:[#allocation114_spill] sm:$0xff]  ;;  %v9709_v21 = vld [vmem:[#allocation116_spill] sm:$0xff] }
 0x4ae   : > { %9699 = vst [vmem:[#allocation61_spill] sm:$0xff] %v8652_v7  ;;  %v4800_v49 = vunpack.c.l.bf16 %v6534_v40  ;;  %v4801_v57 = vunpack.c.h.bf16 %v6534_v40  ;;  %v8672_v37 = vmul.f32 %v4107_v30, %v9704_v0  ;;  %v8675_v5 = vmul.f32 %v4454_v32, %v9705_v35  ;;  %v9708_v55 = vld [vmem:[#allocation102_spill] sm:$0xff] }
 0x4af   : > { %9703 = vst [vmem:[#allocation70_spill] sm:$0xff] %v8668_v28  ;;  %v9707_v18 = vsub.f32 %v8575_v24, %v7577_v54  ;;  %v8680_v43 = vadd.f32 %v4455_v34, %v4454_v32  ;;  %v4228_v40 = vrot.slane %v8660_v45, 4  ;;  %v8686_v7 = vmul.f32 %v4455_v34, %v9710_v44 }
 0x4b0   : > { %9706 = vst [vmem:[#allocation87_spill] sm:$0xff] %v8675_v5  ;;  %v4816_v61 = vmul.f32 %v4800_v49, %v9708_v55  ;;  %v4817_v12 = vmul.f32 %v4801_v57, %v9709_v21  ;;  %v4896_v28 = vadd.f32 %v4801_v57, %v4800_v49  ;;  %v4061_v30 = vsub.f32 %v4045_v33, %v7604_v27 }
 0x4b1   : > { %v4769_v29 = vpack.c.bf16 %v4755_v23, %v9707_v18  ;;  %v4046_v54 = vmul.f32 %v8526_v63, %v7580_v10  ;;  %v4393_v24 = vmul.f32 %v8535_v8, %v7558_v58  ;;  %v4651_v23 = vpop.permute.xlu1 %4650  ;;  %v4756_v32 = vsub.f32 %v8611_v39, %v7511_v51 }
 0x4b2   : > { %v4832_v35 = vadd.f32 %v4817_v12, %v4816_v61  ;;  %v4897_v5 = vrot.slane %v4896_v28, 4  ;;  %v9711_v34 = vsub.f32 %v8581_v60, %v7604_v27  ;;  %v4741_v33 = vmul.f32 %v8566_v53, %v7498_v62 }
 0x4b3   : > { %v4780_v0 = vmul.bf16 1069105081, %v4769_v29  ;;  %v4647_v29 = vpop.permute.xlu0 %4646  ;;  %v4409_v18 = vsub.f32 %v4393_v24, %v9490_v48  ;;  %v4394_v55 = vmul.f32 %v8564_v38, %v9491_v50  ;;  %v4047_v60 = vmul.f32 %v8590_v2, %v7580_v10 }
 0x4b4   : > { %v4070_v49 = vpack.c.bf16 %v4061_v30, %v9711_v34  ;;  %v4833_v44 = vrot.slane %v4832_v35, 4  ;;  %v4898_v63 = vadd.f32 %v4897_v5, %v4896_v28  ;;  %v4757_v39 = vsub.f32 %v4741_v33, %v7511_v51 }
 0x4b5   : > { %6535 = vpow.bf16 %v4780_v0  ;;  %v4062_v62 = vsub.f32 %v4046_v54, %v9526_v41  ;;  %v9712_v53 = vsub.f32 %v8588_v26, %v9490_v48  ;;  %v4742_v5 = vmul.f32 %v8583_v20, %v7515_v47 }
 0x4b6   : > { %v4091_v8 = vmul.bf16 1069105081, %v4070_v49  ;;  %v4834_v61 = vadd.f32 %v4833_v44, %v4832_v35  ;;  %v4899_v21 = vrot.slane %v4898_v63, 2  ;;  %v4770_v28 = vpack.c.bf16 %v4757_v39, %v4756_v32  ;;  %v4659_v35 = vpop.permute.xlu1 %4658 }
 0x4b7   : > { %v4420_v12 = vpack.c.bf16 %v4409_v18, %v9712_v53  ;;  %v4063_v38 = vsub.f32 %v4047_v60, %v9526_v41  ;;  %v4396_v2 = vmul.f32 %v8600_v15, %v7570_v56  ;;  %v4395_v26 = vmul.f32 %v8606_v4, %v9491_v50  ;;  %v4319_v34 = vpop.permute.xlu0 %4318 }
 0x4b8   : > { %6537 = vpow.bf16 %v4091_v8  ;;  %v4835_v0 = vrot.slane %v4834_v61, 2  ;;  %v4900_v51 = vadd.f32 %v4899_v21, %v4898_v63  ;;  %v4783_v24 = vmul.bf16 1069105081, %v4770_v28 }
 0x4b9   : > { %v4437_v30 = vmul.bf16 1069105081, %v4420_v12  ;;  %v4071_v54 = vpack.c.bf16 %v4063_v38, %v4062_v62  ;;  %v4744_v32 = vmul.f32 %v8619_v46, %v7558_v58  ;;  %v4743_v33 = vmul.f32 %v8626_v6, %v7515_v47 }
 0x4ba   : > { %v4836_v49 = vadd.f32 %v4835_v0, %v4834_v61  ;;  %v4901_v20 = vrot.slane %v4900_v51, 1  ;;  %v4410_v44 = vsub.f32 %v4394_v55, %v9528_v52  ;;  %v4758_v15 = vsub.f32 %v4742_v5, %v9529_v25  ;;  %v4667_v53 = vpop.permute.xlu1 %4666 }
 0x4bb   : > { %6539 = vpow.bf16 %v4437_v30  ;;  %v4094_v63 = vmul.bf16 1069105081, %v4071_v54  ;;  %v4411_v18 = vsub.f32 %v4395_v26, %v9528_v52  ;;  %v4759_v4 = vsub.f32 %v4743_v33, %v9529_v25  ;;  %v4655_v5 = vpop.permute.xlu0 %4654 }
 0x4bc   : > { %v4837_v8 = vrot.slane %v4836_v49, 1  ;;  %v4902_v39 = vadd.f32 %v4901_v20, %v4900_v51  ;;  %v4398_v46 = vmul.f32 %v8654_v1, %v7580_v10  ;;  %6541 = vpow.bf16 %v4783_v24  ;;  %v9713_v51 = vld [vmem:[#allocation104_spill] sm:$0xff] }
 0x4bd   : > { %v4412_v60 = vsub.f32 %v4396_v2, %v7604_v27  ;;  %v4421_v61 = vpack.c.bf16 %v4411_v18, %v4410_v44  ;;  %v4397_v47 = vmul.f32 %v8662_v14, %v7570_v56  ;;  %6543 = vpow.bf16 %v4094_v63  ;;  %v9714_v2 = vld [vmem:[#allocation117_spill] sm:$0xff] }
 0x4be   : > { %v4952_v55 = vadd.f32 %v4902_v39, %v8615_v11  ;;  %v4760_v21 = vsub.f32 %v4744_v32, %v9490_v48  ;;  %v4771_v62 = vpack.c.bf16 %v4759_v4, %v4758_v15  ;;  %v8734_v38 = vadd.f32 %v4837_v8, %v4836_v49  ;;  %v4691_v8 = vpop.permute.xlu1 %4690 }
 0x4bf   : > { %v4440_v28 = vmul.bf16 1069105081, %v4421_v61  ;;  %v4413_v1 = vsub.f32 %v4397_v47, %v7604_v27  ;;  %v4414_v0 = vsub.f32 %v4398_v46, %v9526_v41  ;;  %v8738_v14 = vmul.f32 %v4651_v23, %v9491_v50 }
 0x4c0   : > { %v6536_v6 = vpop.eup %6535  ;;  %v4745_v11 = vmul.f32 %v4647_v29, %v7558_v58  ;;  %v4786_v26 = vmul.bf16 1069105081, %v4771_v62  ;;  %v4748_v49 = vmul.f32 %v4659_v35, %v7570_v56  ;;  %v4399_v29 = vmul.f32 %v4319_v34, %v7580_v10 }
 0x4c1   : > { %v4802_v12 = vunpack.c.l.bf16 %v6536_v6  ;;  %v4803_v25 = vunpack.c.h.bf16 %v6536_v6  ;;  %6545 = vpow.bf16 %v4440_v28  ;;  %v4422_v20 = vpack.c.bf16 %v4413_v1, %v4412_v60  ;;  %v9716_v28 = vld [vmem:[#allocation119_spill] sm:$0xff] }
 0x4c2   : > { %v4761_v33 = vsub.f32 %v4745_v11, %v9490_v48  ;;  %6547 = vrcp.f32 %v4952_v55  ;;  %v4762_v60 = vsub.f32 %v8738_v14, %v9528_v52  ;;  %v4663_v48 = vpop.permute.xlu0 %4662  ;;  %v4764_v6 = vsub.f32 %v4748_v49, %v7604_v27 }
 0x4c3   : > { %v4818_v30 = vmul.f32 %v4802_v12, %v9713_v51  ;;  %v4819_v24 = vmul.f32 %v4803_v25, %v9714_v2  ;;  %v4903_v54 = vadd.f32 %v4803_v25, %v4802_v12  ;;  %v6538_v32 = vpop.eup %6537  ;;  %v4443_v18 = vmul.bf16 1069105081, %v4422_v20  ;;  %v9718_v20 = vld [vmem:[#allocation121_spill] sm:$0xff] }
 0x4c4   : > { %v4108_v63 = vunpack.c.l.bf16 %v6538_v32  ;;  %v4109_v23 = vunpack.c.h.bf16 %v6538_v32  ;;  %v4772_v58 = vpack.c.bf16 %v4761_v33, %v4760_v21  ;;  %6549 = vpow.bf16 %v4786_v26  ;;  %v9715_v21 = vld [vmem:[#allocation106_spill] sm:$0xff]  ;;  %v9717_v26 = vld [vmem:[#allocation108_spill] sm:$0xff] }
 0x4c5   : > { %v4839_v44 = vadd.f32 %v4819_v24, %v4818_v30  ;;  %v4904_v15 = vrot.slane %v4903_v54, 4  ;;  %v4415_v34 = vsub.f32 %v4399_v29, %v9526_v41  ;;  %6551 = vpow.bf16 %v4443_v18 }
 0x4c6   : > { %v6540_v39 = vpop.eup %6539  ;;  %v8748_v61 = vadd.f32 %v4109_v23, %v4108_v63  ;;  %v8752_v12 = vmul.f32 %v4108_v63, %v9715_v21  ;;  %v8758_v1 = vmul.f32 %v4109_v23, %v9716_v28  ;;  %v4789_v11 = vmul.bf16 1069105081, %v4772_v58  ;;  %v4671_v29 = vpop.permute.xlu0 %4670 }
 0x4c7   : > { %v4840_v4 = vrot.slane %v4839_v44, 4  ;;  %v4905_v46 = vadd.f32 %v4904_v15, %v4903_v54  ;;  %v4456_v35 = vunpack.c.l.bf16 %v6540_v39  ;;  %v4457_v47 = vunpack.c.h.bf16 %v6540_v39  ;;  %v8755_v25 = vpop.eup %6541  ;;  %v4027_v15 = vpop.permute.xlu1 %4026 }
 0x4c8   : > { %v8762_v51 = vpop.eup %6543  ;;  %v4423_v54 = vpack.c.bf16 %v4415_v34, %v4414_v0  ;;  %v4750_v49 = vmul.f32 %v4667_v53, %v7580_v10  ;;  %v4749_v58 = vmul.f32 %v4663_v48, %v7570_v56  ;;  %6553 = vpow.bf16 %v4789_v11 }
 0x4c9   : > { %v4841_v55 = vadd.f32 %v4840_v4, %v4839_v44  ;;  %v4906_v62 = vrot.slane %v4905_v46, 2  ;;  %v8760_v14 = vadd.f32 %v4457_v47, %v4456_v35  ;;  %v8766_v32 = vmul.f32 %v4456_v35, %v9717_v26 }
 0x4ca   : > { %v8769_v33 = vmul.f32 %v4457_v47, %v9718_v20  ;;  %v4747_v44 = vmul.f32 %v4655_v5, %v9491_v50  ;;  %v4446_v18 = vmul.bf16 1069105081, %v4423_v54  ;;  %v4804_v4 = vunpack.c.l.bf16 %v8755_v25  ;;  %v9721_v54 = vld [vmem:[#allocation122_spill] sm:$0xff] }
 0x4cb   : > { %v4842_v30 = vrot.slane %v4841_v55, 2  ;;  %v4907_v2 = vadd.f32 %v4906_v62, %v4905_v46  ;;  %v4765_v50 = vsub.f32 %v4749_v58, %v7604_v27  ;;  %v4110_v5 = vunpack.c.l.bf16 %v8762_v51 }
 0x4cc   : > { %v4763_v0 = vsub.f32 %v4747_v44, %v9528_v52  ;;  %v8777_v46 = vpop.eup %6545  ;;  %v4766_v56 = vsub.f32 %v4750_v49, %v9526_v41  ;;  %v4751_v52 = vmul.f32 %v4671_v29, %v7580_v10  ;;  %6555 = vpow.bf16 %v4446_v18  ;;  %v9723_v44 = vld [vmem:[#allocation45_spill] sm:$0xff]  ;;  %v9725_v29 = vld [vmem:[#allocation38_spill] sm:$0xff] }
 0x4cd   : > { %v4843_v63 = vadd.f32 %v4842_v30, %v4841_v55  ;;  %v4908_v23 = vrot.slane %v4907_v2, 1  ;;  %v8781_v47 = vpop.eup %6547  ;;  %v8786_v55 = vmul.f32 %v4804_v4, %v4691_v8  ;;  %v4774_v21 = vpack.c.bf16 %v4765_v50, %v4764_v6  ;;  %v4363_v30 = vpop.permute.xlu1 %4362 }
 0x4ce   : > { %v4773_v48 = vpack.c.bf16 %v4763_v0, %v4762_v60  ;;  %v8792_v27 = vmul.f32 %v4110_v5, %v4027_v15  ;;  %v4767_v60 = vsub.f32 %v4751_v52, %v9526_v41  ;;  %v4458_v8 = vunpack.c.l.bf16 %v8777_v46  ;;  %v9728_v52 = vld [vmem:[#allocation55_spill] sm:$0xff] }
 0x4cf   : > { %v4844_v35 = vrot.slane %v4843_v63, 1  ;;  %v4909_v53 = vadd.f32 %v4908_v23, %v4907_v2  ;;  %v8794_v34 = vpop.eup %6549  ;;  %v4795_v10 = vmul.bf16 1069105081, %v4774_v21  ;;  %v9719_v2 = vld [vmem:[#allocation123_spill] sm:$0xff]  ;;  %v9722_v26 = vrot.slane %v9721_v54, 1 }
 0x4d0   : > { %v4792_v11 = vmul.bf16 1069105081, %v4773_v48  ;;  %v8806_v49 = vpack.c.bf16 %v4767_v60, %v4766_v56  ;;  %v3089_v15 = vrot.slane %v9723_v44, 2  ;;  %v8810_v23 = vpop.eup %6551  ;;  %v8814_v18 = vmul.f32 %v4458_v8, %v4363_v30 }
 0x4d1   : > { %v4953_v62 = vadd.f32 %v4909_v53, %v8637_v22  ;;  %v8796_v28 = vadd.f32 %v4844_v35, %v4843_v63  ;;  %v9720_v22 = vrot.slane %v9719_v2, 2  ;;  %v2804_v20 = vadd.f32 %v9722_v26, %v9721_v54  ;;  %v9724_v63 = vld [vmem:[#allocation32_spill] sm:$0xff] }
 0x4d2   : > { %v3155_v41 = vrot.slane %v9724_v63, 1  ;;  %v9726_v0 = vrot.slane %v9725_v29, 4  ;;  %v9727_v53 = vld [vmem:[#allocation128_spill] sm:$0xff]  ;;  %v3090_v56 = vadd.f32 %v3089_v15, %v9723_v44 }
 0x4d3   : > { %6557 = vrcp.f32 %v4953_v62  ;;  %v2738_v6 = vadd.f32 %v9720_v22, %v9719_v2  ;;  %v2842_v50 = vadd.f32 %v2804_v20, %v9727_v53  ;;  %v9729_v62 = vrot.slane %v9728_v52, 2  ;;  %v9732_v22 = vld [vmem:[#allocation71_spill] sm:$0xff] }
 0x4d4   : > { %6559 = vpow.bf16 %v4792_v11  ;;  %v3440_v35 = vadd.f32 %v9726_v0, %v9725_v29  ;;  %v3156_v48 = vadd.f32 %v3155_v41, %v9724_v63  ;;  %v9733_v54 = vrot.slane %v9732_v22, 2  ;;  %v8832_v63 = vpop.eup %6553  ;;  %v9734_v41 = vld [vmem:[#allocation127_spill] sm:$0xff] }
 0x4d5   : > { %6561 = vpow.bf16 %v4795_v10  ;;  %v2739_v58 = vrot.slane %v2738_v6, 1  ;;  %v3506_v21 = vadd.f32 %v9729_v62, %v9728_v52  ;;  %v9730_v10 = vld [vmem:[#allocation34_spill] sm:$0xff]  ;;  %v4798_v20 = vmul.bf16 1069105081, %v8806_v49 }
 0x4d6   : > { %v3441_v60 = vrot.slane %v3440_v35, 2  ;;  %v9731_v30 = vrot.slane %v9730_v10, 4  ;;  %v3858_v26 = vadd.f32 %v9733_v54, %v9732_v22  ;;  %v3091_v29 = vrot.slane %v3090_v56, 1 }
 0x4d7   : > { %v2740_v11 = vadd.f32 %v2739_v58, %v2738_v6  ;;  %v3194_v44 = vadd.f32 %v3156_v48, %v2842_v50  ;;  %v3507_v15 = vrot.slane %v3506_v21, 1  ;;  %v4494_v49 = vadd.f32 %v8645_v17, %v8642_v13  ;;  %v8839_v50 = vpop.eup %6555 }
 0x4d8   : > { %v3792_v2 = vadd.f32 %v9731_v30, %v9730_v10  ;;  %v3442_v53 = vadd.f32 %v3441_v60, %v3440_v35  ;;  %v3859_v58 = vrot.slane %v3858_v26, 1  ;;  %v3092_v52 = vadd.f32 %v3091_v29, %v3090_v56 }
 0x4d9   : > { %v2778_v0 = vadd.f32 %v2740_v11, %v9734_v41  ;;  %v3508_v62 = vadd.f32 %v3507_v15, %v3506_v21  ;;  %v4143_v10 = vrot.slane %v8493_v19, 4  ;;  %v4209_v30 = vrot.slane %v8498_v36, 2  ;;  %v4695_v21 = vpop.permute.xlu0 %4694 }
 0x4da   : > { %v3793_v6 = vrot.slane %v3792_v2, 2  ;;  %v3443_v39 = vrot.slane %v3442_v53, 1  ;;  %v3860_v54 = vadd.f32 %v3859_v58, %v3858_v26  ;;  %v4495_v15 = vrot.slane %v4494_v49, 4 }
 0x4db   : > { %v3130_v48 = vadd.f32 %v3092_v52, %v2778_v0  ;;  %v3546_v24 = vadd.f32 %v3508_v62, %v3194_v44  ;;  %v4144_v35 = vadd.f32 %v4143_v10, %v8493_v19  ;;  %v4210_v11 = vadd.f32 %v4209_v30, %v8498_v36 }
 0x4dc   : > { %v3794_v22 = vadd.f32 %v3793_v6, %v3792_v2  ;;  %v3444_v60 = vadd.f32 %v3443_v39, %v3442_v53  ;;  %v9735_v2 = vrot.slane %v8634_v16, 4  ;;  %v4805_v0 = vunpack.c.h.bf16 %v8755_v25 }
 0x4dd   : > { %v6558_v56 = vpop.eup %6557  ;;  %v3898_v41 = vadd.f32 %v3860_v54, %v3546_v24  ;;  %v4145_v13 = vrot.slane %v4144_v35, 2  ;;  %v4211_v17 = vrot.slane %v4210_v11, 1  ;;  %v4496_v36 = vadd.f32 %v4495_v15, %v4494_v49 }
 0x4de   : > { %v3795_v29 = vrot.slane %v3794_v22, 1  ;;  %v4560_v26 = vadd.f32 %v9735_v2, %v8634_v16  ;;  %v3482_v19 = vadd.f32 %v3444_v60, %v3130_v48  ;;  %v4821_v62 = vmul.f32 %v4805_v0, %v4695_v21 }
 0x4df   : > { %v8847_v44 = vpop.eup %6559  ;;  %v4146_v39 = vadd.f32 %v4145_v13, %v4144_v35  ;;  %v4212_v53 = vadd.f32 %v4211_v17, %v4210_v11  ;;  %v4888_v16 = vadd.f32 %v8734_v38, %v8622_v31  ;;  %v4497_v24 = vrot.slane %v4496_v36, 2 }
 0x4e0   : > { %v3796_v6 = vadd.f32 %v3795_v29, %v3794_v22  ;;  %v4561_v58 = vrot.slane %v4560_v26, 2  ;;  %v8849_v52 = vpop.eup %6561  ;;  %v4889_v54 = vadd.f32 %v8796_v28, %v8648_v3  ;;  %v4846_v22 = vadd.f32 %v4821_v62, %v8786_v55 }
 0x4e1   : > { %v4147_v2 = vrot.slane %v4146_v39, 1  ;;  %v4250_v57 = vadd.f32 %v4212_v53, %v3898_v41  ;;  %v4910_v49 = vadd.f32 %v4805_v0, %v4804_v4  ;;  %v4498_v48 = vadd.f32 %v4497_v24, %v4496_v36  ;;  %v9738_v36 = vld [vmem:[#allocation35_spill] sm:$0xff]  ;;  %v9742_v24 = vld [vmem:[#allocation42_spill] sm:$0xff] }
 0x4e2   : > { %v3834_v10 = vadd.f32 %v3796_v6, %v3482_v19  ;;  %v4562_v30 = vadd.f32 %v4561_v58, %v4560_v26  ;;  %v4968_v11 = vmul.f32 %v8781_v47, %v4888_v16  ;;  %v4969_v21 = vmul.f32 %v6558_v56, %v4889_v54  ;;  %v9736_v56 = vld [vmem:[#allocation26_spill] sm:$0xff]  ;;  %v9740_v16 = vld [vmem:[#allocation40_spill] sm:$0xff] }
 0x4e3   : > { %6563 = vpow.bf16 %v4798_v20  ;;  %v4148_v31 = vadd.f32 %v4147_v2, %v4146_v39  ;;  %v4847_v38 = vrot.slane %v4846_v22, 4  ;;  %v4911_v60 = vrot.slane %v4910_v49, 4 }
 0x4e4   : > { %v4563_v35 = vrot.slane %v4562_v30, 1  ;;  %v4499_v29 = vrot.slane %v4498_v48, 1  ;;  %v4976_v26 = vpack.c.bf16 %v4968_v11, %v4968_v11  ;;  %v4977_v3 = vpack.c.bf16 %v4969_v21, %v4969_v21  ;;  %v9744_v21 = vld [vmem:[#allocation36_spill] sm:$0xff] }
 0x4e5   : > { %v4186_v28 = vadd.f32 %v4148_v31, %v3834_v10  ;;  %v4848_v41 = vadd.f32 %v4847_v38, %v4846_v22  ;;  %v4912_v13 = vadd.f32 %v4911_v60, %v4910_v49  ;;  %v4806_v55 = vunpack.c.l.bf16 %v8794_v34  ;;  %v9746_v60 = vld [vmem:[#allocation125_spill] sm:$0xff] }
 0x4e6   : > { %v4564_v15 = vadd.f32 %v4563_v35, %v4562_v30  ;;  %v4500_v25 = vadd.f32 %v4499_v29, %v4498_v48  ;;  %v5098_v17 = vunpack.c.l.b16 %v4976_v26  ;;  %v5099_v0 = vunpack.c.l.b16 %v4977_v3 }
 0x4e7   : > { %v4849_v19 = vrot.slane %v4848_v41, 2  ;;  %v4913_v47 = vrot.slane %v4912_v13, 2  ;;  %v9737_v20 = vrot.slane %v9736_v56, 4  ;;  %v9739_v58 = vrot.slane %v9738_v36, 2 }
 0x4e8   : > { %v4602_v4 = vadd.f32 %v4564_v15, %v4250_v57  ;;  %v4538_v53 = vadd.f32 %v4500_v25, %v4186_v28  ;;  %v8867_v62 = vsel %vm5106_vm1, %v5099_v0, %v5098_v17  ;;  %v9741_v10 = vrot.slane %v9740_v16, 4 }
 0x4e9   : > { %v2419_v6 = vadd.f32 %v9737_v20, %v9736_v56  ;;  %v2485_v39 = vadd.f32 %v9739_v58, %v9738_v36  ;;  %v9743_v30 = vrot.slane %v9742_v24, 2  ;;  %v4850_v2 = vadd.f32 %v4849_v19, %v4848_v41 }
 0x4ea   : > { %v2771_v57 = vadd.f32 %v9741_v10, %v9740_v16  ;;  %v4914_v22 = vadd.f32 %v4913_v47, %v4912_v13  ;;  %v9745_v31 = vrot.slane %v9744_v21, 4  ;;  %v9747_v29 = vrot.slane %v9746_v60, 2 }
 0x4eb   : > { %v2837_v54 = vadd.f32 %v9743_v30, %v9742_v24  ;;  %v2420_v49 = vrot.slane %v2419_v6, 2  ;;  %v2486_v48 = vrot.slane %v2485_v39, 1  ;;  %v4851_v26 = vrot.slane %v4850_v2, 1 }
 0x4ec   : > { %v2772_v35 = vrot.slane %v2771_v57, 2  ;;  %v3123_v38 = vadd.f32 %v9745_v31, %v9744_v21  ;;  %v3189_v15 = vadd.f32 %v9747_v29, %v9746_v60  ;;  %v4915_v3 = vrot.slane %v4914_v22, 1  ;;  %v9749_v60 = vld [vmem:[#allocation61_spill] sm:$0xff] }
 0x4ed   : > { %v2838_v11 = vrot.slane %v2837_v54, 1  ;;  %v2421_v28 = vadd.f32 %v2420_v49, %v2419_v6  ;;  %v2487_v25 = vadd.f32 %v2486_v48, %v2485_v39  ;;  %v4852_v19 = vadd.f32 %v4851_v26, %v4850_v2  ;;  %v4699_v39 = vpop.permute.xlu1 %4698  ;;  %v9748_v2 = vld [vmem:[#allocation81_spill] sm:$0xff]  ;;  %v4031_v48 = vpop.permute.xlu0 %4030 }
 0x4ee   : > { %v2773_v17 = vadd.f32 %v2772_v35, %v2771_v57  ;;  %v3124_v41 = vrot.slane %v3123_v38, 2  ;;  %v3190_v13 = vrot.slane %v3189_v15, 1  ;;  %v4916_v47 = vadd.f32 %v4915_v3, %v4914_v22  ;;  %v8882_v36 = vpop.eup %6563 }
 0x4ef   : > { %v2839_v0 = vadd.f32 %v2838_v11, %v2837_v54  ;;  %v2422_v56 = vrot.slane %v2421_v28, 1  ;;  %v3474_v20 = vrot.slane %v8509_v9, 4  ;;  %v4890_v30 = vadd.f32 %v4852_v19, %v4538_v53 }
 0x4f0   : > { %v2774_v58 = vrot.slane %v2773_v17, 1  ;;  %v3125_v10 = vadd.f32 %v3124_v41, %v3123_v38  ;;  %v3191_v24 = vadd.f32 %v3190_v13, %v3189_v15  ;;  %v4954_v21 = vadd.f32 %v4916_v47, %v4602_v4 }
 0x4f1   : > { %v2847_v16 = vadd.f32 %v2839_v0, %v2487_v25  ;;  %v2423_v31 = vadd.f32 %v2422_v56, %v2421_v28  ;;  %v3475_v6 = vadd.f32 %v3474_v20, %v8509_v9  ;;  %v3540_v22 = vrot.slane %v9748_v2, 2 }
 0x4f2   : > { %v2775_v57 = vadd.f32 %v2774_v58, %v2773_v17  ;;  %v3126_v54 = vrot.slane %v3125_v10, 1  ;;  %6565 = vrcp.f32 %v4954_v21  ;;  %v3825_v11 = vadd.f32 %v8665_v59, %v8658_v42 }
 0x4f3   : > { %v3199_v49 = vadd.f32 %v3191_v24, %v2847_v16  ;;  %v3476_v35 = vrot.slane %v3475_v6, 2  ;;  %v9750_v38 = vrot.slane %v9749_v60, 4  ;;  %v3541_v9 = vadd.f32 %v3540_v22, %v9748_v2  ;;  %v4371_v16 = vpop.permute.xlu1 %4370 }
 0x4f4   : > { %v2783_v4 = vadd.f32 %v2775_v57, %v2423_v31  ;;  %v3127_v29 = vadd.f32 %v3126_v54, %v3125_v10  ;;  %v4111_v15 = vunpack.c.h.bf16 %v8762_v51  ;;  %v8895_v26 = vmul.f32 %v4806_v55, %v4699_v39  ;;  %v9751_v10 = vld [vmem:[#allocation132_spill] sm:$0xff]  ;;  %v9752_v39 = vld [vmem:[#allocation133_spill] sm:$0xff] }
 0x4f5   : > { %v3891_v53 = vadd.f32 %v9750_v38, %v9749_v60  ;;  %v3477_v3 = vadd.f32 %v3476_v35, %v3475_v6  ;;  %v3826_v28 = vrot.slane %v3825_v11, 4  ;;  %v3542_v0 = vrot.slane %v3541_v9, 1 }
 0x4f6   : > { %v3135_v17 = vadd.f32 %v3127_v29, %v2783_v4  ;;  %v4127_v42 = vmul.f32 %v4111_v15, %v4031_v48  ;;  %v4241_v59 = vadd.f32 %v4111_v15, %v4110_v5  ;;  %v4460_v47 = vunpack.c.l.bf16 %v8810_v23 }
 0x4f7   : > { %v3892_v25 = vrot.slane %v3891_v53, 2  ;;  %v3478_v41 = vrot.slane %v3477_v3, 1  ;;  %v3827_v13 = vadd.f32 %v3826_v28, %v3825_v11  ;;  %v3543_v56 = vadd.f32 %v3542_v0, %v3541_v9  ;;  %v9755_v28 = vld [vmem:[#allocation59_spill] sm:$0xff] }
 0x4f8   : > { %v4177_v20 = vadd.f32 %v4127_v42, %v8792_v27  ;;  %v4242_v58 = vrot.slane %v4241_v59, 4  ;;  %v2406_v24 = vrot.slane %v9751_v10, 2  ;;  %v2472_v57 = vrot.slane %v9752_v39, 1 }
 0x4f9   : > { %v3893_v19 = vadd.f32 %v3892_v25, %v3891_v53  ;;  %v3479_v21 = vadd.f32 %v3478_v41, %v3477_v3  ;;  %v3828_v31 = vrot.slane %v3827_v13, 2  ;;  %v3551_v51 = vadd.f32 %v3543_v56, %v3199_v49  ;;  %v9753_v53 = vld [vmem:[#allocation47_spill] sm:$0xff]  ;;  %v9754_v49 = vld [vmem:[#allocation33_spill] sm:$0xff] }
 0x4fa   : > { %v4178_v5 = vrot.slane %v4177_v20, 4  ;;  %v4243_v54 = vadd.f32 %v4242_v58, %v4241_v59  ;;  %v2407_v2 = vadd.f32 %v2406_v24, %v9751_v10  ;;  %v8906_v27 = vmul.f32 %v4460_v47, %v4371_v16  ;;  %v9757_v24 = vld [vmem:[#allocation16_spill] sm:$0xff] }
 0x4fb   : > { %v3894_v6 = vrot.slane %v3893_v19, 1  ;;  %v3487_v22 = vadd.f32 %v3479_v21, %v3135_v17  ;;  %v3829_v48 = vadd.f32 %v3828_v31, %v3827_v13  ;;  %v2758_v4 = vrot.slane %v9753_v53, 2 }
 0x4fc   : > { %v4179_v11 = vadd.f32 %v4178_v5, %v4177_v20  ;;  %v4244_v60 = vrot.slane %v4243_v54, 2  ;;  %v2408_v38 = vrot.slane %v2407_v2, 1  ;;  %v6566_v29 = vpop.eup %6565  ;;  %v2824_v3 = vrot.slane %v9754_v49, 1 }
 0x4fd   : > { %v3895_v35 = vadd.f32 %v3894_v6, %v3893_v19  ;;  %v3830_v9 = vrot.slane %v3829_v48, 1  ;;  %v9756_v25 = vrot.slane %v9755_v28, 4  ;;  %v4970_v0 = vmul.f32 %v6566_v29, %v4890_v30 }
 0x4fe   : > { %v4180_v42 = vrot.slane %v4179_v11, 2  ;;  %v4245_v59 = vadd.f32 %v4244_v60, %v4243_v54  ;;  %v2473_v41 = vadd.f32 %v2472_v57, %v9752_v39  ;;  %v2409_v19 = vadd.f32 %v2408_v38, %v2407_v2  ;;  %v9759_v60 = vld [vmem:[#allocation39_spill] sm:$0xff] }
 0x4ff   : > { %v3903_v15 = vadd.f32 %v3895_v35, %v3551_v51  ;;  %v3109_v17 = vadd.f32 %v9756_v25, %v9755_v28  ;;  %v3831_v13 = vadd.f32 %v3830_v9, %v3829_v48  ;;  %v2759_v56 = vadd.f32 %v2758_v4, %v9753_v53  ;;  %v9761_v53 = vld [vmem:[#allocation56_spill] sm:$0xff] }
 0x500   : > { %v4978_v58 = vpack.c.bf16 %v4970_v0, %v4970_v0  ;;  %v4181_v16 = vadd.f32 %v4180_v42, %v4179_v11  ;;  %v4246_v10 = vrot.slane %v4245_v59, 1  ;;  %v9758_v21 = vrot.slane %v9757_v24, 2 }
 0x501   : > { %v3110_v20 = vrot.slane %v3109_v17, 2  ;;  %v3839_v6 = vadd.f32 %v3831_v13, %v3487_v22  ;;  %v2760_v51 = vrot.slane %v2759_v56, 1  ;;  %v2825_v30 = vadd.f32 %v2824_v3, %v9754_v49  ;;  %v9763_v13 = vld [vmem:[#allocation66_spill] sm:$0xff] }
 0x502   : > { %v3175_v31 = vadd.f32 %v9758_v21, %v9757_v24  ;;  %v5100_v54 = vunpack.c.l.b16 %v4978_v58  ;;  %v4182_v35 = vrot.slane %v4181_v16, 1  ;;  %v4247_v39 = vadd.f32 %v4246_v10, %v4245_v59  ;;  %v4367_v10 = vpop.permute.xlu0 %4366 }
 0x503   : > { %v3111_v5 = vadd.f32 %v3110_v20, %v3109_v17  ;;  %v2761_v2 = vadd.f32 %v2760_v51, %v2759_v56  ;;  %v9760_v38 = vrot.slane %v9759_v60, 4  ;;  %v9762_v4 = vrot.slane %v9761_v53, 2  ;;  %v9764_v20 = vld [vmem:[#allocation68_spill] sm:$0xff]  ;;  %v9765_v51 = vld [vmem:[#allocation70_spill] sm:$0xff] }
 0x504   : > { %v3176_v57 = vrot.slane %v3175_v31, 1  ;;  %v8927_v22 = vsel %vm5108_vm2, %v5100_v54, %v8867_v62  ;;  %v4183_v9 = vadd.f32 %v4182_v35, %v4181_v16  ;;  %v8929_v49 = vadd.f32 %v4247_v39, %v3903_v15 }
 0x505   : > { %v3112_v48 = vrot.slane %v3111_v5, 1  ;;  %v3461_v11 = vadd.f32 %v9760_v38, %v9759_v60  ;;  %v3527_v29 = vadd.f32 %v9762_v4, %v9761_v53  ;;  %v2845_v28 = vadd.f32 %v2825_v30, %v2473_v41 }
 0x506   : > { %v3177_v3 = vadd.f32 %v3176_v57, %v3175_v31  ;;  %v8931_v42 = vadd.f32 %v4183_v9, %v3839_v6  ;;  %v2781_v59 = vadd.f32 %v2761_v2, %v2409_v19  ;;  %v3812_v56 = vrot.slane %v9763_v13, 4 }
 0x507   : > { %v3113_v25 = vadd.f32 %v3112_v48, %v3111_v5  ;;  %v3462_v17 = vrot.slane %v3461_v11, 2  ;;  %v3528_v0 = vrot.slane %v3527_v29, 1  ;;  %v3878_v58 = vrot.slane %v9764_v20, 2 }
 0x508   : > { %v3197_v24 = vadd.f32 %v3177_v3, %v2845_v28  ;;  %v4163_v15 = vadd.f32 %v8672_v37, %v9765_v51  ;;  %v3813_v16 = vadd.f32 %v3812_v56, %v9763_v13  ;;  %v4229_v31 = vadd.f32 %v4228_v40, %v8660_v45  ;;  %v9766_v3 = vld [vmem:[#allocation126_spill] sm:$0xff] }
 0x509   : > { %v3463_v21 = vadd.f32 %v3462_v17, %v3461_v11  ;;  %v3529_v62 = vadd.f32 %v3528_v0, %v3527_v29  ;;  %v3879_v41 = vadd.f32 %v3878_v58, %v9764_v20  ;;  %v4459_v19 = vunpack.c.h.bf16 %v8777_v46  ;;  %v9768_v20 = vld [vmem:[#allocation129_spill] sm:$0xff] }
 0x50a   : > { %v3133_v6 = vadd.f32 %v3113_v25, %v2781_v59  ;;  %v4164_v54 = vrot.slane %v4163_v15, 4  ;;  %v3814_v35 = vrot.slane %v3813_v16, 2  ;;  %v4230_v57 = vrot.slane %v4229_v31, 2 }
 0x50b   : > { %v3464_v30 = vrot.slane %v3463_v21, 1  ;;  %v3549_v5 = vadd.f32 %v3529_v62, %v3197_v24  ;;  %v3880_v39 = vrot.slane %v3879_v41, 1  ;;  %v4475_v2 = vmul.f32 %v4459_v19, %v4367_v10  ;;  %v9770_v62 = vld [vmem:[#allocation28_spill] sm:$0xff] }
 0x50c   : > { %v4165_v37 = vadd.f32 %v4164_v54, %v4163_v15  ;;  %v4579_v60 = vadd.f32 %v4459_v19, %v4458_v8  ;;  %v4808_v38 = vunpack.c.l.bf16 %v8832_v63  ;;  %v3815_v11 = vadd.f32 %v3814_v35, %v3813_v16  ;;  %v9772_v19 = vld [vmem:[#allocation41_spill] sm:$0xff] }
 0x50d   : > { %v3465_v48 = vadd.f32 %v3464_v30, %v3463_v21  ;;  %v3881_v53 = vadd.f32 %v3880_v39, %v3879_v41  ;;  %v4231_v45 = vadd.f32 %v4230_v57, %v4229_v31  ;;  %v4515_v40 = vadd.f32 %v4475_v2, %v8814_v18 }
 0x50e   : > { %v4166_v29 = vrot.slane %v4165_v37, 2  ;;  %v4580_v9 = vrot.slane %v4579_v60, 4  ;;  %v9767_v28 = vrot.slane %v9766_v3, 2  ;;  %v3816_v17 = vrot.slane %v3815_v11, 1 }
 0x50f   : > { %v3485_v4 = vadd.f32 %v3465_v48, %v3133_v6  ;;  %v3901_v0 = vadd.f32 %v3881_v53, %v3549_v5  ;;  %v4232_v59 = vrot.slane %v4231_v45, 1  ;;  %v4516_v13 = vrot.slane %v4515_v40, 4 }
 0x510   : > { %v2393_v25 = vadd.f32 %v9767_v28, %v9766_v3  ;;  %v4167_v46 = vadd.f32 %v4166_v29, %v4165_v37  ;;  %v4581_v8 = vadd.f32 %v4580_v9, %v4579_v60  ;;  %v9769_v58 = vrot.slane %v9768_v20, 1  ;;  %v9774_v37 = vld [vmem:[#allocation51_spill] sm:$0xff]  ;;  %v9776_v29 = vld [vmem:[#allocation18_spill] sm:$0xff] }
 0x511   : > { %v3817_v24 = vadd.f32 %v3816_v17, %v3815_v11  ;;  %v4233_v18 = vadd.f32 %v4232_v59, %v4231_v45  ;;  %v4517_v21 = vadd.f32 %v4516_v13, %v4515_v40  ;;  %v9771_v51 = vrot.slane %v9770_v62, 2  ;;  %v9775_v45 = vld [vmem:[#allocation53_spill] sm:$0xff] }
 0x512   : > { %v2394_v56 = vrot.slane %v2393_v25, 1  ;;  %v2459_v10 = vadd.f32 %v9769_v58, %v9768_v20  ;;  %v4168_v16 = vrot.slane %v4167_v46, 1  ;;  %v4582_v41 = vrot.slane %v4581_v8, 2  ;;  %v9777_v17 = vld [vmem:[#allocation69_spill] sm:$0xff]  ;;  %v9778_v58 = vld [vmem:[#allocation118_spill] sm:$0xff] }
 0x513   : > { %v2745_v15 = vadd.f32 %v9771_v51, %v9770_v62  ;;  %v9773_v6 = vrot.slane %v9772_v19, 1  ;;  %v3837_v5 = vadd.f32 %v3817_v24, %v3485_v4  ;;  %v4253_v54 = vadd.f32 %v4233_v18, %v3901_v0  ;;  %v9780_v51 = vld [vmem:[#allocation73_spill] sm:$0xff] }
 0x514   : > { %v2395_v31 = vadd.f32 %v2394_v56, %v2393_v25  ;;  %v4518_v35 = vrot.slane %v4517_v21, 2  ;;  %v4169_v57 = vadd.f32 %v4168_v16, %v4167_v46  ;;  %v4583_v2 = vadd.f32 %v4582_v41, %v4581_v8 }
 0x515   : > { %v2811_v30 = vadd.f32 %v9773_v6, %v9772_v19  ;;  %v2746_v39 = vrot.slane %v2745_v15, 1  ;;  %v3096_v60 = vrot.slane %v9774_v37, 2  ;;  %v3162_v40 = vrot.slane %v9775_v45, 1  ;;  %v9782_v6 = vld [vmem:[#allocation83_spill] sm:$0xff] }
 0x516   : > { %v4519_v11 = vadd.f32 %v4518_v35, %v4517_v21  ;;  %v3448_v9 = vrot.slane %v9776_v29, 2  ;;  %v4189_v3 = vadd.f32 %v4169_v57, %v3837_v5  ;;  %v4584_v28 = vrot.slane %v4583_v2, 1 }
 0x517   : > { %v2843_v48 = vadd.f32 %v2811_v30, %v2459_v10  ;;  %v2747_v53 = vadd.f32 %v2746_v39, %v2745_v15  ;;  %v3097_v25 = vadd.f32 %v3096_v60, %v9774_v37  ;;  %v3514_v4 = vrot.slane %v9777_v17, 1 }
 0x518   : > { %v4520_v0 = vrot.slane %v4519_v11, 1  ;;  %v3163_v13 = vadd.f32 %v3162_v40, %v9775_v45  ;;  %v3449_v46 = vadd.f32 %v3448_v9, %v9776_v29  ;;  %v4585_v8 = vadd.f32 %v4584_v28, %v4583_v2  ;;  %v4703_v2 = vpop.permute.xlu0 %4702  ;;  %v9784_v40 = vld [vmem:[#allocation87_spill] sm:$0xff]  ;;  %v4707_v28 = vpop.permute.xlu1 %4706 }
 0x519   : > { %v2779_v59 = vadd.f32 %v2747_v53, %v2395_v31  ;;  %v3098_v56 = vrot.slane %v3097_v25, 1  ;;  %v3515_v20 = vadd.f32 %v3514_v4, %v9777_v17  ;;  %v9779_v10 = vrot.slane %v9778_v58, 4 }
 0x51a   : > { %v4521_v18 = vadd.f32 %v4520_v0, %v4519_v11  ;;  %v3195_v21 = vadd.f32 %v3163_v13, %v2843_v48  ;;  %v3450_v62 = vrot.slane %v3449_v46, 1  ;;  %v9781_v15 = vrot.slane %v9780_v51, 2  ;;  %v9783_v11 = vld [vmem:[#allocation85_spill] sm:$0xff] }
 0x51b   : > { %v3799_v24 = vadd.f32 %v9779_v10, %v9778_v58  ;;  %v8973_v41 = vadd.f32 %v4585_v8, %v4253_v54  ;;  %v3099_v31 = vadd.f32 %v3098_v56, %v3097_v25  ;;  %v4150_v30 = vrot.slane %v9782_v6, 4 }
 0x51c   : > { %v3865_v16 = vadd.f32 %v9781_v15, %v9780_v51  ;;  %v8976_v5 = vadd.f32 %v4521_v18, %v4189_v3  ;;  %v3451_v35 = vadd.f32 %v3450_v62, %v3449_v46  ;;  %v3547_v39 = vadd.f32 %v3515_v20, %v3195_v21 }
 0x51d   : > { %v3800_v19 = vrot.slane %v3799_v24, 2  ;;  %v3131_v37 = vadd.f32 %v3099_v31, %v2779_v59  ;;  %v4151_v48 = vadd.f32 %v4150_v30, %v9782_v6  ;;  %v4216_v53 = vrot.slane %v9783_v11, 2 }
 0x51e   : > { %v3866_v57 = vrot.slane %v3865_v16, 1  ;;  %v4501_v54 = vadd.f32 %v8686_v7, %v9784_v40  ;;  %v9785_v29 = vrot.slane %v8680_v43, 4  ;;  %v4807_v3 = vunpack.c.h.bf16 %v8794_v34 }
 0x51f   : > { %v3801_v60 = vadd.f32 %v3800_v19, %v3799_v24  ;;  %v3483_v25 = vadd.f32 %v3451_v35, %v3131_v37  ;;  %v4152_v4 = vrot.slane %v4151_v48, 2  ;;  %v4217_v0 = vadd.f32 %v4216_v53, %v9783_v11  ;;  %v9786_v35 = vld [vmem:[#allocation27_spill] sm:$0xff] }
 0x520   : > { %v3867_v45 = vadd.f32 %v3866_v57, %v3865_v16  ;;  %v4567_v9 = vadd.f32 %v9785_v29, %v8680_v43  ;;  %v4502_v13 = vrot.slane %v4501_v54, 4  ;;  %v4823_v8 = vmul.f32 %v4807_v3, %v4703_v2 }
 0x521   : > { %v3802_v17 = vrot.slane %v3801_v60, 1  ;;  %v4153_v20 = vadd.f32 %v4152_v4, %v4151_v48  ;;  %v4218_v58 = vrot.slane %v4217_v0, 1  ;;  %v4917_v7 = vadd.f32 %v4807_v3, %v4806_v55  ;;  %v9789_v4 = vld [vmem:[#allocation29_spill] sm:$0xff] }
 0x522   : > { %v3899_v59 = vadd.f32 %v3867_v45, %v3547_v39  ;;  %v4568_v46 = vrot.slane %v4567_v9, 2  ;;  %v8991_v43 = vmul.f32 %v4808_v38, %v4707_v28  ;;  %v4503_v10 = vadd.f32 %v4502_v13, %v4501_v54  ;;  %v9788_v45 = vld [vmem:[#allocation110_spill] sm:$0xff] }
 0x523   : > { %v3803_v56 = vadd.f32 %v3802_v17, %v3801_v60  ;;  %v4853_v18 = vadd.f32 %v4823_v8, %v8895_v26  ;;  %v4154_v62 = vrot.slane %v4153_v20, 1  ;;  %v4219_v51 = vadd.f32 %v4218_v58, %v4217_v0  ;;  %v9787_v60 = vld [vmem:[#allocation37_spill] sm:$0xff] }
 0x524   : > { %v4569_v24 = vadd.f32 %v4568_v46, %v4567_v9  ;;  %v4918_v15 = vrot.slane %v4917_v7, 4  ;;  %v4504_v16 = vrot.slane %v4503_v10, 2  ;;  %v4462_v6 = vunpack.c.l.bf16 %v8839_v50  ;;  %v9790_v46 = vld [vmem:[#allocation24_spill] sm:$0xff] }
 0x525   : > { %v3835_v21 = vadd.f32 %v3803_v56, %v3483_v25  ;;  %v4854_v19 = vrot.slane %v4853_v18, 4  ;;  %v4155_v30 = vadd.f32 %v4154_v62, %v4153_v20  ;;  %v4251_v34 = vadd.f32 %v4219_v51, %v3899_v59  ;;  %v9791_v56 = vld [vmem:[#allocation20_spill] sm:$0xff] }
 0x526   : > { %v4570_v31 = vrot.slane %v4569_v24, 1  ;;  %v4919_v55 = vadd.f32 %v4918_v15, %v4917_v7  ;;  %v2413_v39 = vrot.slane %v9786_v35, 2  ;;  %v4505_v57 = vadd.f32 %v4504_v16, %v4503_v10 }
 0x527   : > { %v4855_v37 = vadd.f32 %v4854_v19, %v4853_v18  ;;  %v2479_v48 = vrot.slane %v9787_v60, 1  ;;  %v4187_v26 = vadd.f32 %v4155_v30, %v3835_v21  ;;  %v2765_v40 = vrot.slane %v9788_v45, 2  ;;  %v9792_v19 = vld [vmem:[#allocation60_spill] sm:$0xff] }
 0x528   : > { %v4571_v2 = vadd.f32 %v4570_v31, %v4569_v24  ;;  %v4920_v11 = vrot.slane %v4919_v55, 2  ;;  %v2414_v53 = vadd.f32 %v2413_v39, %v9786_v35  ;;  %v4506_v54 = vrot.slane %v4505_v57, 1  ;;  %v9794_v39 = vld [vmem:[#allocation62_spill] sm:$0xff] }
 0x529   : > { %v4856_v9 = vrot.slane %v4855_v37, 2  ;;  %v2480_v3 = vadd.f32 %v2479_v48, %v9787_v60  ;;  %v2766_v17 = vadd.f32 %v2765_v40, %v9788_v45  ;;  %v2831_v0 = vrot.slane %v9789_v4, 1  ;;  %v4379_v40 = vpop.permute.xlu1 %4378 }
 0x52a   : > { %v4603_v29 = vadd.f32 %v4571_v2, %v4251_v34  ;;  %v4921_v28 = vadd.f32 %v4920_v11, %v4919_v55  ;;  %v2415_v25 = vrot.slane %v2414_v53, 1  ;;  %v4507_v59 = vadd.f32 %v4506_v54, %v4505_v57 }
 0x52b   : > { %v4857_v13 = vadd.f32 %v4856_v9, %v4855_v37  ;;  %v3117_v8 = vrot.slane %v9790_v46, 2  ;;  %v3183_v20 = vrot.slane %v9791_v56, 1  ;;  %v2767_v10 = vrot.slane %v2766_v17, 1  ;;  %v9796_v37 = vld [vmem:[#allocation112_spill] sm:$0xff] }
 0x52c   : > { %v4922_v58 = vrot.slane %v4921_v28, 1  ;;  %v2416_v7 = vadd.f32 %v2415_v25, %v2414_v53  ;;  %v2832_v24 = vadd.f32 %v2831_v0, %v9789_v4  ;;  %v4539_v18 = vadd.f32 %v4507_v59, %v4187_v26  ;;  %v9797_v25 = vld [vmem:[#allocation120_spill] sm:$0xff]  ;;  %v4375_v0 = vpop.permute.xlu0 %4374 }
 0x52d   : > { %v4858_v21 = vrot.slane %v4857_v13, 1  ;;  %v3118_v62 = vadd.f32 %v3117_v8, %v9790_v46  ;;  %v3184_v51 = vadd.f32 %v3183_v20, %v9791_v56  ;;  %v2768_v16 = vadd.f32 %v2767_v10, %v2766_v17 }
 0x52e   : > { %v4923_v15 = vadd.f32 %v4922_v58, %v4921_v28  ;;  %v2846_v31 = vadd.f32 %v2832_v24, %v2480_v3  ;;  %v9793_v30 = vrot.slane %v9792_v19, 4  ;;  %v9795_v57 = vrot.slane %v9794_v39, 2 }
 0x52f   : > { %v4859_v55 = vadd.f32 %v4858_v21, %v4857_v13  ;;  %v3119_v35 = vrot.slane %v3118_v62, 1  ;;  %v3819_v60 = vrot.slane %v9796_v37, 4  ;;  %v2782_v26 = vadd.f32 %v2768_v16, %v2416_v7 }
 0x530   : > { %v3468_v34 = vadd.f32 %v9793_v30, %v9792_v19  ;;  %v3534_v2 = vadd.f32 %v9795_v57, %v9794_v39  ;;  %v4955_v48 = vadd.f32 %v4923_v15, %v4603_v29  ;;  %v3198_v11 = vadd.f32 %v3184_v51, %v2846_v31  ;;  %v4715_v19 = vpop.permute.xlu1 %4714 }
 0x531   : > { %v4891_v45 = vadd.f32 %v4859_v55, %v4539_v18  ;;  %v3120_v54 = vadd.f32 %v3119_v35, %v3118_v62  ;;  %v3820_v3 = vadd.f32 %v3819_v60, %v9796_v37  ;;  %v3885_v17 = vrot.slane %v9797_v25, 2  ;;  %v9799_v37 = vld [vmem:[#allocation130_spill] sm:$0xff] }
 0x532   : > { %v3469_v53 = vrot.slane %v3468_v34, 2  ;;  %v3535_v9 = vrot.slane %v3534_v2, 1  ;;  %6567 = vrcp.f32 %v4955_v48  ;;  %v4170_v4 = vadd.f32 %v8758_v1, %v8752_v12 }
 0x533   : > { %v3134_v59 = vadd.f32 %v3120_v54, %v2782_v26  ;;  %v3821_v29 = vrot.slane %v3820_v3, 2  ;;  %v9798_v46 = vrot.slane %v8748_v61, 4  ;;  %v3886_v20 = vadd.f32 %v3885_v17, %v9797_v25  ;;  %v9801_v25 = vld [vmem:[#allocation43_spill] sm:$0xff] }
 0x534   : > { %v3470_v28 = vadd.f32 %v3469_v53, %v3468_v34  ;;  %v3536_v13 = vadd.f32 %v3535_v9, %v3534_v2  ;;  %v4171_v58 = vrot.slane %v4170_v4, 4  ;;  %v4461_v7 = vunpack.c.h.bf16 %v8810_v23 }
 0x535   : > { %v4236_v8 = vadd.f32 %v9798_v46, %v8748_v61  ;;  %v9025_v10 = vmul.f32 %v4462_v6, %v4379_v40  ;;  %v3822_v12 = vadd.f32 %v3821_v29, %v3820_v3  ;;  %v3887_v21 = vrot.slane %v3886_v20, 1 }
 0x536   : > { %v3471_v56 = vrot.slane %v3470_v28, 1  ;;  %v3550_v24 = vadd.f32 %v3536_v13, %v3198_v11  ;;  %v4172_v62 = vadd.f32 %v4171_v58, %v4170_v4  ;;  %v4477_v51 = vmul.f32 %v4461_v7, %v4375_v0  ;;  %v9803_v0 = vld [vmem:[#allocation31_spill] sm:$0xff] }
 0x537   : > { %v4237_v1 = vrot.slane %v4236_v8, 2  ;;  %v3823_v15 = vrot.slane %v3822_v12, 1  ;;  %v4586_v61 = vadd.f32 %v4461_v7, %v4460_v47  ;;  %v4810_v31 = vunpack.c.l.bf16 %v8847_v44 }
 0x538   : > { %v3472_v18 = vadd.f32 %v3471_v56, %v3470_v28  ;;  %v3888_v34 = vadd.f32 %v3887_v21, %v3886_v20  ;;  %v4173_v55 = vrot.slane %v4172_v62, 2  ;;  %v4522_v35 = vadd.f32 %v4477_v51, %v8906_v27  ;;  %v9805_v56 = vld [vmem:[#allocation131_spill] sm:$0xff] }
 0x539   : > { %v4238_v16 = vadd.f32 %v4237_v1, %v4236_v8  ;;  %v3824_v39 = vadd.f32 %v3823_v15, %v3822_v12  ;;  %v4587_v2 = vrot.slane %v4586_v61, 4  ;;  %v9800_v60 = vrot.slane %v9799_v37, 2  ;;  %v9808_v15 = vld [vmem:[#allocation57_spill] sm:$0xff] }
 0x53a   : > { %v3486_v30 = vadd.f32 %v3472_v18, %v3134_v59  ;;  %v3902_v26 = vadd.f32 %v3888_v34, %v3550_v24  ;;  %v4174_v11 = vadd.f32 %v4173_v55, %v4172_v62  ;;  %v4523_v53 = vrot.slane %v4522_v35, 4  ;;  %v9807_v62 = vld [vmem:[#allocation30_spill] sm:$0xff] }
 0x53b   : > { %v4239_v57 = vrot.slane %v4238_v16, 1  ;;  %v2400_v48 = vadd.f32 %v9800_v60, %v9799_v37  ;;  %v9036_v23 = vmul.f32 %v4810_v31, %v4715_v19  ;;  %v4588_v54 = vadd.f32 %v4587_v2, %v4586_v61 }
 0x53c   : > { %v3838_v47 = vadd.f32 %v3824_v39, %v3486_v30  ;;  %v6568_v3 = vpop.eup %6567  ;;  %v4175_v27 = vrot.slane %v4174_v11, 1  ;;  %v4524_v28 = vadd.f32 %v4523_v53, %v4522_v35  ;;  %v9802_v17 = vrot.slane %v9801_v25, 2  ;;  %v9809_v30 = vld [vmem:[#allocation49_spill] sm:$0xff]  ;;  %v4711_v53 = vpop.permute.xlu0 %4710 }
 0x53d   : > { %v4240_v40 = vadd.f32 %v4239_v57, %v4238_v16  ;;  %v2401_v9 = vrot.slane %v2400_v48, 1  ;;  %v9804_v59 = vrot.slane %v9803_v0, 1  ;;  %v9044_v29 = vmul.f32 %v6568_v3, %v4891_v45 }
 0x53e   : > { %v2752_v4 = vadd.f32 %v9802_v17, %v9801_v25  ;;  %v4589_v8 = vrot.slane %v4588_v54, 2  ;;  %v9806_v20 = vrot.slane %v9805_v56, 1  ;;  %v4176_v7 = vadd.f32 %v4175_v27, %v4174_v11  ;;  %v9813_v17 = vld [vmem:[#allocation64_spill] sm:$0xff] }
 0x53f   : > { %v2818_v13 = vadd.f32 %v9804_v59, %v9803_v0  ;;  %v4254_v46 = vadd.f32 %v4240_v40, %v3902_v26  ;;  %v4525_v24 = vrot.slane %v4524_v28, 2  ;;  %v2402_v12 = vadd.f32 %v2401_v9, %v2400_v48  ;;  %v9810_v48 = vld [vmem:[#allocation54_spill] sm:$0xff] }
 0x540   : > { %v2466_v58 = vadd.f32 %v9806_v20, %v9805_v56  ;;  %v2753_v1 = vrot.slane %v2752_v4, 1  ;;  %v4590_v18 = vadd.f32 %v4589_v8, %v4588_v54  ;;  %v3103_v51 = vrot.slane %v9807_v62, 2  ;;  %v9811_v54 = vld [vmem:[#allocation79_spill] sm:$0xff]  ;;  %v9815_v56 = vld [vmem:[#allocation44_spill] sm:$0xff] }
 0x541   : > { %v3169_v16 = vrot.slane %v9808_v15, 1  ;;  %v4190_v61 = vadd.f32 %v4176_v7, %v3838_v47  ;;  %v4526_v19 = vadd.f32 %v4525_v24, %v4524_v28  ;;  %v3455_v34 = vrot.slane %v9809_v30, 2 }
 0x542   : > { %v2844_v21 = vadd.f32 %v2818_v13, %v2466_v58  ;;  %v2754_v45 = vadd.f32 %v2753_v1, %v2752_v4  ;;  %v4979_v55 = vpack.c.bf16 %v9044_v29, %v9044_v29  ;;  %v4591_v35 = vrot.slane %v4590_v18, 1 }
 0x543   : > { %v3104_v39 = vadd.f32 %v3103_v51, %v9807_v62  ;;  %v3170_v57 = vadd.f32 %v3169_v16, %v9808_v15  ;;  %v4527_v2 = vrot.slane %v4526_v19, 1  ;;  %v3456_v60 = vadd.f32 %v3455_v34, %v9809_v30  ;;  %v9816_v62 = vld [vmem:[#allocation25_spill] sm:$0xff] }
 0x544   : > { %v2780_v37 = vadd.f32 %v2754_v45, %v2402_v12  ;;  %v3521_v26 = vrot.slane %v9810_v48, 1  ;;  %v4592_v11 = vadd.f32 %v4591_v35, %v4590_v18  ;;  %v9812_v9 = vrot.slane %v9811_v54, 4 }
 0x545   : > { %v3105_v47 = vrot.slane %v3104_v39, 1  ;;  %v3196_v40 = vadd.f32 %v3170_v57, %v2844_v21  ;;  %v4528_v27 = vadd.f32 %v4527_v2, %v4526_v19  ;;  %v3457_v28 = vrot.slane %v3456_v60, 1  ;;  %v4383_v57 = vpop.permute.xlu0 %4382 }
 0x546   : > { %v3806_v3 = vadd.f32 %v9812_v9, %v9811_v54  ;;  %v3522_v25 = vadd.f32 %v3521_v26, %v9810_v48  ;;  %v9814_v4 = vrot.slane %v9813_v17, 2  ;;  %v9065_v59 = vadd.f32 %v4592_v11, %v4254_v46 }
 0x547   : > { %v3106_v13 = vadd.f32 %v3105_v47, %v3104_v39  ;;  %v4157_v20 = vrot.slane %v9815_v56, 4  ;;  %v9068_v58 = vadd.f32 %v4528_v27, %v4190_v61  ;;  %v3458_v7 = vadd.f32 %v3457_v28, %v3456_v60  ;;  %v4723_v39 = vpop.permute.xlu1 %4722 }
 0x548   : > { %v3872_v0 = vadd.f32 %v9814_v4, %v9813_v17  ;;  %v3807_v8 = vrot.slane %v3806_v3, 2  ;;  %v3548_v24 = vadd.f32 %v3522_v25, %v3196_v40  ;;  %v4223_v51 = vrot.slane %v9816_v62, 2 }
 0x549   : > { %v3132_v1 = vadd.f32 %v3106_v13, %v2780_v37  ;;  %v4158_v21 = vadd.f32 %v4157_v20, %v9815_v56  ;;  %v4508_v46 = vadd.f32 %v8769_v33, %v8766_v32  ;;  %v9817_v16 = vrot.slane %v8760_v14, 4  ;;  %v4719_v56 = vpop.permute.xlu0 %4718 }
 0x54a   : > { %v3873_v12 = vrot.slane %v3872_v0, 1  ;;  %v3808_v18 = vadd.f32 %v3807_v8, %v3806_v3  ;;  %v4809_v61 = vunpack.c.h.bf16 %v8832_v63  ;;  %v4224_v35 = vadd.f32 %v4223_v51, %v9816_v62  ;;  %v4984_v62 = vld [vmem:[#allocation7] sm:$0xff] }
 0x54b   : > { %v4574_v19 = vadd.f32 %v9817_v16, %v8760_v14  ;;  %v3484_v45 = vadd.f32 %v3458_v7, %v3132_v1  ;;  %v4159_v34 = vrot.slane %v4158_v21, 2  ;;  %v4509_v37 = vrot.slane %v4508_v46, 4  ;;  %v4988_v51 = vld [vmem:[#allocation7 + $0x20] sm:$0xff] }
 0x54c   : > { %v3874_v15 = vadd.f32 %v3873_v12, %v3872_v0  ;;  %v3809_v30 = vrot.slane %v3808_v18, 1  ;;  %v4825_v48 = vmul.f32 %v4809_v61, %v4711_v53  ;;  %v4225_v32 = vrot.slane %v4224_v35, 1 }
 0x54d   : > { %v4575_v60 = vrot.slane %v4574_v19, 2  ;;  %v4160_v11 = vadd.f32 %v4159_v34, %v4158_v21  ;;  %v4924_v33 = vadd.f32 %v4809_v61, %v4808_v38  ;;  %v4510_v14 = vadd.f32 %v4509_v37, %v4508_v46  ;;  %v4731_v38 = vpop.permute.xlu1 %4730 }
 0x54e   : > { %v3900_v2 = vadd.f32 %v3874_v15, %v3548_v24  ;;  %v3810_v26 = vadd.f32 %v3809_v30, %v3808_v18  ;;  %v4860_v40 = vadd.f32 %v4825_v48, %v8991_v43  ;;  %v4812_v54 = vunpack.c.l.bf16 %v8849_v52  ;;  %v4727_v48 = vpop.permute.xlu0 %4726 }
 0x54f   : > { %v4576_v47 = vadd.f32 %v4575_v60, %v4574_v19  ;;  %v4161_v3 = vrot.slane %v4160_v11, 1  ;;  %v4226_v27 = vadd.f32 %v4225_v32, %v4224_v35  ;;  %v4925_v28 = vrot.slane %v4924_v33, 4 }
 0x550   : > { %v3836_v9 = vadd.f32 %v3810_v26, %v3484_v45  ;;  %v4511_v25 = vrot.slane %v4510_v14, 2  ;;  %v4861_v4 = vrot.slane %v4860_v40, 4  ;;  %v4828_v53 = vmul.f32 %v4812_v54, %v4723_v39 }
 0x551   : > { %v4577_v17 = vrot.slane %v4576_v47, 1  ;;  %v4162_v0 = vadd.f32 %v4161_v3, %v4160_v11  ;;  %v4252_v13 = vadd.f32 %v4226_v27, %v3900_v2  ;;  %v4926_v8 = vadd.f32 %v4925_v28, %v4924_v33 }
 0x552   : > { %v4463_v63 = vunpack.c.h.bf16 %v8839_v50  ;;  %v4512_v20 = vadd.f32 %v4511_v25, %v4510_v14  ;;  %v4862_v43 = vadd.f32 %v4861_v4, %v4860_v40  ;;  %v4814_v24 = vunpack.c.l.bf16 %v8882_v36 }
 0x553   : > { %v4578_v7 = vadd.f32 %v4577_v17, %v4576_v47  ;;  %v4188_v12 = vadd.f32 %v4162_v0, %v3836_v9  ;;  %v4927_v1 = vrot.slane %v4926_v8, 2  ;;  %v4811_v34 = vunpack.c.h.bf16 %v8847_v44  ;;  %v4996_v44 = vld [vmem:[#allocation7 + $0x60] sm:$0xff] }
 0x554   : > { %v4479_v18 = vmul.f32 %v4463_v63, %v4383_v57  ;;  %v4593_v21 = vadd.f32 %v4463_v63, %v4462_v6  ;;  %v4513_v15 = vrot.slane %v4512_v20, 1  ;;  %v4863_v16 = vrot.slane %v4862_v43, 2 }
 0x555   : > { %v4604_v46 = vadd.f32 %v4578_v7, %v4252_v13  ;;  %v9089_v19 = vmul.f32 %v4814_v24, %v4731_v38  ;;  %v4928_v61 = vadd.f32 %v4927_v1, %v4926_v8  ;;  %v5931_v57 = vcombine.low %v4984_v62, %v4988_v51  ;;  %v4992_v13 = vld [vmem:[#allocation7 + $0x40] sm:$0xff] }
 0x556   : > { %v4529_v45 = vadd.f32 %v4479_v18, %v9025_v10  ;;  %v4594_v30 = vrot.slane %v4593_v21, 4  ;;  %v4514_v35 = vadd.f32 %v4513_v15, %v4512_v20  ;;  %v4864_v39 = vadd.f32 %v4863_v16, %v4862_v43  ;;  %v5000_v1 = vld [vmem:[#allocation7 + $0x80] sm:$0xff]  ;;  %v4735_v15 = vpop.permute.xlu0 %4734 }
 0x557   : > { %v5932_v50 = vcombine.high %v4984_v62, %v4988_v51  ;;  %v4929_v6 = vrot.slane %v4928_v61, 1  ;;  %v4827_v60 = vmul.f32 %v4811_v34, %v4719_v56  ;;  %v4931_v32 = vadd.f32 %v4811_v34, %v4810_v31 }
 0x558   : > { %v4530_v2 = vrot.slane %v4529_v45, 4  ;;  %v4595_v37 = vadd.f32 %v4594_v30, %v4593_v21  ;;  %v4540_v26 = vadd.f32 %v4514_v35, %v4188_v12  ;;  %v4865_v11 = vrot.slane %v4864_v39, 1 }
 0x559   : > { %5442 = vmatprep.subr.bf16.mxu1 %v5932_v50  ;;  %v4813_v10 = vunpack.c.h.bf16 %v8849_v52  ;;  %v4930_v33 = vadd.f32 %v4929_v6, %v4928_v61  ;;  %v4867_v40 = vadd.f32 %v4827_v60, %v9036_v23  ;;  %v4932_v3 = vrot.slane %v4931_v32, 4 }
 0x55a   : > { %v4531_v14 = vadd.f32 %v4530_v2, %v4529_v45  ;;  %v4596_v47 = vrot.slane %v4595_v37, 2  ;;  %5443 = vmatpush1.bf16.msra.mxu1 %v5931_v57  ;;  %v4866_v9 = vadd.f32 %v4865_v11, %v4864_v39  ;;  %v5939_v12 = vcombine.low %v4992_v13, %v4996_v44  ;;  %v5008_v2 = vld [vmem:[#allocation7 + $0xc0] sm:$0xff] }
 0x55b   : > { %v4829_v27 = vmul.f32 %v4813_v10, %v4727_v48  ;;  %v4938_v28 = vadd.f32 %v4813_v10, %v4812_v54  ;;  %v4956_v25 = vadd.f32 %v4930_v33, %v4604_v46  ;;  %v4868_v0 = vrot.slane %v4867_v40, 4  ;;  %v5004_v54 = vld [vmem:[#allocation7 + $0xa0] sm:$0xff] }
 0x55c   : > { %v4532_v17 = vrot.slane %v4531_v14, 2  ;;  %v4597_v4 = vadd.f32 %v4596_v47, %v4595_v37  ;;  %v4892_v31 = vadd.f32 %v4866_v9, %v4540_v26  ;;  %v4933_v8 = vadd.f32 %v4932_v3, %v4931_v32  ;;  %v5012_v37 = vld [vmem:[#allocation7 + $0xe0] sm:$0xff] }
 0x55d   : > { %v4874_v63 = vadd.f32 %v4829_v27, %v4828_v53  ;;  %v4939_v52 = vrot.slane %v4938_v28, 4  ;;  %6569 = vrcp.f32 %v4956_v25  ;;  %v4869_v20 = vadd.f32 %v4868_v0, %v4867_v40  ;;  %v5020_v47 = vld [vmem:[#allocation7 + $0x120] sm:$0xff] }
 0x55e   : > { %v4533_v38 = vadd.f32 %v4532_v17, %v4531_v14  ;;  %v4598_v56 = vrot.slane %v4597_v4, 1  ;;  %v4934_v23 = vrot.slane %v4933_v8, 2  ;;  %v5940_v51 = vcombine.high %v4992_v13, %v4996_v44  ;;  %v5016_v14 = vld [vmem:[#allocation7 + $0x100] sm:$0xff] }
 0x55f   : > { %v4875_v7 = vrot.slane %v4874_v63, 4  ;;  %v4940_v43 = vadd.f32 %v4939_v52, %v4938_v28  ;;  %v4870_v62 = vrot.slane %v4869_v20, 2  ;;  %v4815_v53 = vunpack.c.h.bf16 %v8882_v36 }
 0x560   : > { %v4534_v18 = vrot.slane %v4533_v38, 1  ;;  %v4599_v21 = vadd.f32 %v4598_v56, %v4597_v4  ;;  %v4935_v46 = vadd.f32 %v4934_v23, %v4933_v8  ;;  %5444 = vmatprep.subr.bf16.mxu1 %v5940_v51  ;;  %v5947_v35 = vcombine.low %v5000_v1, %v5004_v54  ;;  %v5024_v8 = vld [vmem:[#allocation7 + $0x140] sm:$0xff] }
 0x561   : > { %v4876_v16 = vadd.f32 %v4875_v7, %v4874_v63  ;;  %v4941_v61 = vrot.slane %v4940_v43, 2  ;;  %v4871_v34 = vadd.f32 %v4870_v62, %v4869_v20  ;;  %5445 = vmatpush1.bf16.msra.mxu1 %v5939_v12  ;;  %v4831_v6 = vmul.f32 %v4815_v53, %v4735_v15  ;;  %v5028_v63 = vld [vmem:[#allocation7 + $0x160] sm:$0xff] }
 0x562   : > { %v4535_v45 = vadd.f32 %v4534_v18, %v4533_v38  ;;  %v9099_v30 = vadd.f32 %v4599_v21, %v8929_v49  ;;  %v4936_v39 = vrot.slane %v4935_v46, 1  ;;  %v4945_v26 = vadd.f32 %v4815_v53, %v4814_v24  ;;  %v5036_v12 = vld [vmem:[#allocation7 + $0x1a0] sm:$0xff] }
 0x563   : > { %v4877_v57 = vrot.slane %v4876_v16, 2  ;;  %v4942_v50 = vadd.f32 %v4941_v61, %v4940_v43  ;;  %v4872_v48 = vrot.slane %v4871_v34, 1  ;;  %v5948_v11 = vcombine.high %v5000_v1, %v5004_v54  ;;  %v5040_v15 = vld [vmem:[#allocation7 + $0x1c0] sm:$0xff] }
 0x564   : > { %v9102_v60 = vadd.f32 %v4535_v45, %v8931_v42  ;;  %v4937_v49 = vadd.f32 %v4936_v39, %v4935_v46  ;;  %v4881_v33 = vadd.f32 %v4831_v6, %v9089_v19  ;;  %v4946_v9 = vrot.slane %v4945_v26, 4  ;;  %v5044_v46 = vld [vmem:[#allocation7 + $0x1e0] sm:$0xff] }
 0x565   : > { %v4878_v32 = vadd.f32 %v4877_v57, %v4876_v16  ;;  %v4943_v10 = vrot.slane %v4942_v50, 1  ;;  %v4873_v40 = vadd.f32 %v4872_v48, %v4871_v34  ;;  %5446 = vmatprep.subr.bf16.mxu1 %v5948_v11  ;;  %v5955_v3 = vcombine.low %v5008_v2, %v5012_v37  ;;  %v4985_v57 = vld [vmem:[#allocation7 + $0x8] sm:$0xff] }
 0x566   : > { %v5956_v27 = vcombine.high %v5008_v2, %v5012_v37  ;;  %v4957_v42 = vadd.f32 %v4937_v49, %v8973_v41  ;;  %v4882_v17 = vrot.slane %v4881_v33, 4  ;;  %5447 = vmatpush1.bf16.msra.mxu1 %v5947_v35  ;;  %v4947_v4 = vadd.f32 %v4946_v9, %v4945_v26 }
 0x567   : > { %v4879_v28 = vrot.slane %v4878_v32, 1  ;;  %v4944_v25 = vadd.f32 %v4943_v10, %v4942_v50  ;;  %v6570_v36 = vpop.eup %6569  ;;  %v4893_v24 = vadd.f32 %v4873_v40, %v8976_v5  ;;  %v5964_v0 = vcombine.high %v5016_v14, %v5020_v47  ;;  %v4989_v50 = vld [vmem:[#allocation7 + $0x28] sm:$0xff] }
 0x568   : > { %5448 = vmatprep.subr.bf16.mxu1 %v5956_v27  ;;  %v4972_v19 = vmul.f32 %v6570_v36, %v4892_v31  ;;  %6571 = vrcp.f32 %v4957_v42  ;;  %v5101_v41 = vunpack.c.l.b16 %v4979_v55  ;;  %v4883_v52 = vadd.f32 %v4882_v17, %v4881_v33  ;;  %v4997_v40 = vld [vmem:[#allocation7 + $0x68] sm:$0xff] }
 0x569   : > { %v4880_v13 = vadd.f32 %v4879_v28, %v4878_v32  ;;  %v4958_v44 = vadd.f32 %v4944_v25, %v9065_v59  ;;  %v4948_v38 = vrot.slane %v4947_v4, 2  ;;  %v5963_v5 = vcombine.low %v5016_v14, %v5020_v47  ;;  %v5032_v59 = vld [vmem:[#allocation7 + $0x180] sm:$0xff]  ;;  %v4993_v47 = vld [vmem:[#allocation7 + $0x48] sm:$0xff] }
 0x56a   : > { %v4980_v56 = vpack.c.bf16 %v4972_v19, %v4972_v19  ;;  %5449 = vmatpush1.bf16.msra.mxu1 %v5955_v3  ;;  %v4884_v23 = vrot.slane %v4883_v52, 2  ;;  %v5972_v7 = vcombine.high %v5024_v8, %v5028_v63  ;;  %v6751_v18 = vmov 0   ;;  %v5001_v28 = vld [vmem:[#allocation7 + $0x88] sm:$0xff] }
 0x56b   : > { %v4894_v20 = vadd.f32 %v4880_v13, %v9068_v58  ;;  %6573 = vrcp.f32 %v4958_v44  ;;  %v4949_v31 = vadd.f32 %v4948_v38, %v4947_v4  ;;  %5450 = vmatprep.subr.bf16.mxu1 %v5964_v0  ;;  %5474 = vmatprep.mubr.bf16.mxu1 %v6751_v18  ;;  %v5971_v29 = vcombine.low %v5024_v8, %v5028_v63  ;;  %v5005_v25 = vld [vmem:[#allocation7 + $0xa8] sm:$0xff] }
 0x56c   : > { %v5102_v43 = vunpack.c.l.b16 %v4980_v56  ;;  %v4885_v1 = vadd.f32 %v4884_v23, %v4883_v52  ;;  %v5111_v55 = vsel %vm5110_vm3, %v5101_v41, %v8927_v22  ;;  %v5980_v62 = vcombine.high %v5032_v59, %v5036_v12  ;;  %v5013_v4 = vld [vmem:[#allocation7 + $0xe8] sm:$0xff] }
 0x56d   : > { %v4950_v54 = vrot.slane %v4949_v31, 1  ;;  %v5979_v45 = vcombine.low %v5032_v59, %v5036_v12  ;;  %v5988_v22 = vcombine.high %v5040_v15, %v5044_v46  ;;  %v5987_v37 = vcombine.low %v5040_v15, %v5044_v46  ;;  %v5017_v13 = vld [vmem:[#allocation7 + $0x108] sm:$0xff]  ;;  %v5002_v15 = vld [vmem:[#allocation7 + $0x90] sm:$0xff] }
 0x56e   : > { %5451 = vmatpush1.bf16.msra.mxu1 %v5963_v5  ;;  %v4886_v58 = vrot.slane %v4885_v1, 1  ;;  %v5113_v51 = vsel %vm5112_vm4, %v5102_v43, %v5111_v55  ;;  %v5933_v9 = vcombine.low %v4985_v57, %v4989_v50  ;;  %v5942_v42 = vcombine.high %v4993_v47, %v4997_v40  ;;  %v5021_v44 = vld [vmem:[#allocation7 + $0x128] sm:$0xff]  ;;  %v5006_v46 = vld [vmem:[#allocation7 + $0xb0] sm:$0xff] }
 0x56f   : > { %v4951_v21 = vadd.f32 %v4950_v54, %v4949_v31  ;;  %5452 = vmatprep.subr.bf16.mxu1 %v5972_v7  ;;  %v5941_v17 = vcombine.low %v4993_v47, %v4997_v40  ;;  %v5950_v36 = vcombine.high %v5001_v28, %v5005_v25  ;;  %v5949_v0 = vcombine.low %v5001_v28, %v5005_v25  ;;  %v5025_v41 = vld [vmem:[#allocation7 + $0x148] sm:$0xff]  ;;  %v4990_v54 = vld [vmem:[#allocation7 + $0x30] sm:$0xff]  ;;  %v4991_v47 = vld [vmem:[#allocation7 + $0x38] sm:$0xff] }
 0x570   : > { %v4887_v16 = vadd.f32 %v4886_v58, %v4885_v1  ;;  %v5966_v63 = vcombine.high %v5017_v13, %v5021_v44  ;;  %v5029_v52 = vld [vmem:[#allocation7 + $0x168] sm:$0xff]  ;;  %v5965_v38 = vcombine.low %v5017_v13, %v5021_v44  ;;  %v4986_v1 = vld [vmem:[#allocation7 + $0x10] sm:$0xff] }
 0x571   : > { %v4959_v61 = vadd.f32 %v4951_v21, %v9099_v30  ;;  %v5934_v30 = vcombine.high %v4985_v57, %v4989_v50  ;;  %v5974_v56 = vcombine.high %v5025_v41, %v5029_v52  ;;  %v5037_v5 = vld [vmem:[#allocation7 + $0x1a8] sm:$0xff]  ;;  %v5973_v23 = vcombine.low %v5025_v41, %v5029_v52  ;;  %v4994_v58 = vld [vmem:[#allocation7 + $0x50] sm:$0xff] }
 0x572   : > { %v6572_v53 = vpop.eup %6571  ;;  %5453 = vmatpush1.bf16.msra.mxu1 %v5971_v29  ;;  %v4895_v35 = vadd.f32 %v4887_v16, %v9102_v60  ;;  %v5041_v7 = vld [vmem:[#allocation7 + $0x1c8] sm:$0xff]  ;;  %v5936_v55 = vcombine.high %v4986_v1, %v4990_v54  ;;  %v4998_v21 = vld [vmem:[#allocation7 + $0x70] sm:$0xff] }
 0x573   : > { %v4973_v34 = vmul.f32 %v6572_v53, %v4893_v24  ;;  %6575 = vrcp.f32 %v4959_v61  ;;  %5454 = vmatprep.subr.bf16.mxu1 %v5980_v62  ;;  %v5009_v24 = vld [vmem:[#allocation7 + $0xc8] sm:$0xff]  ;;  %v5935_v62 = vcombine.low %v4986_v1, %v4990_v54  ;;  %v5943_v16 = vcombine.low %v4994_v58, %v4998_v21  ;;  %v5010_v53 = vld [vmem:[#allocation7 + $0xd0] sm:$0xff] }
 0x574   : > { %v5958_v19 = vcombine.high %v5009_v24, %v5013_v4  ;;  %v5957_v8 = vcombine.low %v5009_v24, %v5013_v4  ;;  %v5045_v43 = vld [vmem:[#allocation7 + $0x1e8] sm:$0xff]  ;;  %v5952_v61 = vcombine.high %v5002_v15, %v5006_v46 }
 0x575   : > { %v6574_v39 = vpop.eup %6573  ;;  %v4981_v6 = vpack.c.bf16 %v4973_v34, %v4973_v34  ;;  %v5990_v12 = vcombine.high %v5041_v7, %v5045_v43  ;;  %v5989_v29 = vcombine.low %v5041_v7, %v5045_v43  ;;  %v5951_v34 = vcombine.low %v5002_v15, %v5006_v46  ;;  %v5043_v43 = vld [vmem:[#allocation7 + $0x1d8] sm:$0xff] }
 0x576   : > { %v4974_v2 = vmul.f32 %v6574_v39, %v4894_v20  ;;  %5455 = vmatpush1.bf16.msra.mxu1 %v5979_v45  ;;  %v5033_v20 = vld [vmem:[#allocation7 + $0x188] sm:$0xff]  ;;  %v5014_v45 = vld [vmem:[#allocation7 + $0xf0] sm:$0xff] }
 0x577   : > { %v5103_v48 = vunpack.c.l.b16 %v4981_v6  ;;  %5456 = vmatprep.subr.bf16.mxu1 %v5988_v22  ;;  %v5982_v31 = vcombine.high %v5033_v20, %v5037_v5  ;;  %v5981_v59 = vcombine.low %v5033_v20, %v5037_v5  ;;  %v5018_v22 = vld [vmem:[#allocation7 + $0x110] sm:$0xff]  ;;  %v5959_v57 = vcombine.low %v5010_v53, %v5014_v45  ;;  %v5035_v5 = vld [vmem:[#allocation7 + $0x198] sm:$0xff] }
 0x578   : > { %v4982_v26 = vpack.c.bf16 %v4974_v2, %v4974_v2  ;;  %v5022_v39 = vld [vmem:[#allocation7 + $0x130] sm:$0xff] }
 0x579   : > { %v5115_v49 = vsel %vm5114_vm5, %v5103_v48, %v5113_v51  ;;  %v5944_v51 = vcombine.high %v4994_v58, %v4998_v21  ;;  %v5968_v50 = vcombine.high %v5018_v22, %v5022_v39  ;;  %v5026_v6 = vld [vmem:[#allocation7 + $0x150] sm:$0xff]  ;;  %v9819_v21 = vld [vmem:[#allocation13_spill] sm:$0xff] }
 0x57a   : > { %v5104_v11 = vunpack.c.l.b16 %v4982_v26  ;;  %5457 = vmatpush1.bf16.msra.mxu1 %v5987_v37  ;;  %v5030_v2 = vld [vmem:[#allocation7 + $0x170] sm:$0xff]  ;;  %v5967_v37 = vcombine.low %v5018_v22, %v5022_v39 }
 0x57b   : > { %5483 = vmatprep.subr.bf16.mxu1 %v5934_v30  ;;  %v5976_v48 = vcombine.high %v5026_v6, %v5030_v2  ;;  %v5034_v26 = vld [vmem:[#allocation7 + $0x190] sm:$0xff] }
 0x57c   : > { %v5117_v60 = vsel %vm5116_vm6, %v5104_v11, %v5115_v49  ;;  %v5038_v30 = vld [vmem:[#allocation7 + $0x1b0] sm:$0xff]  ;;  %v5975_v11 = vcombine.low %v5026_v6, %v5030_v2 }
 0x57d   : > { %v6576_v32 = vpop.eup %6575  ;;  %v5984_v49 = vcombine.high %v5034_v26, %v5038_v30  ;;  %v9820_v22 = vld [vmem:[#allocation14_spill] sm:$0xff] }
 0x57e   : > { %v4975_v10 = vmul.f32 %v6576_v32, %v4895_v35  ;;  %v5960_v35 = vcombine.high %v5010_v53, %v5014_v45  ;;  %v5046_v32 = vld [vmem:[#allocation7 + $0x1f0] sm:$0xff]  ;;  %v6577_v53 = vld [vmem:[%s6958_s23] sm:$0xff] }
 0x580   : > { %v4983_v33 = vpack.c.bf16 %v4975_v10, %v4975_v10  ;;  %v5983_v10 = vcombine.low %v5034_v26, %v5038_v30  ;;  %v6579_v30 = vld [vmem:[%s6958_s23 + $0x10] sm:$0xff] }
 0x582   : > { %v5105_v14 = vunpack.c.l.b16 %v4983_v33 }
 0x584   : > { %v5119_v3 = vsel %vm5118_vm7, %v5105_v14, %v5117_v60  ;;  %v5042_v60 = vld [vmem:[#allocation7 + $0x1d0] sm:$0xff]  ;;  %v4987_v14 = vld [vmem:[#allocation7 + $0x18] sm:$0xff] }
 0x585   : > { %v9118_v27 = vpack.c.b16 %v5119_v3, %v5119_v3  ;;  %v5992_v33 = vcombine.high %v5042_v60, %v5046_v32  ;;  %v5991_v40 = vcombine.low %v5042_v60, %v5046_v32  ;;  %v4995_v3 = vld [vmem:[#allocation7 + $0x58] sm:$0xff]  ;;  %v5937_v28 = vcombine.low %v4987_v14, %v4991_v47 }
 0x586   : > { %v6580_v60 = vld [vmem:[%s6958_s23 + $0x18] sm:$0xff] }
 0x587   : > { %5475 = vmatmul.mubr.bf16.vlgmr.msra.gmra.mrb[16].mxu1 %v9118_v27 }
 0x588   : > { %5484 = vmatpush1.bf16.msra.mxu1 %v5933_v9  ;;  %5515 = vmatprep.mubr.bf16.mxu1 %v6751_v18  ;;  %v5938_v9 = vcombine.high %v4987_v14, %v4991_v47  ;;  %v9823_v14 = vld [vmem:[#allocation19_spill] sm:$0xff] }
 0x589   : > { %5485 = vmatprep.subr.bf16.mxu1 %v5942_v42  ;;  %v4999_v42 = vld [vmem:[#allocation7 + $0x78] sm:$0xff] }
 0x58a   : > { %v5946_v25 = vcombine.high %v4995_v3, %v4999_v42  ;;  %v5945_v24 = vcombine.low %v4995_v3, %v4999_v42 }
 0x58c   : > { %5486 = vmatpush1.bf16.msra.mxu1 %v5941_v17  ;;  %v5003_v17 = vld [vmem:[#allocation7 + $0x98] sm:$0xff] }
 0x58d   : > { %5487 = vmatprep.subr.bf16.mxu1 %v5950_v36  ;;  %v5007_v36 = vld [vmem:[#allocation7 + $0xb8] sm:$0xff] }
 0x58e   : > { %v5954_v4 = vcombine.high %v5003_v17, %v5007_v36  ;;  %v5953_v13 = vcombine.low %v5003_v17, %v5007_v36 }
 0x590   : > { %5488 = vmatpush1.bf16.msra.mxu1 %v5949_v0  ;;  %v5011_v0 = vld [vmem:[#allocation7 + $0xd8] sm:$0xff] }
 0x591   : > { %5489 = vmatprep.subr.bf16.mxu1 %v5958_v19  ;;  %v5015_v19 = vld [vmem:[#allocation7 + $0xf8] sm:$0xff] }
 0x592   : > { %v5962_v44 = vcombine.high %v5011_v0, %v5015_v19  ;;  %v5961_v41 = vcombine.low %v5011_v0, %v5015_v19  ;;  %v9824_v0 = vld [vmem:[#allocation21_spill] sm:$0xff] }
 0x594   : > { %5490 = vmatpush1.bf16.msra.mxu1 %v5957_v8  ;;  %v5019_v8 = vld [vmem:[#allocation7 + $0x118] sm:$0xff] }
 0x595   : > { %5491 = vmatprep.subr.bf16.mxu1 %v5966_v63  ;;  %v5023_v63 = vld [vmem:[#allocation7 + $0x138] sm:$0xff] }
 0x596   : > { %v5970_v52 = vcombine.high %v5019_v8, %v5023_v63  ;;  %v5969_v20 = vcombine.low %v5019_v8, %v5023_v63 }
 0x598   : > { %5492 = vmatpush1.bf16.msra.mxu1 %v5965_v38  ;;  %v5027_v38 = vld [vmem:[#allocation7 + $0x158] sm:$0xff] }
 0x599   : > { %5493 = vmatprep.subr.bf16.mxu1 %v5974_v56  ;;  %v5031_v56 = vld [vmem:[#allocation7 + $0x178] sm:$0xff] }
 0x59c   : > { %5494 = vmatpush1.bf16.msra.mxu1 %v5973_v23  ;;  %v5039_v23 = vld [vmem:[#allocation7 + $0x1b8] sm:$0xff] }
 0x59d   : > { %5495 = vmatprep.subr.bf16.mxu1 %v5982_v31  ;;  %v5977_v31 = vcombine.low %v5027_v38, %v5031_v56  ;;  %v5986_v7 = vcombine.high %v5035_v5, %v5039_v23 }
 0x5a0   : > { %5496 = vmatpush1.bf16.msra.mxu1 %v5981_v59  ;;  %v5047_v59 = vld [vmem:[#allocation7 + $0x1f8] sm:$0xff] }
 0x5a1   : > { %5497 = vmatprep.subr.bf16.mxu1 %v5990_v12  ;;  %v5985_v12 = vcombine.low %v5035_v5, %v5039_v23  ;;  %v5994_v1 = vcombine.high %v5043_v43, %v5047_v59  ;;  %v5993_v54 = vcombine.low %v5043_v43, %v5047_v59  ;;  %v6584_v5 = vld [vmem:[%s6958_s23 + $0x38] sm:$0xff] }
 0x5a4   : > { %5498 = vmatpush1.bf16.msra.mxu1 %v5989_v29  ;;  %v5048_v29 = vld [vmem:[%s9211_s4] sm:$0xff] }
 0x5a5   : > { %5524 = vmatprep.subr.bf16.mxu1 %v5936_v55  ;;  %v9818_v55 = vld [vmem:[#allocation12_spill] sm:$0xff]  ;;  %v5061_v39 = vrot.slane %v5048_v29, %v9820_v22  ;;  %v5073_v47 = vrot.slane %v5048_v29, %v9823_v14  ;;  %v5077_v19 = vrot.slane %v5048_v29, %v9824_v0 }
 0x5a6   : > { %v5053_v58 = vrot.slane %v5048_v29, %v9818_v55 }
 0x5a7   : > { %5516 = vmatmul.mubr.bf16.vlgmr.msra.gmra.mrb[20].mxu1 %v9118_v27 }
 0x5a8   : > { %5525 = vmatpush1.bf16.msra.mxu1 %v5935_v62  ;;  %5556 = vmatprep.mubr.bf16.mxu1 %v6751_v18  ;;  %v5057_v62 = vrot.slane %v5048_v29, %v9819_v21 }
 0x5a9   : > { %5526 = vmatprep.subr.bf16.mxu1 %v5944_v51 }
 0x5ac   : > { %5527 = vmatpush1.bf16.msra.mxu1 %v5943_v16 }
 0x5ad   : > { %5528 = vmatprep.subr.bf16.mxu1 %v5952_v61 }
 0x5b0   : > { %5529 = vmatpush1.bf16.msra.mxu1 %v5951_v34 }
 0x5b1   : > { %5530 = vmatprep.subr.bf16.mxu1 %v5960_v35  ;;  %v6578_v35 = vld [vmem:[%s6958_s23 + $0x8] sm:$0xff] }
 0x5b4   : > { %5531 = vmatpush1.bf16.msra.mxu1 %v5959_v57  ;;  %v9821_v57 = vld [vmem:[#allocation15_spill] sm:$0xff] }
 0x5b5   : > { %5532 = vmatprep.subr.bf16.mxu1 %v5968_v50  ;;  %v5065_v50 = vrot.slane %v5048_v29, %v9821_v57 }
 0x5b8   : > { %5533 = vmatpush1.bf16.msra.mxu1 %v5967_v37 }
 0x5b9   : > { %5534 = vmatprep.subr.bf16.mxu1 %v5976_v48 }
 0x5bc   : > { %5535 = vmatpush1.bf16.msra.mxu1 %v5975_v11 }
 0x5bd   : > { %5536 = vmatprep.subr.bf16.mxu1 %v5984_v49 }
 0x5c0   : > { %5537 = vmatpush1.bf16.msra.mxu1 %v5983_v10  ;;  %v9822_v10 = vld [vmem:[#allocation17_spill] sm:$0xff] }
 0x5c1   : > { %5538 = vmatprep.subr.bf16.mxu1 %v5992_v33  ;;  %v5069_v33 = vrot.slane %v5048_v29, %v9822_v10 }
 0x5c4   : > { %5539 = vmatpush1.bf16.msra.mxu1 %v5991_v40 }
 0x5c5   : > { %5565 = vmatprep.subr.bf16.mxu1 %v5938_v9 }
 0x5c7   : > { %5557 = vmatmul.mubr.bf16.vlgmr.msra.gmra.mrb[24].mxu1 %v9118_v27 }
 0x5c8   : > { %5566 = vmatpush1.bf16.msra.mxu1 %v5937_v28  ;;  %5597 = vmatprep.mubr.bf16.mxu1 %v6751_v18  ;;  %v5978_v18 = vcombine.high %v5027_v38, %v5031_v56  ;;  %v6583_v56 = vld [vmem:[%s6958_s23 + $0x30] sm:$0xff] }
 0x5c9   : > { %5567 = vmatprep.subr.bf16.mxu1 %v5946_v25  ;;  %v6581_v25 = vld [vmem:[%s6958_s23 + $0x20] sm:$0xff] }
 0x5cc   : > { %5568 = vmatpush1.bf16.msra.mxu1 %v5945_v24  ;;  %v6582_v24 = vld [vmem:[%s6958_s23 + $0x28] sm:$0xff] }
 0x5cd   : > { %5569 = vmatprep.subr.bf16.mxu1 %v5954_v4 }
 0x5d0   : > { %5570 = vmatpush1.bf16.msra.mxu1 %v5953_v13  ;;  %v9825_v13 = vld [vmem:[#allocation23_spill] sm:$0xff] }
 0x5d1   : > { %5571 = vmatprep.subr.bf16.mxu1 %v5962_v44  ;;  %v5081_v44 = vrot.slane %v5048_v29, %v9825_v13 }
 0x5d4   : > { %5572 = vmatpush1.bf16.msra.mxu1 %v5961_v41 }
 0x5d5   : > { %5573 = vmatprep.subr.bf16.mxu1 %v5970_v52 }
 0x5d8   : > { %5574 = vmatpush1.bf16.msra.mxu1 %v5969_v20 }
 0x5d9   : > { %5575 = vmatprep.subr.bf16.mxu1 %v5978_v18 }
 0x5dc   : > { %5576 = vmatpush1.bf16.msra.mxu1 %v5977_v31 }
 0x5dd   : > { %5577 = vmatprep.subr.bf16.mxu1 %v5986_v7 }
 0x5e0   : > { %5578 = vmatpush1.bf16.msra.mxu1 %v5985_v12 }
 0x5e1   : > { %5579 = vmatprep.subr.bf16.mxu1 %v5994_v1 }
 0x5e4   : > { %5580 = vmatpush1.bf16.msra.mxu1 %v5993_v54 }
 0x5e7   : > { %5598 = vmatmul.mubr.bf16.vlgmr.msra.gmra.mrb[28].mxu1 %v9118_v27 }
 0x65a   : > { %v5476_v51 = vpop.f32.mrb[16].mxu1 }
 0x65b   : > { %v5477_v15 = vadd.f32 %v5476_v51, %v5053_v58  ;;  %v5478_v46 = vpop.f32.mrb[17].mxu1 }
 0x65c   : > { %v5479_v16 = vadd.f32 %v5478_v46, %v5057_v62  ;;  %v5480_v61 = vpop.f32.mrb[18].mxu1 }
 0x65d   : > { %v5606_v45 = vadd.f32 %v6577_v53, %v5477_v15  ;;  %v5481_v34 = vpop.f32.mrb[19].mxu1 }
 0x65e   : > { %v5607_v27 = vadd.f32 %v6578_v35, %v5479_v16 }
 0x65f   : > { %5614 = vst [vmem:[%s9136_s12] sm:$0xff] %v5606_v45 }
 0x660   : > { %5615 = vst [vmem:[%s9136_s12 + $0x8] sm:$0xff] %v5607_v27 }
 0x67a   : > { %v5517_v6 = vpop.f32.mrb[20].mxu1 }
 0x67b   : > { %v5518_v2 = vadd.f32 %v5517_v6, %v5061_v39  ;;  %v5519_v37 = vpop.f32.mrb[21].mxu1 }
 0x67c   : > { %v5520_v48 = vadd.f32 %v5519_v37, %v5065_v50  ;;  %v5521_v26 = vpop.f32.mrb[22].mxu1 }
 0x67d   : > { %v5608_v11 = vadd.f32 %v6579_v30, %v5518_v2  ;;  %v5522_v49 = vpop.f32.mrb[23].mxu1 }
 0x67e   : > { %v5609_v32 = vadd.f32 %v6580_v60, %v5520_v48 }
 0x67f   : > { %5616 = vst [vmem:[%s9136_s12 + $0x10] sm:$0xff] %v5608_v11 }
 0x680   : > { %5617 = vst [vmem:[%s9136_s12 + $0x18] sm:$0xff] %v5609_v32 }
 0x69a   : > { %v5558_v40 = vpop.f32.mrb[24].mxu1 }
 0x69b   : > { %v5559_v9 = vadd.f32 %v5558_v40, %v5069_v33  ;;  %v5560_v3 = vpop.f32.mrb[25].mxu1 }
 0x69c   : > { %v5561_v42 = vadd.f32 %v5560_v3, %v5073_v47  ;;  %v5562_v28 = vpop.f32.mrb[26].mxu1 }
 0x69d   : > { %v5610_v17 = vadd.f32 %v6581_v25, %v5559_v9  ;;  %v5563_v36 = vpop.f32.mrb[27].mxu1 }
 0x69e   : > { %v5611_v4 = vadd.f32 %v6582_v24, %v5561_v42 }
 0x69f   : > { %5618 = vst [vmem:[%s9136_s12 + $0x20] sm:$0xff] %v5610_v17 }
 0x6a0   : > { %5619 = vst [vmem:[%s9136_s12 + $0x28] sm:$0xff] %v5611_v4 }
 0x6ba   : > { %v5599_v8 = vpop.f32.mrb[28].mxu1 }
 0x6bb   : > { %v5600_v63 = vadd.f32 %v5599_v8, %v5077_v19  ;;  %v5601_v41 = vpop.f32.mrb[29].mxu1 }
 0x6bc   : > { %v5602_v52 = vadd.f32 %v5601_v41, %v5081_v44  ;;  %v5603_v38 = vpop.f32.mrb[30].mxu1 }
 0x6bd   : > { %v5612_v20 = vadd.f32 %v6583_v56, %v5600_v63  ;;  %v5604_v18 = vpop.f32.mrb[31].mxu1 }
 0x6be   : > { %v5613_v23 = vadd.f32 %v6584_v5, %v5602_v52 }
 0x6bf   : > { %5620 = vst [vmem:[%s9136_s12 + $0x30] sm:$0xff] %v5612_v20 }
 0x6c0   : > { %5621 = vst [vmem:[%s9136_s12 + $0x38] sm:$0xff] %v5613_v23 }
 0x6c1   : > { %6684 = shalt.err (!%p6681_p2)
}
 0x6c2   : > { %s6685_s14 = scalar_lea.hbm %s9161_s8, 1024  ;;  %s6689_s26 = scalar_lea.hbm %s9212_s5, 2048 }
 0x6c3   : > { %p6686_p13 = scmp.ne.s32.totalorder %s9161_s8, %s6685_s14  ;;  %p6690_p4 = scmp.lt.u32.totalorder %s9161_s8, %s9212_s5 }
 0x6c4   : > { %p6691_p7 = scmp.lt.u32.totalorder %s6689_s26, %s6685_s14  ;;  %p6693_p11 = scmp.lt.u32.totalorder %s6685_s14, %s9161_s8 }
 0x6c5   : > { %p6687_p6 = pnand %p6686_p13, %p9826_p0 }
 0x6c6   : > { %p6692_p8 = por %p6691_p7, %p6690_p4 }
 0x6c7   : > { %p6688_p10 = pneg %p6687_p6 }
 0x6c8   : > { %p6694_p1 = por %p6693_p11, %p6692_p8 }
 0x6ca   : > { %p6695_p3 = pnand %p6694_p1, %p6688_p10 }
 0x6cc   : > { %6698 = shalt.err (!%p6695_p3)
}
 0x6cd   : > { %6114 = dma.vmem_to_hbm [thread:$0]  (%p9826_p0), %s9163_s7, 1024, %s9161_s8, %s5623_s22  }
 0x6ce PF: > { %s5649_s12 = sand.u32 1, %s6729_s18   ;;  %p9827_p5 = scmp.ne.s32.totalorder %s9348_s25, 0 }
 0x6cf   : > { %p9828_p9 = scmp.ge.s32.totalorder %s6741_s21, 2  ;;  %s5650_s13 = scalar_lea.sflag [#allocation4], %s5649_s12 }
 0x6d1   : > { %p6128_p12 = pnand %p9828_p9, %p9827_p5 }
 0x6d3   : > { %6724 = dma.done.wait (!%p6128_p12), %s5650_s13, 1024  }
 0x6d4   : > { %6726 = vsyncadd (!%p6128_p12), %s5650_s13, 4294966272  ;;  %p19_p2 = scmp.ge.s32.totalorder %s6893_s16, 4   ;;  %s9829_s18 = smov %s6733_s19 }
 0x6d5   : > { %s9830_s19 = smov %s6737_s20  ;;  %s9831_s20 = smov %s6902_s27 }
 0x6d6   : > { %s9832_s21 = smov %s6893_s16  ;;  %21 = sbr.rel (!%p19_p2) target bundleno = 6 (0x6), region = 93 }
 0x6dd   :  { %5655 = vsyncpa [#allocation3], 1 }
 0x6de   :  { %5657 = vsyncpa [#allocation3 + $0x1], 1 }
 0x6df   :  { %5658 = vsyncpa [#allocation6], 1 }
 0x6e0   :  { %5659 = vsyncpa [#allocation4], 1 }
 0x6e1   :  { %5661 = vsyncpa [#allocation4 + $0x1], 1 }

</bundles_post_ra>
